<compile_context>
chip_gen: v5e
topology: v5e:2x2
jax: 0.10.0
libtpu: 0.0.40
codegen_flags: <defaults>
</compile_context>

<pallas_src>
import math
import numpy as np
import jax
import jax.numpy as jnp
from jax.experimental import pallas as pl
from jax.experimental.pallas import tpu as pltpu


# ------------------------------ fused Pallas kernel -------------------------------

def _wrn_fused_kernel(x_ref, ta_ref, sb_ref, tb_ref, pool_ref,
                      m0_ref, m11_ref, m12_ref, m21_ref, m22_ref,
                      msc_ref, g_ref, scales_ref, shifts_ref, fcb_ref,
                      out_ref):
    f32, bf16 = jnp.float32, jnp.bfloat16
    scales = scales_ref[...]                  # (5, 256) f32
    shifts = shifts_ref[...]                  # (5, 256) f32

    def conv(act, row_ref, col_ref):
        """3x3 conv in planar layout:  sum_dy RowShift[dy] @ act @ ColWeight[dy]."""
        acc = None
        for dy in range(3):
            shifted = jnp.dot(row_ref[dy], act,
                              preferred_element_type=f32).astype(bf16)
            part = jnp.dot(shifted, col_ref[dy], preferred_element_type=f32)
            acc = part if acc is None else acc + part
        return acc                            # f32 accumulator

    def bn_relu(v, i):
        return jnp.maximum(v * scales[i:i + 1, :] + shifts[i:i + 1, :], 0.0)

    x = x_ref[...]                                        # (N*16, 16*3) bf16
    h0 = conv(x, ta_ref, m0_ref)                          # stem conv -> (N*16, 256) f32

    # ---- BasicBlock(16 -> 16, stride 1), equal_inout ----
    o = bn_relu(h0, 0).astype(bf16)
    o = conv(o, ta_ref, m11_ref)
    o = bn_relu(o, 1).astype(bf16)
    o = conv(o, ta_ref, m12_ref)                          # drop_rate=0.0 -> dropout no-op
    h1 = h0 + o                                           # residual add (fused)

    # ---- BasicBlock(16 -> 32, stride 2), conv shortcut ----
    x2 = bn_relu(h1, 2).astype(bf16)                      # (N*16, 256)
    o = conv(x2, sb_ref, m21_ref)                         # stride-2 conv1 -> (N*8, 256)
    o = bn_relu(o, 3).astype(bf16)
    o = conv(o, tb_ref, m22_ref)                          # conv2 -> (N*8, 256)
    s = jnp.dot(sb_ref[1], x2, preferred_element_type=f32).astype(bf16)
    s = jnp.dot(s, msc_ref[...], preferred_element_type=f32)     # 1x1 stride-2 shortcut
    h2 = s + o                                            # residual add (fused)

    # ---- final BN + ReLU, global average pool, linear head (fused) ----
    f = bn_relu(h2, 4).astype(bf16)                       # (N*8, 256)
    pooled = jnp.dot(pool_ref[...], f, preferred_element_type=f32)       # (N, 256)
    logits = jnp.dot(pooled.astype(bf16), g_ref[...],
                     preferred_element_type=f32) + fcb_ref[...]          # (N, 10)
    out_ref[...] = logits


# --------------------------- parameter folding (one-time) --------------------------

def _make_col_mats(w, w_in, w_out, stride, pad):
    """Fold dx taps + W padding/stride + channel contraction into per-dy matrices.
    w: (Cout, Cin, KH, KW) PyTorch layout -> (KH, w_in*Cin, w_out*Cout) bf16."""
    cout, cin, kh, kw = w.shape
    wt = jnp.transpose(w, (2, 3, 1, 0))                  # (KH, KW, Cin, Cout)
    sel = np.zeros((kw, w_in, w_out), np.float32)
    for dx in range(kw):
        for wp in range(w_out):
            ws = stride * wp + dx - pad
            if 0 <= ws < w_in:
                sel[dx, ws, wp] = 1.0
    m = jnp.einsum('xab,yxio->yaibo', jnp.asarray(sel), wt)
    return m.reshape(kh, w_in * cin, w_out * cout).astype(jnp.bfloat16)


def _make_row_mats(n, h_in, h_out, stride, pad, kh):
    """Block-diagonal (over batch) row-selection matrices handling the dy taps,
    H padding and H stride.  -> (kh, n*h_out, n*h_in) bf16 of 0/1 entries."""
    mats = np.zeros((kh, n * h_out, n * h_in), np.float32)
    for dy in range(kh):
        blk = np.zeros((h_out, h_in), np.float32)
        for hp in range(h_out):
            hs = stride * hp + dy - pad
            if 0 <= hs < h_in:
                blk[hp, hs] = 1.0
        mats[dy] = np.kron(np.eye(n, dtype=np.float32), blk)
    return jnp.asarray(mats, dtype=jnp.bfloat16)


def _bn_fold(bn, width, eps=1e-5):
    scale = bn["gamma"] / jnp.sqrt(bn["var"] + eps)
    shift = bn["beta"] - bn["mean"] * scale
    return jnp.tile(scale, width), jnp.tile(shift, width)        # (width * C,)


def prepare_params(params, batch):
    """One-time folding of PyTorch-layout weights into the planar kernel operands."""
    p = {}
    # row-shift / row-selection / pooling matrices (shape-only constants)
    p["TA"] = _make_row_mats(batch, 16, 16, 1, 1, 3)     # (3, N*16, N*16)
    p["SB"] = _make_row_mats(batch, 16, 8, 2, 1, 3)      # (3, N*8,  N*16)
    p["TB"] = _make_row_mats(batch, 8, 8, 1, 1, 3)       # (3, N*8,  N*8)
    p["POOL"] = jnp.asarray(
        np.kron(np.eye(batch, dtype=np.float32),
                np.full((1, 8), 1.0 / 64.0, np.float32)),
        dtype=jnp.bfloat16)                               # (N, N*8), includes 1/(8*8)

    # Toeplitz-expanded conv weights (dx taps folded into the lane dimension)
    b1, b2 = params["b1"], params["b2"]
    p["M0"] = _make_col_mats(params["conv0"], 16, 16, 1, 1)      # (3, 48, 256)
    p["M11"] = _make_col_mats(b1["conv1"], 16, 16, 1, 1)         # (3, 256, 256)
    p["M12"] = _make_col_mats(b1["conv2"], 16, 16, 1, 1)
    p["M21"] = _make_col_mats(b2["conv1"], 16, 8, 2, 1)          # stride-2
    p["M22"] = _make_col_mats(b2["conv2"], 8, 8, 1, 1)
    p["MSC"] = _make_col_mats(b2["shortcut"], 16, 8, 2, 0)[0]    # 1x1 -> (256, 256)

    # BN folded to scale/shift, tiled across W so they broadcast over (w, c) lanes
    scs, shs = [], []
    for bn, w in ((b1["bn1"], 16), (b1["bn2"], 16), (b2["bn1"], 16),
                  (b2["bn2"], 8), (params["bn_final"], 8)):
        sc, sh = _bn_fold(bn, w)
        scs.append(sc)
        shs.append(sh)
    p["scales"] = jnp.stack(scs).astype(jnp.float32)             # (5, 256)
    p["shifts"] = jnp.stack(shs).astype(jnp.float32)             # (5, 256)

    # average-pool-over-W + linear head folded into one (8*32, num_classes) matrix
    p["G"] = jnp.tile(params["fc_w"].T[None, :, :], (8, 1, 1)
                      ).reshape(8 * 32, -1).astype(jnp.bfloat16)
    p["fcb"] = params["fc_b"].reshape(1, -1).astype(jnp.float32)
    return p


# ------------------------------------ forward --------------------------------------

def wide_resnet_forward(prep, x_nchw):
    n = x_nchw.shape[0]
    # NCHW -> planar (rows = n*h, lanes = w*c); tiny one-time layout op on the input
    x = jnp.transpose(x_nchw, (0, 2, 3, 1)).reshape(n * 16, 16 * 3).astype(jnp.bfloat16)
    args = (x, prep["TA"], prep["SB"], prep["TB"], prep["POOL"],
            prep["M0"], prep["M11"], prep["M12"], prep["M21"], prep["M22"],
            prep["MSC"], prep["G"], prep["scales"], prep["shifts"], prep["fcb"])
    num_classes = prep["fcb"].shape[1]
    logits = pl.pallas_call(
        _wrn_fused_kernel,
        out_shape=jax.ShapeDtypeStruct((n, num_classes), jnp.float32),
        in_specs=[pl.BlockSpec(memory_space=pltpu.MemorySpace.VMEM)] * len(args),
        out_specs=pl.BlockSpec(memory_space=pltpu.MemorySpace.VMEM),
    )(*args)
    # TODO(synk): forward() in the reference also sets output['loss'] = make_loss(...),
    # but make_loss is not defined in the provided module; only 'target' is produced.
    return {"target": logits}


# --------------------------------- parameter init -----------------------------------

def _conv_init(key, cout, cin, kh, kw):
    n = kh * kw * cout
    return (jax.random.normal(key, (cout, cin, kh, kw), jnp.float32)
            * math.sqrt(2.0 / n))


def _bn_init(key, c):
    k1, k2, k3, k4 = jax.random.split(key, 4)
    return {"gamma": 1.0 + 0.1 * jax.random.normal(k1, (c,), jnp.float32),
            "beta": 0.1 * jax.random.normal(k2, (c,), jnp.float32),
            "mean": 0.1 * jax.random.normal(k3, (c,), jnp.float32),
            "var": jax.random.uniform(k4, (c,), jnp.float32, 0.5, 1.5)}


def init_params(key, in_ch=3, num_classes=10):
    # WideResNet(data_size=(3,16,16), num_classes=10, depth=7, widen=1, drop=0.0)
    # -> num_down=1, hidden_size=[16,16,32], n=1 BasicBlock per NetworkBlock.
    ks = jax.random.split(key, 16)
    p = {}
    p["conv0"] = _conv_init(ks[0], 16, in_ch, 3, 3)
    # NetworkBlock 1: BasicBlock(16 -> 16, stride=1), equal_inout = True
    p["b1"] = {"bn1": _bn_init(ks[1], 16),
               "conv1": _conv_init(ks[2], 16, 16, 3, 3),
               "bn2": _bn_init(ks[3], 16),
               "conv2": _conv_init(ks[4], 16, 16, 3, 3)}
    # NetworkBlock 2: BasicBlock(16 -> 32, stride=2), equal_inout = False
    p["b2"] = {"bn1": _bn_init(ks[5], 16),
               "conv1": _conv_init(ks[6], 32, 16, 3, 3),
               "bn2": _bn_init(ks[7], 32),
               "conv2": _conv_init(ks[8], 32, 32, 3, 3),
               "shortcut": _conv_init(ks[9], 32, 16, 1, 1)}
    p["bn_final"] = _bn_init(ks[10], 32)
    p["fc_w"] = (jax.random.normal(ks[11], (num_classes, 32), jnp.float32)
                 * (1.0 / math.sqrt(32.0)))
    p["fc_b"] = 0.01 * jax.random.normal(ks[12], (num_classes,), jnp.float32)
    return p


# ---------------------------------------- main ---------------------------------------

if __name__ == "__main__":
    key = jax.random.PRNGKey(0)
    k_param, k_data = jax.random.split(key)
    params = init_params(k_param, in_ch=3, num_classes=10)
    x = jax.random.normal(k_data, (2, 3, 16, 16), jnp.float32)   # NCHW, data_size=(3,16,16)

    prep = prepare_params(params, batch=2)                       # one-time weight folding
    fwd = jax.jit(wide_resnet_forward)
    out = fwd(prep, x)
    jax.block_until_ready(out["target"])
    assert out["target"].shape == (2, 10)
    assert bool(jnp.all(jnp.isfinite(out["target"])))
    print("KERNEL_OK")
</pallas_src>

<mosaic_0001>
module attributes {stable_mosaic.version = 11 : i64} {
  func.func @_wrn_fused_kernel(%arg0: memref<32x48xbf16, #tpu.memory_space<vmem>>, %arg1: memref<3x32x32xbf16, #tpu.memory_space<vmem>>, %arg2: memref<3x16x32xbf16, #tpu.memory_space<vmem>>, %arg3: memref<3x16x16xbf16, #tpu.memory_space<vmem>>, %arg4: memref<2x16xbf16, #tpu.memory_space<vmem>>, %arg5: memref<3x48x256xbf16, #tpu.memory_space<vmem>>, %arg6: memref<3x256x256xbf16, #tpu.memory_space<vmem>>, %arg7: memref<3x256x256xbf16, #tpu.memory_space<vmem>>, %arg8: memref<3x256x256xbf16, #tpu.memory_space<vmem>>, %arg9: memref<3x256x256xbf16, #tpu.memory_space<vmem>>, %arg10: memref<256x256xbf16, #tpu.memory_space<vmem>>, %arg11: memref<256x10xbf16, #tpu.memory_space<vmem>>, %arg12: memref<5x256xf32, #tpu.memory_space<vmem>>, %arg13: memref<5x256xf32, #tpu.memory_space<vmem>>, %arg14: memref<1x10xf32, #tpu.memory_space<vmem>>, %arg15: memref<2x10xf32, #tpu.memory_space<vmem>>) attributes {dimension_semantics = [], scalar_prefetch = 0 : i64, scratch_operands = 0 : i64, tpu.core_type = #tpu.core_type<tc>} {
    %c0 = arith.constant 0 : index
    %c0_0 = arith.constant 0 : index
    %0 = vector.load %arg12[%c0, %c0_0] : memref<5x256xf32, #tpu.memory_space<vmem>>, vector<5x256xf32>
    %c0_1 = arith.constant 0 : index
    %c0_2 = arith.constant 0 : index
    %1 = vector.load %arg13[%c0_1, %c0_2] : memref<5x256xf32, #tpu.memory_space<vmem>>, vector<5x256xf32>
    %c0_3 = arith.constant 0 : index
    %c0_4 = arith.constant 0 : index
    %2 = vector.load %arg0[%c0_3, %c0_4] : memref<32x48xbf16, #tpu.memory_space<vmem>>, vector<32x48xbf16>
    %c0_5 = arith.constant 0 : index
    %c0_6 = arith.constant 0 : index
    %c0_7 = arith.constant 0 : index
    %3 = vector.load %arg1[%c0_5, %c0_6, %c0_7] : memref<3x32x32xbf16, #tpu.memory_space<vmem>>, vector<1x32x32xbf16>
    %4 = vector.shape_cast %3 : vector<1x32x32xbf16> to vector<32x32xbf16>
    %cst = arith.constant dense<0.000000e+00> : vector<32x48xf32>
    %5 = tpu.matmul %4, %2, %cst {dimension_numbers = #tpu.dot_dimension_numbers<[1], [0], [0], [1], [0, 0, 1, 1], [], []>} : vector<32x32xbf16>, vector<32x48xbf16>, vector<32x48xf32> -> vector<32x48xf32>
    %6 = arith.truncf %5 : vector<32x48xf32> to vector<32x48xbf16>
    %c0_8 = arith.constant 0 : index
    %c0_9 = arith.constant 0 : index
    %c0_10 = arith.constant 0 : index
    %7 = vector.load %arg5[%c0_8, %c0_9, %c0_10] : memref<3x48x256xbf16, #tpu.memory_space<vmem>>, vector<1x48x256xbf16>
    %8 = vector.shape_cast %7 : vector<1x48x256xbf16> to vector<48x256xbf16>
    %cst_11 = arith.constant dense<0.000000e+00> : vector<32x256xf32>
    %9 = tpu.matmul %6, %8, %cst_11 {dimension_numbers = #tpu.dot_dimension_numbers<[1], [0], [0], [1], [0, 0, 1, 1], [], []>} : vector<32x48xbf16>, vector<48x256xbf16>, vector<32x256xf32> -> vector<32x256xf32>
    %c1 = arith.constant 1 : index
    %c0_12 = arith.constant 0 : index
    %c0_13 = arith.constant 0 : index
    %10 = vector.load %arg1[%c1, %c0_12, %c0_13] : memref<3x32x32xbf16, #tpu.memory_space<vmem>>, vector<1x32x32xbf16>
    %11 = vector.shape_cast %10 : vector<1x32x32xbf16> to vector<32x32xbf16>
    %cst_14 = arith.constant dense<0.000000e+00> : vector<32x48xf32>
    %12 = tpu.matmul %11, %2, %cst_14 {dimension_numbers = #tpu.dot_dimension_numbers<[1], [0], [0], [1], [0, 0, 1, 1], [], []>} : vector<32x32xbf16>, vector<32x48xbf16>, vector<32x48xf32> -> vector<32x48xf32>
    %13 = arith.truncf %12 : vector<32x48xf32> to vector<32x48xbf16>
    %c1_15 = arith.constant 1 : index
    %c0_16 = arith.constant 0 : index
    %c0_17 = arith.constant 0 : index
    %14 = vector.load %arg5[%c1_15, %c0_16, %c0_17] : memref<3x48x256xbf16, #tpu.memory_space<vmem>>, vector<1x48x256xbf16>
    %15 = vector.shape_cast %14 : vector<1x48x256xbf16> to vector<48x256xbf16>
    %cst_18 = arith.constant dense<0.000000e+00> : vector<32x256xf32>
    %16 = tpu.matmul %13, %15, %cst_18 {dimension_numbers = #tpu.dot_dimension_numbers<[1], [0], [0], [1], [0, 0, 1, 1], [], []>} : vector<32x48xbf16>, vector<48x256xbf16>, vector<32x256xf32> -> vector<32x256xf32>
    %17 = arith.addf %9, %16 : vector<32x256xf32>
    %c2 = arith.constant 2 : index
    %c0_19 = arith.constant 0 : index
    %c0_20 = arith.constant 0 : index
    %18 = vector.load %arg1[%c2, %c0_19, %c0_20] : memref<3x32x32xbf16, #tpu.memory_space<vmem>>, vector<1x32x32xbf16>
    %19 = vector.shape_cast %18 : vector<1x32x32xbf16> to vector<32x32xbf16>
    %cst_21 = arith.constant dense<0.000000e+00> : vector<32x48xf32>
    %20 = tpu.matmul %19, %2, %cst_21 {dimension_numbers = #tpu.dot_dimension_numbers<[1], [0], [0], [1], [0, 0, 1, 1], [], []>} : vector<32x32xbf16>, vector<32x48xbf16>, vector<32x48xf32> -> vector<32x48xf32>
    %21 = arith.truncf %20 : vector<32x48xf32> to vector<32x48xbf16>
    %c2_22 = arith.constant 2 : index
    %c0_23 = arith.constant 0 : index
    %c0_24 = arith.constant 0 : index
    %22 = vector.load %arg5[%c2_22, %c0_23, %c0_24] : memref<3x48x256xbf16, #tpu.memory_space<vmem>>, vector<1x48x256xbf16>
    %23 = vector.shape_cast %22 : vector<1x48x256xbf16> to vector<48x256xbf16>
    %cst_25 = arith.constant dense<0.000000e+00> : vector<32x256xf32>
    %24 = tpu.matmul %21, %23, %cst_25 {dimension_numbers = #tpu.dot_dimension_numbers<[1], [0], [0], [1], [0, 0, 1, 1], [], []>} : vector<32x48xbf16>, vector<48x256xbf16>, vector<32x256xf32> -> vector<32x256xf32>
    %25 = arith.addf %17, %24 : vector<32x256xf32>
    %26 = vector.extract_strided_slice %0 {offsets = [0, 0], sizes = [1, 256], strides = [1, 1]} : vector<5x256xf32> to vector<1x256xf32>
    %27 = vector.broadcast %26 : vector<1x256xf32> to vector<32x256xf32>
    %28 = arith.mulf %25, %27 : vector<32x256xf32>
    %29 = vector.extract_strided_slice %1 {offsets = [0, 0], sizes = [1, 256], strides = [1, 1]} : vector<5x256xf32> to vector<1x256xf32>
    %30 = vector.broadcast %29 : vector<1x256xf32> to vector<32x256xf32>
    %31 = arith.addf %28, %30 : vector<32x256xf32>
    %cst_26 = arith.constant 0.000000e+00 : f32
    %32 = vector.broadcast %cst_26 : f32 to vector<32x256xf32>
    %33 = arith.maximumf %31, %32 : vector<32x256xf32>
    %34 = arith.truncf %33 : vector<32x256xf32> to vector<32x256xbf16>
    %c0_27 = arith.constant 0 : index
    %c0_28 = arith.constant 0 : index
    %c0_29 = arith.constant 0 : index
    %35 = vector.load %arg1[%c0_27, %c0_28, %c0_29] : memref<3x32x32xbf16, #tpu.memory_space<vmem>>, vector<1x32x32xbf16>
    %36 = vector.shape_cast %35 : vector<1x32x32xbf16> to vector<32x32xbf16>
    %cst_30 = arith.constant dense<0.000000e+00> : vector<32x256xf32>
    %37 = tpu.matmul %36, %34, %cst_30 {dimension_numbers = #tpu.dot_dimension_numbers<[1], [0], [0], [1], [0, 0, 1, 1], [], []>} : vector<32x32xbf16>, vector<32x256xbf16>, vector<32x256xf32> -> vector<32x256xf32>
    %38 = arith.truncf %37 : vector<32x256xf32> to vector<32x256xbf16>
    %c0_31 = arith.constant 0 : index
    %c0_32 = arith.constant 0 : index
    %c0_33 = arith.constant 0 : index
    %39 = vector.load %arg6[%c0_31, %c0_32, %c0_33] : memref<3x256x256xbf16, #tpu.memory_space<vmem>>, vector<1x256x256xbf16>
    %40 = vector.shape_cast %39 : vector<1x256x256xbf16> to vector<256x256xbf16>
    %cst_34 = arith.constant dense<0.000000e+00> : vector<32x256xf32>
    %41 = tpu.matmul %38, %40, %cst_34 {dimension_numbers = #tpu.dot_dimension_numbers<[1], [0], [0], [1], [0, 0, 1, 1], [], []>} : vector<32x256xbf16>, vector<256x256xbf16>, vector<32x256xf32> -> vector<32x256xf32>
    %c1_35 = arith.constant 1 : index
    %c0_36 = arith.constant 0 : index
    %c0_37 = arith.constant 0 : index
    %42 = vector.load %arg1[%c1_35, %c0_36, %c0_37] : memref<3x32x32xbf16, #tpu.memory_space<vmem>>, vector<1x32x32xbf16>
    %43 = vector.shape_cast %42 : vector<1x32x32xbf16> to vector<32x32xbf16>
    %cst_38 = arith.constant dense<0.000000e+00> : vector<32x256xf32>
    %44 = tpu.matmul %43, %34, %cst_38 {dimension_numbers = #tpu.dot_dimension_numbers<[1], [0], [0], [1], [0, 0, 1, 1], [], []>} : vector<32x32xbf16>, vector<32x256xbf16>, vector<32x256xf32> -> vector<32x256xf32>
    %45 = arith.truncf %44 : vector<32x256xf32> to vector<32x256xbf16>
    %c1_39 = arith.constant 1 : index
    %c0_40 = arith.constant 0 : index
    %c0_41 = arith.constant 0 : index
    %46 = vector.load %arg6[%c1_39, %c0_40, %c0_41] : memref<3x256x256xbf16, #tpu.memory_space<vmem>>, vector<1x256x256xbf16>
    %47 = vector.shape_cast %46 : vector<1x256x256xbf16> to vector<256x256xbf16>
    %cst_42 = arith.constant dense<0.000000e+00> : vector<32x256xf32>
    %48 = tpu.matmul %45, %47, %cst_42 {dimension_numbers = #tpu.dot_dimension_numbers<[1], [0], [0], [1], [0, 0, 1, 1], [], []>} : vector<32x256xbf16>, vector<256x256xbf16>, vector<32x256xf32> -> vector<32x256xf32>
    %49 = arith.addf %41, %48 : vector<32x256xf32>
    %c2_43 = arith.constant 2 : index
    %c0_44 = arith.constant 0 : index
    %c0_45 = arith.constant 0 : index
    %50 = vector.load %arg1[%c2_43, %c0_44, %c0_45] : memref<3x32x32xbf16, #tpu.memory_space<vmem>>, vector<1x32x32xbf16>
    %51 = vector.shape_cast %50 : vector<1x32x32xbf16> to vector<32x32xbf16>
    %cst_46 = arith.constant dense<0.000000e+00> : vector<32x256xf32>
    %52 = tpu.matmul %51, %34, %cst_46 {dimension_numbers = #tpu.dot_dimension_numbers<[1], [0], [0], [1], [0, 0, 1, 1], [], []>} : vector<32x32xbf16>, vector<32x256xbf16>, vector<32x256xf32> -> vector<32x256xf32>
    %53 = arith.truncf %52 : vector<32x256xf32> to vector<32x256xbf16>
    %c2_47 = arith.constant 2 : index
    %c0_48 = arith.constant 0 : index
    %c0_49 = arith.constant 0 : index
    %54 = vector.load %arg6[%c2_47, %c0_48, %c0_49] : memref<3x256x256xbf16, #tpu.memory_space<vmem>>, vector<1x256x256xbf16>
    %55 = vector.shape_cast %54 : vector<1x256x256xbf16> to vector<256x256xbf16>
    %cst_50 = arith.constant dense<0.000000e+00> : vector<32x256xf32>
    %56 = tpu.matmul %53, %55, %cst_50 {dimension_numbers = #tpu.dot_dimension_numbers<[1], [0], [0], [1], [0, 0, 1, 1], [], []>} : vector<32x256xbf16>, vector<256x256xbf16>, vector<32x256xf32> -> vector<32x256xf32>
    %57 = arith.addf %49, %56 : vector<32x256xf32>
    %58 = vector.extract_strided_slice %0 {offsets = [1, 0], sizes = [1, 256], strides = [1, 1]} : vector<5x256xf32> to vector<1x256xf32>
    %59 = vector.broadcast %58 : vector<1x256xf32> to vector<32x256xf32>
    %60 = arith.mulf %57, %59 : vector<32x256xf32>
    %61 = vector.extract_strided_slice %1 {offsets = [1, 0], sizes = [1, 256], strides = [1, 1]} : vector<5x256xf32> to vector<1x256xf32>
    %62 = vector.broadcast %61 : vector<1x256xf32> to vector<32x256xf32>
    %63 = arith.addf %60, %62 : vector<32x256xf32>
    %cst_51 = arith.constant 0.000000e+00 : f32
    %64 = vector.broadcast %cst_51 : f32 to vector<32x256xf32>
    %65 = arith.maximumf %63, %64 : vector<32x256xf32>
    %66 = arith.truncf %65 : vector<32x256xf32> to vector<32x256xbf16>
    %c0_52 = arith.constant 0 : index
    %c0_53 = arith.constant 0 : index
    %c0_54 = arith.constant 0 : index
    %67 = vector.load %arg1[%c0_52, %c0_53, %c0_54] : memref<3x32x32xbf16, #tpu.memory_space<vmem>>, vector<1x32x32xbf16>
    %68 = vector.shape_cast %67 : vector<1x32x32xbf16> to vector<32x32xbf16>
    %cst_55 = arith.constant dense<0.000000e+00> : vector<32x256xf32>
    %69 = tpu.matmul %68, %66, %cst_55 {dimension_numbers = #tpu.dot_dimension_numbers<[1], [0], [0], [1], [0, 0, 1, 1], [], []>} : vector<32x32xbf16>, vector<32x256xbf16>, vector<32x256xf32> -> vector<32x256xf32>
    %70 = arith.truncf %69 : vector<32x256xf32> to vector<32x256xbf16>
    %c0_56 = arith.constant 0 : index
    %c0_57 = arith.constant 0 : index
    %c0_58 = arith.constant 0 : index
    %71 = vector.load %arg7[%c0_56, %c0_57, %c0_58] : memref<3x256x256xbf16, #tpu.memory_space<vmem>>, vector<1x256x256xbf16>
    %72 = vector.shape_cast %71 : vector<1x256x256xbf16> to vector<256x256xbf16>
    %cst_59 = arith.constant dense<0.000000e+00> : vector<32x256xf32>
    %73 = tpu.matmul %70, %72, %cst_59 {dimension_numbers = #tpu.dot_dimension_numbers<[1], [0], [0], [1], [0, 0, 1, 1], [], []>} : vector<32x256xbf16>, vector<256x256xbf16>, vector<32x256xf32> -> vector<32x256xf32>
    %c1_60 = arith.constant 1 : index
    %c0_61 = arith.constant 0 : index
    %c0_62 = arith.constant 0 : index
    %74 = vector.load %arg1[%c1_60, %c0_61, %c0_62] : memref<3x32x32xbf16, #tpu.memory_space<vmem>>, vector<1x32x32xbf16>
    %75 = vector.shape_cast %74 : vector<1x32x32xbf16> to vector<32x32xbf16>
    %cst_63 = arith.constant dense<0.000000e+00> : vector<32x256xf32>
    %76 = tpu.matmul %75, %66, %cst_63 {dimension_numbers = #tpu.dot_dimension_numbers<[1], [0], [0], [1], [0, 0, 1, 1], [], []>} : vector<32x32xbf16>, vector<32x256xbf16>, vector<32x256xf32> -> vector<32x256xf32>
    %77 = arith.truncf %76 : vector<32x256xf32> to vector<32x256xbf16>
    %c1_64 = arith.constant 1 : index
    %c0_65 = arith.constant 0 : index
    %c0_66 = arith.constant 0 : index
    %78 = vector.load %arg7[%c1_64, %c0_65, %c0_66] : memref<3x256x256xbf16, #tpu.memory_space<vmem>>, vector<1x256x256xbf16>
    %79 = vector.shape_cast %78 : vector<1x256x256xbf16> to vector<256x256xbf16>
    %cst_67 = arith.constant dense<0.000000e+00> : vector<32x256xf32>
    %80 = tpu.matmul %77, %79, %cst_67 {dimension_numbers = #tpu.dot_dimension_numbers<[1], [0], [0], [1], [0, 0, 1, 1], [], []>} : vector<32x256xbf16>, vector<256x256xbf16>, vector<32x256xf32> -> vector<32x256xf32>
    %81 = arith.addf %73, %80 : vector<32x256xf32>
    %c2_68 = arith.constant 2 : index
    %c0_69 = arith.constant 0 : index
    %c0_70 = arith.constant 0 : index
    %82 = vector.load %arg1[%c2_68, %c0_69, %c0_70] : memref<3x32x32xbf16, #tpu.memory_space<vmem>>, vector<1x32x32xbf16>
    %83 = vector.shape_cast %82 : vector<1x32x32xbf16> to vector<32x32xbf16>
    %cst_71 = arith.constant dense<0.000000e+00> : vector<32x256xf32>
    %84 = tpu.matmul %83, %66, %cst_71 {dimension_numbers = #tpu.dot_dimension_numbers<[1], [0], [0], [1], [0, 0, 1, 1], [], []>} : vector<32x32xbf16>, vector<32x256xbf16>, vector<32x256xf32> -> vector<32x256xf32>
    %85 = arith.truncf %84 : vector<32x256xf32> to vector<32x256xbf16>
    %c2_72 = arith.constant 2 : index
    %c0_73 = arith.constant 0 : index
    %c0_74 = arith.constant 0 : index
    %86 = vector.load %arg7[%c2_72, %c0_73, %c0_74] : memref<3x256x256xbf16, #tpu.memory_space<vmem>>, vector<1x256x256xbf16>
    %87 = vector.shape_cast %86 : vector<1x256x256xbf16> to vector<256x256xbf16>
    %cst_75 = arith.constant dense<0.000000e+00> : vector<32x256xf32>
    %88 = tpu.matmul %85, %87, %cst_75 {dimension_numbers = #tpu.dot_dimension_numbers<[1], [0], [0], [1], [0, 0, 1, 1], [], []>} : vector<32x256xbf16>, vector<256x256xbf16>, vector<32x256xf32> -> vector<32x256xf32>
    %89 = arith.addf %81, %88 : vector<32x256xf32>
    %90 = arith.addf %25, %89 : vector<32x256xf32>
    %91 = vector.extract_strided_slice %0 {offsets = [2, 0], sizes = [1, 256], strides = [1, 1]} : vector<5x256xf32> to vector<1x256xf32>
    %92 = vector.broadcast %91 : vector<1x256xf32> to vector<32x256xf32>
    %93 = arith.mulf %90, %92 : vector<32x256xf32>
    %94 = vector.extract_strided_slice %1 {offsets = [2, 0], sizes = [1, 256], strides = [1, 1]} : vector<5x256xf32> to vector<1x256xf32>
    %95 = vector.broadcast %94 : vector<1x256xf32> to vector<32x256xf32>
    %96 = arith.addf %93, %95 : vector<32x256xf32>
    %cst_76 = arith.constant 0.000000e+00 : f32
    %97 = vector.broadcast %cst_76 : f32 to vector<32x256xf32>
    %98 = arith.maximumf %96, %97 : vector<32x256xf32>
    %99 = arith.truncf %98 : vector<32x256xf32> to vector<32x256xbf16>
    %c0_77 = arith.constant 0 : index
    %c0_78 = arith.constant 0 : index
    %c0_79 = arith.constant 0 : index
    %100 = vector.load %arg2[%c0_77, %c0_78, %c0_79] : memref<3x16x32xbf16, #tpu.memory_space<vmem>>, vector<1x16x32xbf16>
    %101 = vector.shape_cast %100 : vector<1x16x32xbf16> to vector<16x32xbf16>
    %cst_80 = arith.constant dense<0.000000e+00> : vector<16x256xf32>
    %102 = tpu.matmul %101, %99, %cst_80 {dimension_numbers = #tpu.dot_dimension_numbers<[1], [0], [0], [1], [0, 0, 1, 1], [], []>} : vector<16x32xbf16>, vector<32x256xbf16>, vector<16x256xf32> -> vector<16x256xf32>
    %103 = arith.truncf %102 : vector<16x256xf32> to vector<16x256xbf16>
    %c0_81 = arith.constant 0 : index
    %c0_82 = arith.constant 0 : index
    %c0_83 = arith.constant 0 : index
    %104 = vector.load %arg8[%c0_81, %c0_82, %c0_83] : memref<3x256x256xbf16, #tpu.memory_space<vmem>>, vector<1x256x256xbf16>
    %105 = vector.shape_cast %104 : vector<1x256x256xbf16> to vector<256x256xbf16>
    %cst_84 = arith.constant dense<0.000000e+00> : vector<16x256xf32>
    %106 = tpu.matmul %103, %105, %cst_84 {dimension_numbers = #tpu.dot_dimension_numbers<[1], [0], [0], [1], [0, 0, 1, 1], [], []>} : vector<16x256xbf16>, vector<256x256xbf16>, vector<16x256xf32> -> vector<16x256xf32>
    %c1_85 = arith.constant 1 : index
    %c0_86 = arith.constant 0 : index
    %c0_87 = arith.constant 0 : index
    %107 = vector.load %arg2[%c1_85, %c0_86, %c0_87] : memref<3x16x32xbf16, #tpu.memory_space<vmem>>, vector<1x16x32xbf16>
    %108 = vector.shape_cast %107 : vector<1x16x32xbf16> to vector<16x32xbf16>
    %cst_88 = arith.constant dense<0.000000e+00> : vector<16x256xf32>
    %109 = tpu.matmul %108, %99, %cst_88 {dimension_numbers = #tpu.dot_dimension_numbers<[1], [0], [0], [1], [0, 0, 1, 1], [], []>} : vector<16x32xbf16>, vector<32x256xbf16>, vector<16x256xf32> -> vector<16x256xf32>
    %110 = arith.truncf %109 : vector<16x256xf32> to vector<16x256xbf16>
    %c1_89 = arith.constant 1 : index
    %c0_90 = arith.constant 0 : index
    %c0_91 = arith.constant 0 : index
    %111 = vector.load %arg8[%c1_89, %c0_90, %c0_91] : memref<3x256x256xbf16, #tpu.memory_space<vmem>>, vector<1x256x256xbf16>
    %112 = vector.shape_cast %111 : vector<1x256x256xbf16> to vector<256x256xbf16>
    %cst_92 = arith.constant dense<0.000000e+00> : vector<16x256xf32>
    %113 = tpu.matmul %110, %112, %cst_92 {dimension_numbers = #tpu.dot_dimension_numbers<[1], [0], [0], [1], [0, 0, 1, 1], [], []>} : vector<16x256xbf16>, vector<256x256xbf16>, vector<16x256xf32> -> vector<16x256xf32>
    %114 = arith.addf %106, %113 : vector<16x256xf32>
    %c2_93 = arith.constant 2 : index
    %c0_94 = arith.constant 0 : index
    %c0_95 = arith.constant 0 : index
    %115 = vector.load %arg2[%c2_93, %c0_94, %c0_95] : memref<3x16x32xbf16, #tpu.memory_space<vmem>>, vector<1x16x32xbf16>
    %116 = vector.shape_cast %115 : vector<1x16x32xbf16> to vector<16x32xbf16>
    %cst_96 = arith.constant dense<0.000000e+00> : vector<16x256xf32>
    %117 = tpu.matmul %116, %99, %cst_96 {dimension_numbers = #tpu.dot_dimension_numbers<[1], [0], [0], [1], [0, 0, 1, 1], [], []>} : vector<16x32xbf16>, vector<32x256xbf16>, vector<16x256xf32> -> vector<16x256xf32>
    %118 = arith.truncf %117 : vector<16x256xf32> to vector<16x256xbf16>
    %c2_97 = arith.constant 2 : index
    %c0_98 = arith.constant 0 : index
    %c0_99 = arith.constant 0 : index
    %119 = vector.load %arg8[%c2_97, %c0_98, %c0_99] : memref<3x256x256xbf16, #tpu.memory_space<vmem>>, vector<1x256x256xbf16>
    %120 = vector.shape_cast %119 : vector<1x256x256xbf16> to vector<256x256xbf16>
    %cst_100 = arith.constant dense<0.000000e+00> : vector<16x256xf32>
    %121 = tpu.matmul %118, %120, %cst_100 {dimension_numbers = #tpu.dot_dimension_numbers<[1], [0], [0], [1], [0, 0, 1, 1], [], []>} : vector<16x256xbf16>, vector<256x256xbf16>, vector<16x256xf32> -> vector<16x256xf32>
    %122 = arith.addf %114, %121 : vector<16x256xf32>
    %123 = vector.extract_strided_slice %0 {offsets = [3, 0], sizes = [1, 256], strides = [1, 1]} : vector<5x256xf32> to vector<1x256xf32>
    %124 = vector.broadcast %123 : vector<1x256xf32> to vector<16x256xf32>
    %125 = arith.mulf %122, %124 : vector<16x256xf32>
    %126 = vector.extract_strided_slice %1 {offsets = [3, 0], sizes = [1, 256], strides = [1, 1]} : vector<5x256xf32> to vector<1x256xf32>
    %127 = vector.broadcast %126 : vector<1x256xf32> to vector<16x256xf32>
    %128 = arith.addf %125, %127 : vector<16x256xf32>
    %cst_101 = arith.constant 0.000000e+00 : f32
    %129 = vector.broadcast %cst_101 : f32 to vector<16x256xf32>
    %130 = arith.maximumf %128, %129 : vector<16x256xf32>
    %131 = arith.truncf %130 : vector<16x256xf32> to vector<16x256xbf16>
    %c0_102 = arith.constant 0 : index
    %c0_103 = arith.constant 0 : index
    %c0_104 = arith.constant 0 : index
    %132 = vector.load %arg3[%c0_102, %c0_103, %c0_104] : memref<3x16x16xbf16, #tpu.memory_space<vmem>>, vector<1x16x16xbf16>
    %133 = vector.shape_cast %132 : vector<1x16x16xbf16> to vector<16x16xbf16>
    %cst_105 = arith.constant dense<0.000000e+00> : vector<16x256xf32>
    %134 = tpu.matmul %133, %131, %cst_105 {dimension_numbers = #tpu.dot_dimension_numbers<[1], [0], [0], [1], [0, 0, 1, 1], [], []>} : vector<16x16xbf16>, vector<16x256xbf16>, vector<16x256xf32> -> vector<16x256xf32>
    %135 = arith.truncf %134 : vector<16x256xf32> to vector<16x256xbf16>
    %c0_106 = arith.constant 0 : index
    %c0_107 = arith.constant 0 : index
    %c0_108 = arith.constant 0 : index
    %136 = vector.load %arg9[%c0_106, %c0_107, %c0_108] : memref<3x256x256xbf16, #tpu.memory_space<vmem>>, vector<1x256x256xbf16>
    %137 = vector.shape_cast %136 : vector<1x256x256xbf16> to vector<256x256xbf16>
    %cst_109 = arith.constant dense<0.000000e+00> : vector<16x256xf32>
    %138 = tpu.matmul %135, %137, %cst_109 {dimension_numbers = #tpu.dot_dimension_numbers<[1], [0], [0], [1], [0, 0, 1, 1], [], []>} : vector<16x256xbf16>, vector<256x256xbf16>, vector<16x256xf32> -> vector<16x256xf32>
    %c1_110 = arith.constant 1 : index
    %c0_111 = arith.constant 0 : index
    %c0_112 = arith.constant 0 : index
    %139 = vector.load %arg3[%c1_110, %c0_111, %c0_112] : memref<3x16x16xbf16, #tpu.memory_space<vmem>>, vector<1x16x16xbf16>
    %140 = vector.shape_cast %139 : vector<1x16x16xbf16> to vector<16x16xbf16>
    %cst_113 = arith.constant dense<0.000000e+00> : vector<16x256xf32>
    %141 = tpu.matmul %140, %131, %cst_113 {dimension_numbers = #tpu.dot_dimension_numbers<[1], [0], [0], [1], [0, 0, 1, 1], [], []>} : vector<16x16xbf16>, vector<16x256xbf16>, vector<16x256xf32> -> vector<16x256xf32>
    %142 = arith.truncf %141 : vector<16x256xf32> to vector<16x256xbf16>
    %c1_114 = arith.constant 1 : index
    %c0_115 = arith.constant 0 : index
    %c0_116 = arith.constant 0 : index
    %143 = vector.load %arg9[%c1_114, %c0_115, %c0_116] : memref<3x256x256xbf16, #tpu.memory_space<vmem>>, vector<1x256x256xbf16>
    %144 = vector.shape_cast %143 : vector<1x256x256xbf16> to vector<256x256xbf16>
    %cst_117 = arith.constant dense<0.000000e+00> : vector<16x256xf32>
    %145 = tpu.matmul %142, %144, %cst_117 {dimension_numbers = #tpu.dot_dimension_numbers<[1], [0], [0], [1], [0, 0, 1, 1], [], []>} : vector<16x256xbf16>, vector<256x256xbf16>, vector<16x256xf32> -> vector<16x256xf32>
    %146 = arith.addf %138, %145 : vector<16x256xf32>
    %c2_118 = arith.constant 2 : index
    %c0_119 = arith.constant 0 : index
    %c0_120 = arith.constant 0 : index
    %147 = vector.load %arg3[%c2_118, %c0_119, %c0_120] : memref<3x16x16xbf16, #tpu.memory_space<vmem>>, vector<1x16x16xbf16>
    %148 = vector.shape_cast %147 : vector<1x16x16xbf16> to vector<16x16xbf16>
    %cst_121 = arith.constant dense<0.000000e+00> : vector<16x256xf32>
    %149 = tpu.matmul %148, %131, %cst_121 {dimension_numbers = #tpu.dot_dimension_numbers<[1], [0], [0], [1], [0, 0, 1, 1], [], []>} : vector<16x16xbf16>, vector<16x256xbf16>, vector<16x256xf32> -> vector<16x256xf32>
    %150 = arith.truncf %149 : vector<16x256xf32> to vector<16x256xbf16>
    %c2_122 = arith.constant 2 : index
    %c0_123 = arith.constant 0 : index
    %c0_124 = arith.constant 0 : index
    %151 = vector.load %arg9[%c2_122, %c0_123, %c0_124] : memref<3x256x256xbf16, #tpu.memory_space<vmem>>, vector<1x256x256xbf16>
    %152 = vector.shape_cast %151 : vector<1x256x256xbf16> to vector<256x256xbf16>
    %cst_125 = arith.constant dense<0.000000e+00> : vector<16x256xf32>
    %153 = tpu.matmul %150, %152, %cst_125 {dimension_numbers = #tpu.dot_dimension_numbers<[1], [0], [0], [1], [0, 0, 1, 1], [], []>} : vector<16x256xbf16>, vector<256x256xbf16>, vector<16x256xf32> -> vector<16x256xf32>
    %154 = arith.addf %146, %153 : vector<16x256xf32>
    %c1_126 = arith.constant 1 : index
    %c0_127 = arith.constant 0 : index
    %c0_128 = arith.constant 0 : index
    %155 = vector.load %arg2[%c1_126, %c0_127, %c0_128] : memref<3x16x32xbf16, #tpu.memory_space<vmem>>, vector<1x16x32xbf16>
    %156 = vector.shape_cast %155 : vector<1x16x32xbf16> to vector<16x32xbf16>
    %cst_129 = arith.constant dense<0.000000e+00> : vector<16x256xf32>
    %157 = tpu.matmul %156, %99, %cst_129 {dimension_numbers = #tpu.dot_dimension_numbers<[1], [0], [0], [1], [0, 0, 1, 1], [], []>} : vector<16x32xbf16>, vector<32x256xbf16>, vector<16x256xf32> -> vector<16x256xf32>
    %158 = arith.truncf %157 : vector<16x256xf32> to vector<16x256xbf16>
    %c0_130 = arith.constant 0 : index
    %c0_131 = arith.constant 0 : index
    %159 = vector.load %arg10[%c0_130, %c0_131] : memref<256x256xbf16, #tpu.memory_space<vmem>>, vector<256x256xbf16>
    %cst_132 = arith.constant dense<0.000000e+00> : vector<16x256xf32>
    %160 = tpu.matmul %158, %159, %cst_132 {dimension_numbers = #tpu.dot_dimension_numbers<[1], [0], [0], [1], [0, 0, 1, 1], [], []>} : vector<16x256xbf16>, vector<256x256xbf16>, vector<16x256xf32> -> vector<16x256xf32>
    %161 = arith.addf %160, %154 : vector<16x256xf32>
    %162 = vector.extract_strided_slice %0 {offsets = [4, 0], sizes = [1, 256], strides = [1, 1]} : vector<5x256xf32> to vector<1x256xf32>
    %163 = vector.broadcast %162 : vector<1x256xf32> to vector<16x256xf32>
    %164 = arith.mulf %161, %163 : vector<16x256xf32>
    %165 = vector.extract_strided_slice %1 {offsets = [4, 0], sizes = [1, 256], strides = [1, 1]} : vector<5x256xf32> to vector<1x256xf32>
    %166 = vector.broadcast %165 : vector<1x256xf32> to vector<16x256xf32>
    %167 = arith.addf %164, %166 : vector<16x256xf32>
    %cst_133 = arith.constant 0.000000e+00 : f32
    %168 = vector.broadcast %cst_133 : f32 to vector<16x256xf32>
    %169 = arith.maximumf %167, %168 : vector<16x256xf32>
    %170 = arith.truncf %169 : vector<16x256xf32> to vector<16x256xbf16>
    %c0_134 = arith.constant 0 : index
    %c0_135 = arith.constant 0 : index
    %171 = vector.load %arg4[%c0_134, %c0_135] : memref<2x16xbf16, #tpu.memory_space<vmem>>, vector<2x16xbf16>
    %cst_136 = arith.constant dense<0.000000e+00> : vector<2x256xf32>
    %172 = tpu.matmul %171, %170, %cst_136 {dimension_numbers = #tpu.dot_dimension_numbers<[1], [0], [0], [1], [0, 0, 1, 1], [], []>} : vector<2x16xbf16>, vector<16x256xbf16>, vector<2x256xf32> -> vector<2x256xf32>
    %173 = arith.truncf %172 : vector<2x256xf32> to vector<2x256xbf16>
    %c0_137 = arith.constant 0 : index
    %c0_138 = arith.constant 0 : index
    %174 = vector.load %arg11[%c0_137, %c0_138] : memref<256x10xbf16, #tpu.memory_space<vmem>>, vector<256x10xbf16>
    %cst_139 = arith.constant dense<0.000000e+00> : vector<2x10xf32>
    %175 = tpu.matmul %173, %174, %cst_139 {dimension_numbers = #tpu.dot_dimension_numbers<[1], [0], [0], [1], [0, 0, 1, 1], [], []>} : vector<2x256xbf16>, vector<256x10xbf16>, vector<2x10xf32> -> vector<2x10xf32>
    %c0_140 = arith.constant 0 : index
    %c0_141 = arith.constant 0 : index
    %176 = vector.load %arg14[%c0_140, %c0_141] : memref<1x10xf32, #tpu.memory_space<vmem>>, vector<1x10xf32>
    %177 = vector.broadcast %176 : vector<1x10xf32> to vector<2x10xf32>
    %178 = arith.addf %175, %177 : vector<2x10xf32>
    %c0_142 = arith.constant 0 : index
    %c0_143 = arith.constant 0 : index
    %179 = vector.load %arg15[%c0_142, %c0_143] : memref<2x10xf32, #tpu.memory_space<vmem>>, vector<2x10xf32>
    tpu.vector_store %arg15[%c0_142, %c0_143], %178 {strides = array<i32>} : memref<2x10xf32, #tpu.memory_space<vmem>>, vector<2x10xf32>,
    return
  }
}

</mosaic_0001>

<bundles_post_ra>
// kernel: wide_resnet_forward.1
= control target key start
LH: loop header
LB: loop body
LE: loop exit
PB: predicated region body
PF: predicated region fallthrough
CT: control target
= control target key end

     0   :  { %20 = vsyncpa [#allocation3], 0  ;;  %s8254_s0 = inlined_call_operand.vmem [shape: bf16[32,48], index: 0, kind: input, shape index: {}]   ;;  %s8255_s1 = inlined_call_operand.vmem [shape: bf16[3,32,32], index: 1, kind: input, shape index: {}]   ;;  %s8256_s2 = inlined_call_operand.vmem [shape: bf16[3,16,32], index: 2, kind: input, shape index: {}]   ;;  %s8257_s3 = inlined_call_operand.hbm [shape: bf16[3,16,16], index: 3, kind: input, shape index: {}]   ;;  %s8258_s4 = inlined_call_operand.vmem [shape: bf16[2,16], index: 4, kind: input, shape index: {}]   ;;  %s8259_s5 = inlined_call_operand.vmem [shape: bf16[3,48,256], index: 5, kind: input, shape index: {}]   ;;  %s8260_s6 = inlined_call_operand.hbm [shape: bf16[3,256,256], index: 6, kind: input, shape index: {}]   ;;  %s8261_s7 = inlined_call_operand.hbm [shape: bf16[3,256,256], index: 7, kind: input, shape index: {}]   ;;  %s8262_s8 = inlined_call_operand.hbm [shape: bf16[3,256,256], index: 8, kind: input, shape index: {}]   ;;  %s8263_s9 = inlined_call_operand.hbm [shape: bf16[3,256,256], index: 9, kind: input, shape index: {}]   ;;  %s8264_s10 = inlined_call_operand.vmem [shape: bf16[256,256], index: 10, kind: input, shape index: {}]   ;;  %s8265_s11 = inlined_call_operand.vmem [shape: bf16[256,10], index: 11, kind: input, shape index: {}]   ;;  %s8266_s12 = inlined_call_operand.vmem [shape: f32[5,256], index: 12, kind: input, shape index: {}]   ;;  %s8267_s13 = inlined_call_operand.hbm [shape: f32[5,256], index: 13, kind: input, shape index: {}]   ;;  %s8268_s14 = inlined_call_operand.vmem [shape: f32[1,10], index: 14, kind: input, shape index: {}]   ;;  %s8269_s15 = inlined_call_operand.hbm [shape: f32[2,10], index: 15, kind: output, shape index: {}]  }
   0x1   :  { %21 = vsyncpa [#allocation6], 0 }
   0x2   :  { %22 = vsyncpa [#allocation9], 0 }
   0x3   :  { %23 = vsyncpa [#allocation12], 0  ;;  %s52_s20 = sshll.u32 %s8260_s6, 4  ;;  %s53_s20 = int_to_ptr.hbm [resolvable:$true] %s52_s20 }
   0x4   :  { %24 = vsyncpa [#allocation4], 0  ;;  %s7378_s21 = smov [#allocation5]   ;;  %s78_s25 = sshll.u32 %s8262_s8, 4  ;;  %s79_s25 = int_to_ptr.hbm [resolvable:$true] %s78_s25 }
   0x5   :  { %s54_s22 = sshll.u32 %s7378_s21, 4  ;;  %s7379_s26 = smov 128   ;;  %s55_s22 = int_to_ptr.vmem [resolvable:$true] %s54_s22 }
   0x6   :  { %s7380_s27 = smov 8   ;;  %s7381_s28 = smov [#allocation8]  }
   0x7   :  { %60 = dma.hbm_to_vmem [thread:$0]  %s53_s20, 12288, %s55_s22, [#allocation6], %s7379_s26, %s7379_s26, %s7380_s27  }
   0x8   :  { %s80_s29 = sshll.u32 %s7381_s28, 4  ;;  %s35_s16 = sshll.u32 %s8257_s3, 4  ;;  %s81_s29 = int_to_ptr.vmem [resolvable:$true] %s80_s29  ;;  %s36_s16 = int_to_ptr.hbm [resolvable:$true] %s35_s16 }
   0x9   :  { %86 = dma.hbm_to_vmem [thread:$0]  %s79_s25, 12288, %s81_s29, [#allocation9], %s7379_s26, %s7379_s26, %s7380_s27  }
   0xa   :  { %s7382_s8 = smov [#allocation2]   ;;  %s65_s20 = sshll.u32 %s8261_s7, 4  ;;  %s66_s20 = int_to_ptr.hbm [resolvable:$true] %s65_s20 }
   0xb   :  { %s37_s17 = sshll.u32 %s7382_s8, 4  ;;  %s7383_s21 = smov 64   ;;  %s38_s17 = int_to_ptr.vmem [resolvable:$true] %s37_s17 }
   0xc   :  { %s7384_s22 = smov 4   ;;  %s7385_s23 = smov [#allocation7]  }
   0xd   :  { %43 = dma.hbm_to_vmem [thread:$0]  %s36_s16, 384, %s38_s17, [#allocation3], %s7383_s21, %s7383_s21, %s7384_s22  }
   0xe   :  { %s67_s24 = sshll.u32 %s7385_s23, 4  ;;  %s91_s30 = sshll.u32 %s8263_s9, 4  ;;  %s68_s24 = int_to_ptr.vmem [resolvable:$true] %s67_s24  ;;  %s92_s30 = int_to_ptr.hbm [resolvable:$true] %s91_s30 }
   0xf   :  { %73 = dma.hbm_to_vmem [thread:$0]  %s66_s20, 12288, %s68_s24, [#allocation6], %s7379_s26, %s7379_s26, %s7380_s27  }
  0x10   :  { %s111_s7 = sshll.u32 %s8267_s13, 4  ;;  %s7386_s6 = smov [#allocation10]   ;;  %s112_s7 = int_to_ptr.hbm [resolvable:$true] %s111_s7 }
  0x11   :  { %s93_s8 = sshll.u32 %s7386_s6, 4  ;;  %s7387_s16 = smov [#allocation11]   ;;  %s94_s8 = int_to_ptr.vmem [resolvable:$true] %s93_s8 }
  0x12   :  { %99 = dma.hbm_to_vmem [thread:$0]  %s92_s30, 12288, %s94_s8, [#allocation9], %s7379_s26, %s7379_s26, %s7380_s27  }
  0x13   :  { %s113_s9 = sshll.u32 %s7387_s16, 4  ;;  %s114_s9 = int_to_ptr.vmem [resolvable:$true] %s113_s9 }
  0x14   :  { %116 = dma.hbm_to_vmem [thread:$0]  %s112_s7, 256, %s114_s9, [#allocation12]  }
  0x15   :  { %7368 = dma.done.wait [#allocation3], 384  }
  0x16   :  { %7369 = vsyncadd [#allocation3], 4294966912 }
  0x17   :  { %7370 = dma.done.wait [#allocation6], 24576  }
  0x18   :  { %7371 = vsyncadd [#allocation6], 4294942720 }
  0x19   :  { %7372 = dma.done.wait [#allocation9], 24576  }
  0x1a   :  { %7373 = vsyncadd [#allocation9], 4294942720 }
  0x1b   :  { %7374 = dma.done.wait [#allocation12], 256  }
  0x1c   :  { %7375 = vsyncadd [#allocation12], 4294967040  ;;  %v7502_v0 = vld [vmem:[%s8254_s0 + $0x8] sm:$0xff]  ;;  %v6702_v1 = vld [vmem:[%s8254_s0] sm:$0xff]  ;;  %vm178_vm0 = vcmask 261120   ;;  %vm291_vm1 = vcmask 392192  }
  0x1d   :  { %191 = vmatpush.bf16.msra.mxu0 %v7502_v0  ;;  %7166 = vmatpush.bf16.msra.mxu1 %v7502_v0  ;;  %v7512_v2 = vld [vmem:[%s8255_s1] sm:$0xff]  ;;  %v7517_v3 = vld [vmem:[%s8255_s1 + $0x8] sm:$0xff]  ;;  %v7527_v4 = vld [vmem:[%s8255_s1 + $0x10] sm:$0xff]  ;;  %vm3422_vm2 = vcmask 130048   ;;  %s7388_s9 = smov [#allocation13]   ;;  %vm4744_vm3 = vcmask 74752  }
  0x1e   :  { %v7534_v5 = vld [vmem:[%s8255_s1 + $0x18] sm:$0xff]  ;;  %v4850_v6 = vld [vmem:[%s8259_s5 + $0x20] sm:$0xf]  ;;  %v6711_v7 = vld [vmem:[%s8259_s5 + $0x24] sm:$0xf0] }
  0x1f   :  { %v6710_v8 = vld [vmem:[%s8259_s5 + $0x24] sm:$0xf]  ;;  %v4851_v9 = vor.u32 %v6711_v7, %v4850_v6  ;;  %v4852_v10 = vld [vmem:[%s8259_s5 + $0x28] sm:$0xf0]  ;;  %v4842_v12 = vld [vmem:[%s8259_s5 + $0x10] sm:$0xf] }
  0x20   :  { %v4855_v11 = vor.u32 %v6710_v8, %v4852_v10  ;;  %v6709_v13 = vld [vmem:[%s8259_s5 + $0x14] sm:$0xf0]  ;;  %v6708_v14 = vld [vmem:[%s8259_s5 + $0x14] sm:$0xf]  ;;  %v4844_v16 = vld [vmem:[%s8259_s5 + $0x18] sm:$0xf0] }
  0x21   :  { %192 = vmatpush.bf16.msra.mxu0 %v6702_v1  ;;  %7167 = vmatpush.bf16.msra.mxu1 %v6702_v1  ;;  %v4843_v15 = vor.u32 %v6709_v13, %v4842_v12  ;;  %v4847_v17 = vor.u32 %v6708_v14, %v4844_v16  ;;  %v4834_v18 = vld [vmem:[%s8259_s5] sm:$0xf]  ;;  %v6707_v19 = vld [vmem:[%s8259_s5 + $0x4] sm:$0xf0]  ;;  %v6706_v20 = vld [vmem:[%s8259_s5 + $0x4] sm:$0xf] }
  0x22   :  { %v4835_v21 = vor.u32 %v6707_v19, %v4834_v18  ;;  %v4836_v22 = vld [vmem:[%s8259_s5 + $0x8] sm:$0xf0]  ;;  %v4822_v24 = vld [vmem:[%s8259_s5 + $0x50] sm:$0xf]  ;;  %v6719_v25 = vld [vmem:[%s8259_s5 + $0x54] sm:$0xf0] }
  0x23   :  { %v4839_v23 = vor.u32 %v6706_v20, %v4836_v22  ;;  %v6718_v26 = vld [vmem:[%s8259_s5 + $0x54] sm:$0xf]  ;;  %v4823_v27 = vor.u32 %v6719_v25, %v4822_v24  ;;  %v4824_v28 = vld [vmem:[%s8259_s5 + $0x58] sm:$0xf0]  ;;  %v4814_v30 = vld [vmem:[%s8259_s5 + $0x40] sm:$0xf] }
  0x24   :  { %4782 = vmatmul.msk.bf16.vlgmr.msra.gmra.mxu0 %vm178_vm0, %v7512_v2  ;;  %4783 = vmatmul.msk.bf16.vlgmr.msra.gmra.mxu1 %vm178_vm0, %v7517_v3  ;;  %v4827_v29 = vor.u32 %v6718_v26, %v4824_v28  ;;  %v6717_v31 = vld [vmem:[%s8259_s5 + $0x44] sm:$0xf0]  ;;  %v6716_v32 = vld [vmem:[%s8259_s5 + $0x44] sm:$0xf]  ;;  %v4816_v34 = vld [vmem:[%s8259_s5 + $0x48] sm:$0xf0] }
  0x25   :  { %239 = vmatpush.bf16.msrb.mxu1 %v7502_v0  ;;  %377 = vmatpush.bf16.msrb.mxu0 %v4851_v9  ;;  %v4815_v33 = vor.u32 %v6717_v31, %v4814_v30  ;;  %v4819_v35 = vor.u32 %v6716_v32, %v4816_v34  ;;  %v4806_v36 = vld [vmem:[%s8259_s5 + $0x30] sm:$0xf]  ;;  %v6715_v37 = vld [vmem:[%s8259_s5 + $0x34] sm:$0xf0]  ;;  %v6714_v38 = vld [vmem:[%s8259_s5 + $0x34] sm:$0xf] }
  0x26   :  { %303 = vmatpush.bf16.msra.mxu2 %v4823_v27  ;;  %322 = vmatpush.bf16.msra.mxu3 %v4827_v29  ;;  %v4807_v39 = vor.u32 %v6715_v37, %v4806_v36  ;;  %v4808_v40 = vld [vmem:[%s8259_s5 + $0x38] sm:$0xf0]  ;;  %v7622_v54 = vld [vmem:[%s8255_s1 + $0x20] sm:$0xff]  ;;  %v7629_v55 = vld [vmem:[%s8255_s1 + $0x28] sm:$0xff] }
  0x27   :  { %v4811_v41 = vor.u32 %v6714_v38, %v4808_v40  ;;  %v4898_v56 = vld [vmem:[%s8259_s5 + $0x80] sm:$0xf]  ;;  %v6727_v57 = vld [vmem:[%s8259_s5 + $0x84] sm:$0xf0]  ;;  %v6726_v58 = vld [vmem:[%s8259_s5 + $0x84] sm:$0xf] }
  0x28   :  { %v4899_v59 = vor.u32 %v6727_v57, %v4898_v56  ;;  %v4900_v60 = vld [vmem:[%s8259_s5 + $0x88] sm:$0xf0]  ;;  %v6724_v6 = vld [vmem:[%s8259_s5 + $0x74] sm:$0xf]  ;;  %v4892_v9 = vld [vmem:[%s8259_s5 + $0x78] sm:$0xf0] }
  0x29   :  { %240 = vmatpush.bf16.msrb.mxu1 %v6702_v1  ;;  %378 = vmatpush.bf16.msrb.mxu0 %v4843_v15  ;;  %v4903_v63 = vor.u32 %v6726_v58, %v4900_v60  ;;  %v4895_v10 = vor.u32 %v6724_v6, %v4892_v9  ;;  %v6723_v12 = vld [vmem:[%s8259_s5 + $0x64] sm:$0xf0]  ;;  %v6722_v13 = vld [vmem:[%s8259_s5 + $0x64] sm:$0xf]  ;;  %v4884_v15 = vld [vmem:[%s8259_s5 + $0x68] sm:$0xf0] }
  0x2a   :  { %304 = vmatpush.bf16.msra.mxu2 %v4815_v33  ;;  %323 = vmatpush.bf16.msra.mxu3 %v4819_v35  ;;  %v144_v58 = vld [vmem:[%s8266_s12] sm:$0x1f]  ;;  %v146_v6 = vld [vmem:[#allocation11] sm:$0x1f] }
  0x2d   :  { %396 = vmatpush.bf16.msra.mxu1 %v4855_v11  ;;  %379 = vmatpush.bf16.msrb.mxu0 %v4835_v21  ;;  %v4882_v11 = vld [vmem:[%s8259_s5 + $0x60] sm:$0xf] }
  0x2e   :  { %305 = vmatpush.bf16.msra.mxu2 %v4807_v39  ;;  %324 = vmatpush.bf16.msra.mxu3 %v4811_v41  ;;  %v4883_v14 = vor.u32 %v6723_v12, %v4882_v11 }
  0x31   :  { %397 = vmatpush.bf16.msra.mxu1 %v4847_v17  ;;  %519 = vmatpush.bf16.msra.mxu0 %v4903_v63  ;;  %v4887_v17 = vor.u32 %v6722_v13, %v4884_v15 }
  0x32   :  { %437 = vmatpush.bf16.msrb.mxu2 %v7502_v0  ;;  %v4890_v0 = vld [vmem:[%s8259_s5 + $0x70] sm:$0xf]  ;;  %500 = vmatpush.bf16.msrb.mxu3 %v4899_v59 }
  0x34   :  { %4796 = vmatmul.msk.bf16.vlgmr.msrb.gmra.mxu1 %vm178_vm0, %v7527_v4 }
  0x35   :  { %398 = vmatpush.bf16.msra.mxu1 %v4839_v23  ;;  %520 = vmatpush.bf16.msra.mxu0 %v4895_v10 }
  0x36   :  { %438 = vmatpush.bf16.msrb.mxu2 %v6702_v1  ;;  %v6725_v1 = vld [vmem:[%s8259_s5 + $0x74] sm:$0xf0]  ;;  %s4751_s5 = sshll.u32 %s7388_s9, 4  ;;  %s4752_s5 = int_to_ptr.vmem [resolvable:$true] %s4751_s5 }
  0x37   :  { %v4891_v8 = vor.u32 %v6725_v1, %v4890_v0 }
  0x39   :  { %501 = vmatpush.bf16.msrb.mxu3 %v4891_v8  ;;  %521 = vmatpush.bf16.msra.mxu0 %v4887_v17  ;;  %v541_v8 = vperm.slane %v144_v58, 0 }
  0x3d   :  { %502 = vmatpush.bf16.msrb.mxu3 %v4883_v14 }
  0x44   :  { %4797 = vmatmul.msk.bf16.gmra.mxu1 %vm178_vm0, %v7534_v5 }
  0xa1   :  { %v194_v42 = vpop.f32.mrf.mxu0  ;;  %v199_v43 = vpop.f32.mrf.mxu1 }
  0xa9   :  { %v196_v44 = vpop.f32.mrf.mxu0  ;;  %v201_v45 = vpop.f32.mrf.mxu1 }
  0xaa   :  { %v204_v46 = vpack.c.bf16 %v196_v44, %v194_v42  ;;  %v205_v50 = vpack.c.bf16 %v201_v45, %v199_v43  ;;  %v145_v42 = vld [vmem:[%s8266_s12 + $0x8] sm:$0x1f] }
  0xac   :  { %4856 = vmatmul.msk.bf16.vlgmr.msrb.gmra.mxu0 %vm291_vm1, %v204_v46  ;;  %4858 = vmatmul.msk.bf16.vlgmr.msra.gmra.mxu1 %vm291_vm1, %v204_v46  ;;  %v542_v46 = vperm.slane %v145_v42, 0  ;;  %v6775_v42 = vld [vmem:[#allocation5 + $0x174] sm:$0xf0] }
  0xb1   :  { %v242_v47 = vpop.f32.mrf.mxu1 }
  0xb9   :  { %v244_v48 = vpop.f32.mrf.mxu1 }
  0xba   :  { %v252_v49 = vpack.c.bf16 %v244_v48, %v242_v47 }
  0xbc   :  { %4828 = vmatmul.msk.bf16.vlgmr.msra.gmra.mxu2 %vm291_vm1, %v252_v49  ;;  %4830 = vmatmul.msk.bf16.vlgmr.msra.gmra.mxu3 %vm291_vm1, %v252_v49  ;;  %v147_v49 = vld [vmem:[#allocation11 + $0x8] sm:$0x1f] }
  0xbd   :  { %4857 = vmatmul.msk.bf16.gmra.mxu0 %vm291_vm1, %v205_v50  ;;  %4859 = vmatmul.msk.bf16.gmra.mxu1 %vm291_vm1, %v205_v50  ;;  %v552_v60 = vperm.slane %v147_v49, 0  ;;  %v5022_v49 = vld [vmem:[#allocation5 + $0x1d0] sm:$0xf] }
  0xc1   :  { %v247_v51 = vpop.f32.mrf.mxu1 }
  0xc9   :  { %v249_v52 = vpop.f32.mrf.mxu1 }
  0xca   :  { %v253_v53 = vpack.c.bf16 %v249_v52, %v247_v51 }
  0xcc   :  { %4829 = vmatmul.msk.bf16.gmra.mxu2 %vm291_vm1, %v253_v53  ;;  %4831 = vmatmul.msk.bf16.gmra.mxu3 %vm291_vm1, %v253_v53 }
  0xdc   :  { %4872 = vmatmul.msk.bf16.vlgmr.msrb.gmra.mxu2 %vm178_vm0, %v7622_v54 }
  0xec   :  { %4873 = vmatmul.msk.bf16.gmra.mxu2 %vm178_vm0, %v7629_v55 }
 0x129   :  { %v381_v61 = vpop.f32.mrf.mxu0  ;;  %v400_v31 = vpop.f32.mrf.mxu1 }
 0x131   :  { %v383_v27 = vpop.f32.mrf.mxu0  ;;  %v402_v35 = vpop.f32.mrf.mxu1 }
 0x13a   :  { %v386_v29 = vpop.f32.mrf.mxu0  ;;  %v405_v38 = vpop.f32.mrf.mxu1 }
 0x13f   :  { %v307_v62 = vpop.f32.mrf.mxu2  ;;  %v326_v26 = vpop.f32.mrf.mxu3 }
 0x140   :  { %v7654_v7 = vadd.f32 %v381_v61, %v307_v62  ;;  %v401_v45 = vadd.f32 %v400_v31, %v326_v26 }
 0x142   :  { %v388_v32 = vpop.f32.mrf.mxu0  ;;  %v407_v48 = vpop.f32.mrf.mxu1 }
 0x147   :  { %v309_v16 = vpop.f32.mrf.mxu2  ;;  %v328_v28 = vpop.f32.mrf.mxu3 }
 0x148   :  { %v403_v43 = vadd.f32 %v402_v35, %v328_v28  ;;  %v384_v57 = vadd.f32 %v383_v27, %v309_v16  ;;  %v551_v16 = vperm.slane %v146_v6, 0  ;;  %v5038_v27 = vld [vmem:[#allocation5 + $0x1f0] sm:$0xf]  ;;  %v6791_v28 = vld [vmem:[#allocation5 + $0x1f4] sm:$0xf0] }
 0x149   :  { %v5024_v6 = vld [vmem:[#allocation5 + $0x1d8] sm:$0xf0] }
 0x14f   :  { %v312_v18 = vpop.f32.mrf.mxu2  ;;  %v331_v30 = vpop.f32.mrf.mxu3 }
 0x150   :  { %v406_v41 = vadd.f32 %v405_v38, %v331_v30  ;;  %v387_v51 = vadd.f32 %v386_v29, %v312_v18  ;;  %v6789_v38 = vld [vmem:[#allocation5 + $0x1e4] sm:$0xf0] }
 0x157   :  { %v314_v19 = vpop.f32.mrf.mxu2  ;;  %v333_v33 = vpop.f32.mrf.mxu3 }
 0x158   :  { %v408_v52 = vadd.f32 %v407_v48, %v333_v33  ;;  %v389_v12 = vadd.f32 %v388_v32, %v314_v19  ;;  %v5039_v32 = vor.u32 %v6791_v28, %v5038_v27  ;;  %v4968_v27 = vld [vmem:[#allocation5 + $0x168] sm:$0xf0]  ;;  %v4950_v28 = vld [vmem:[#allocation5 + $0x140] sm:$0xf] }
 0x15f   :  { %v440_v20 = vpop.f32.mrf.mxu2 }
 0x167   :  { %v442_v21 = vpop.f32.mrf.mxu2 }
 0x168   :  { %v450_v22 = vpack.c.bf16 %v442_v21, %v440_v20 }
 0x16a   :  { %4904 = vmatmul.msk.bf16.vlgmr.msrb.gmra.mxu3 %vm291_vm1, %v450_v22  ;;  %4906 = vmatmul.msk.bf16.vlgmr.msra.gmra.mxu0 %vm291_vm1, %v450_v22 }
 0x16f   :  { %v445_v23 = vpop.f32.mrf.mxu2 }
 0x177   :  { %v447_v24 = vpop.f32.mrf.mxu2 }
 0x178   :  { %v451_v25 = vpack.c.bf16 %v447_v24, %v445_v23 }
 0x17a   :  { %4905 = vmatmul.msk.bf16.gmra.mxu3 %vm291_vm1, %v451_v25  ;;  %4907 = vmatmul.msk.bf16.gmra.mxu0 %vm291_vm1, %v451_v25 }
 0x1e7   :  { %v523_v34 = vpop.f32.mrf.mxu0 }
 0x1e8   :  { %v7682_v53 = vadd.f32 %v523_v34, %v401_v45 }
 0x1ea   :  { %v544_v1 = vmul.f32 %v542_v46, %v7682_v53 }
 0x1ec   :  { %v554_v20 = vadd.f32 %v552_v60, %v544_v1  ;;  %v6786_v1 = vld [vmem:[#allocation5 + $0x1d4] sm:$0xf] }
 0x1ed   :  { %v504_v36 = vpop.f32.mrf.mxu3 }
 0x1ee   :  { %v7698_v11 = vadd.f32 %v504_v36, %v7654_v7  ;;  %v562_v30 = vmax.f32 %v554_v20, 0.0  ;;  %v6784_v20 = vld [vmem:[#allocation5 + $0x1c4] sm:$0xf] }
 0x1ef   :  { %v525_v37 = vpop.f32.mrf.mxu0 }
 0x1f0   :  { %v7680_v47 = vadd.f32 %v525_v37, %v403_v43  ;;  %v543_v24 = vmul.f32 %v541_v8, %v7698_v11  ;;  %v5030_v37 = vld [vmem:[#allocation5 + $0x1e0] sm:$0xf]  ;;  %v6790_v43 = vld [vmem:[#allocation5 + $0x1f4] sm:$0xf] }
 0x1f1   :  { %v5031_v45 = vor.u32 %v6789_v38, %v5030_v37  ;;  %v4942_v38 = vld [vmem:[#allocation5 + $0x130] sm:$0xf] }
 0x1f2   :  { %v546_v61 = vmul.f32 %v542_v46, %v7680_v47  ;;  %v553_v33 = vadd.f32 %v551_v16, %v543_v24  ;;  %v5006_v24 = vld [vmem:[#allocation5 + $0x1b0] sm:$0xf] }
 0x1f4   :  { %v556_v13 = vadd.f32 %v552_v60, %v546_v61  ;;  %v561_v48 = vmax.f32 %v553_v33, 0.0  ;;  %v4998_v33 = vld [vmem:[#allocation5 + $0x1a0] sm:$0xf] }
 0x1f5   :  { %v506_v39 = vpop.f32.mrf.mxu3 }
 0x1f6   :  { %v7693_v0 = vadd.f32 %v506_v39, %v384_v57  ;;  %v564_v19 = vmax.f32 %v556_v13, 0.0  ;;  %v5032_v57 = vld [vmem:[#allocation5 + $0x1e8] sm:$0xf0]  ;;  %v6774_v13 = vld [vmem:[#allocation5 + $0x174] sm:$0xf] }
 0x1f7   :  { %v528_v40 = vpop.f32.mrf.mxu0 }
 0x1f8   :  { %v7678_v44 = vadd.f32 %v528_v40, %v406_v41  ;;  %v545_v17 = vmul.f32 %v541_v8, %v7693_v0  ;;  %v7710_v36 = vpack.c.bf16 %v564_v19, %v562_v30  ;;  %v4974_v41 = vld [vmem:[#allocation5 + $0x170] sm:$0xf]  ;;  %v6772_v19 = vld [vmem:[#allocation5 + $0x164] sm:$0xf] }
 0x1f9   :  { %v4971_v30 = vor.u32 %v6772_v19, %v4968_v27  ;;  %v5134_v19 = vld [vmem:[#allocation5 + $0xb0] sm:$0xf]  ;;  %v6751_v27 = vld [vmem:[#allocation5 + $0xb4] sm:$0xf0] }
 0x1fa   :  { %v548_v56 = vmul.f32 %v542_v46, %v7678_v44  ;;  %v555_v29 = vadd.f32 %v551_v16, %v545_v17  ;;  %v5027_v17 = vor.u32 %v6786_v1, %v5024_v6  ;;  %v5158_v6 = vld [vmem:[#allocation5 + $0xe0] sm:$0xf] }
 0x1fc   :  { %v558_v9 = vadd.f32 %v552_v60, %v548_v56  ;;  %v563_v39 = vmax.f32 %v555_v29, 0.0  ;;  %v6788_v56 = vld [vmem:[#allocation5 + $0x1e4] sm:$0xf] }
 0x1fd   :  { %v509_v50 = vpop.f32.mrf.mxu3  ;;  %v5035_v61 = vor.u32 %v6788_v56, %v5032_v57  ;;  %v6759_v56 = vld [vmem:[#allocation5 + $0xf4] sm:$0xf0] }
 0x1fe   :  { %v7689_v62 = vadd.f32 %v509_v50, %v387_v51  ;;  %v566_v21 = vmax.f32 %v558_v9, 0.0  ;;  %v6787_v51 = vld [vmem:[#allocation5 + $0x1d4] sm:$0xf0]  ;;  %v7722_v58 = vpack.c.bf16 %v563_v39, %v561_v48  ;;  %v5014_v9 = vld [vmem:[#allocation5 + $0x1c0] sm:$0xf] }
 0x1ff   :  { %v530_v59 = vpop.f32.mrf.mxu0  ;;  %v6767_v39 = vld [vmem:[#allocation5 + $0x134] sm:$0xf0]  ;;  %v6765_v48 = vld [vmem:[#allocation5 + $0x124] sm:$0xf0] }
 0x200   :  { %v7691_v63 = vadd.f32 %v530_v59, %v408_v52  ;;  %v547_v14 = vmul.f32 %v541_v8, %v7689_v62  ;;  %v4975_v52 = vor.u32 %v6775_v42, %v4974_v41  ;;  %v4966_v59 = vld [vmem:[#allocation5 + $0x160] sm:$0xf]  ;;  %v4990_v42 = vld [vmem:[#allocation5 + $0x190] sm:$0xf] }
 0x202   :  { %v550_v10 = vmul.f32 %v542_v46, %v7691_v63  ;;  %v557_v25 = vadd.f32 %v551_v16, %v547_v14  ;;  %v5040_v46 = vld [vmem:[#allocation5 + $0x1f8] sm:$0xf0] }
 0x203   :  { %v5043_v50 = vor.u32 %v6790_v43, %v5040_v46  ;;  %v4976_v14 = vld [vmem:[#allocation5 + $0x178] sm:$0xf0]  ;;  %v6779_v43 = vld [vmem:[#allocation5 + $0x194] sm:$0xf0]  ;;  %v4934_v46 = vld [vmem:[#allocation5 + $0x120] sm:$0xf] }
 0x204   :  { %v560_v15 = vadd.f32 %v552_v60, %v550_v10  ;;  %v565_v34 = vmax.f32 %v557_v25, 0.0  ;;  %v6773_v60 = vld [vmem:[#allocation5 + $0x164] sm:$0xf0]  ;;  %v6783_v25 = vld [vmem:[#allocation5 + $0x1b4] sm:$0xf0]  ;;  %v4935_v57 = vor.u32 %v6765_v48, %v4934_v46 }
 0x205   :  { %v511_v18 = vpop.f32.mrf.mxu3  ;;  %v6785_v10 = vld [vmem:[#allocation5 + $0x1c4] sm:$0xf0]  ;;  %v4992_v46 = vld [vmem:[#allocation5 + $0x198] sm:$0xf0]  ;;  %v5078_v48 = vld [vmem:[#allocation5 + $0x40] sm:$0xf] }
 0x206   :  { %v568_v22 = vmax.f32 %v560_v15, 0.0  ;;  %v7702_v23 = vadd.f32 %v511_v18, %v389_v12  ;;  %v4967_v12 = vor.u32 %v6773_v60, %v4966_v59  ;;  %v4958_v15 = vld [vmem:[#allocation5 + $0x150] sm:$0xf]  ;;  %v4979_v18 = vor.u32 %v6774_v13, %v4976_v14  ;;  %v6763_v60 = vld [vmem:[#allocation5 + $0x114] sm:$0xf0] }
 0x207   :  { %v4926_v59 = vld [vmem:[#allocation5 + $0x110] sm:$0xf]  ;;  %v6743_v14 = vld [vmem:[#allocation5 + $0x74] sm:$0xf0] }
 0x208   :  { %v549_v7 = vmul.f32 %v541_v8, %v7702_v23  ;;  %v7706_v26 = vpack.c.bf16 %v568_v22, %v566_v21  ;;  %v5023_v8 = vor.u32 %v6787_v51, %v5022_v49  ;;  %v5016_v21 = vld [vmem:[#allocation5 + $0x1c8] sm:$0xf0]  ;;  %v5015_v22 = vor.u32 %v6785_v10, %v5014_v9  ;;  %v6777_v51 = vld [vmem:[#allocation5 + $0x184] sm:$0xf0]  ;;  %v4918_v10 = vld [vmem:[#allocation5 + $0x100] sm:$0xf] }
 0x209   :  { %v5019_v29 = vor.u32 %v6784_v20, %v5016_v21  ;;  %v4991_v49 = vor.u32 %v6779_v43, %v4990_v42  ;;  %v4927_v9 = vor.u32 %v6763_v60, %v4926_v59  ;;  %v5102_v13 = vld [vmem:[#allocation5 + $0x70] sm:$0xf]  ;;  %v6741_v20 = vld [vmem:[#allocation5 + $0x64] sm:$0xf0]  ;;  %v6766_v59 = vld [vmem:[#allocation5 + $0x134] sm:$0xf] }
 0x20a   :  { %v559_v31 = vadd.f32 %v551_v16, %v549_v7  ;;  %598 = vmatpush.bf16.msra.mxu2 %v7706_v26  ;;  %672 = vmatpush.bf16.msrb.mxu0 %v7706_v26  ;;  %v6771_v16 = vld [vmem:[#allocation5 + $0x154] sm:$0xf0]  ;;  %v4944_v60 = vld [vmem:[#allocation5 + $0x138] sm:$0xf0] }
 0x20b   :  { %v4959_v7 = vor.u32 %v6771_v16, %v4958_v15  ;;  %v6755_v16 = vld [vmem:[#allocation5 + $0xd4] sm:$0xf0] }
 0x20c   :  { %v567_v35 = vmax.f32 %v559_v31, 0.0  ;;  %v6769_v31 = vld [vmem:[#allocation5 + $0x144] sm:$0xf0] }
 0x20e   :  { %599 = vmatpush.bf16.msra.mxu2 %v7710_v36  ;;  %673 = vmatpush.bf16.msrb.mxu0 %v7710_v36  ;;  %v7714_v40 = vpack.c.bf16 %v567_v35, %v565_v34  ;;  %v6781_v34 = vld [vmem:[#allocation5 + $0x1a4] sm:$0xf0]  ;;  %v4951_v35 = vor.u32 %v6769_v31, %v4950_v28  ;;  %v5135_v28 = vor.u32 %v6751_v27, %v5134_v19  ;;  %v6780_v31 = vld [vmem:[#allocation5 + $0x1a4] sm:$0xf] }
 0x20f   :  { %v4999_v41 = vor.u32 %v6781_v34, %v4998_v33  ;;  %v5086_v33 = vld [vmem:[#allocation5 + $0x50] sm:$0xf]  ;;  %v6739_v34 = vld [vmem:[#allocation5 + $0x54] sm:$0xf0]  ;;  %v6756_v19 = vld [vmem:[#allocation5 + $0xe4] sm:$0xf] }
 0x210   :  { %579 = vmatpush.bf16.msrb.mxu1 %v7714_v40  ;;  %653 = vmatpush.bf16.msra.mxu3 %v7714_v40 }
 0x211   :  { %4914 = vmatmul.msk.bf16.vlgmr.msrb.gmra.mxu0 %vm178_vm0, %v7527_v4  ;;  %4910 = vmatmul.msk.bf16.vlgmr.msra.gmra.mxu2 %vm178_vm0, %v7512_v2 }
 0x212   :  { %901 = vmatpush.bf16.msrb.mxu2 %v5039_v32  ;;  %939 = vmatpush.bf16.msra.mxu0 %v5043_v50  ;;  %v5008_v32 = vld [vmem:[#allocation5 + $0x1b8] sm:$0xf0]  ;;  %v4982_v50 = vld [vmem:[#allocation5 + $0x180] sm:$0xf] }
 0x214   :  { %580 = vmatpush.bf16.msrb.mxu1 %v7722_v58  ;;  %654 = vmatpush.bf16.msra.mxu3 %v7722_v58 }
 0x216   :  { %902 = vmatpush.bf16.msrb.mxu2 %v5031_v45  ;;  %940 = vmatpush.bf16.msra.mxu0 %v5035_v61  ;;  %v4943_v45 = vor.u32 %v6767_v39, %v4942_v38  ;;  %v4983_v61 = vor.u32 %v6777_v51, %v4982_v50  ;;  %v6749_v38 = vld [vmem:[#allocation5 + $0xa4] sm:$0xf0]  ;;  %v6768_v39 = vld [vmem:[#allocation5 + $0x144] sm:$0xf]  ;;  %v5118_v51 = vld [vmem:[#allocation5 + $0x90] sm:$0xf] }
 0x217   :  { %4912 = vmatmul.msk.bf16.vlgmr.msra.gmra.mxu3 %vm178_vm0, %v7527_v4  ;;  %4908 = vmatmul.msk.bf16.vlgmr.msrb.gmra.mxu1 %vm178_vm0, %v7512_v2  ;;  %v6782_v4 = vld [vmem:[#allocation5 + $0x1b4] sm:$0xf]  ;;  %v5007_v2 = vor.u32 %v6783_v25, %v5006_v24  ;;  %v6753_v24 = vld [vmem:[#allocation5 + $0xc4] sm:$0xf0] }
 0x218   :  { %882 = vmatpush.bf16.msra.mxu1 %v4975_v52  ;;  %920 = vmatpush.bf16.msrb.mxu3 %v4979_v18  ;;  %v5011_v37 = vor.u32 %v6782_v4, %v5008_v32  ;;  %v5166_v52 = vld [vmem:[#allocation5 + $0xf0] sm:$0xf]  ;;  %v5094_v18 = vld [vmem:[#allocation5 + $0x60] sm:$0xf]  ;;  %v5000_v32 = vld [vmem:[#allocation5 + $0x1a8] sm:$0xf0] }
 0x219   :  { %v5167_v1 = vor.u32 %v6759_v56, %v5166_v52  ;;  %v5095_v25 = vor.u32 %v6741_v20, %v5094_v18  ;;  %v6737_v50 = vld [vmem:[#allocation5 + $0x44] sm:$0xf0]  ;;  %v6747_v52 = vld [vmem:[#allocation5 + $0x94] sm:$0xf0]  ;;  %v5168_v18 = vld [vmem:[#allocation5 + $0xf8] sm:$0xf0] }
 0x21a   :  { %903 = vmatpush.bf16.msrb.mxu2 %v5023_v8  ;;  %941 = vmatpush.bf16.msra.mxu0 %v5027_v17  ;;  %v6757_v8 = vld [vmem:[#allocation5 + $0xe4] sm:$0xf0]  ;;  %v5103_v17 = vor.u32 %v6743_v14, %v5102_v13  ;;  %v5079_v56 = vor.u32 %v6737_v50, %v5078_v48  ;;  %v5144_v48 = vld [vmem:[#allocation5 + $0xc8] sm:$0xf0]  ;;  %v6740_v50 = vld [vmem:[#allocation5 + $0x64] sm:$0xf] }
 0x21b   :  { %v5159_v15 = vor.u32 %v6757_v8, %v5158_v6  ;;  %v4984_v6 = vld [vmem:[#allocation5 + $0x188] sm:$0xf0]  ;;  %v6745_v14 = vld [vmem:[#allocation5 + $0x84] sm:$0xf0] }
 0x21c   :  { %883 = vmatpush.bf16.msra.mxu1 %v4967_v12  ;;  %921 = vmatpush.bf16.msrb.mxu3 %v4971_v30  ;;  %v6761_v12 = vld [vmem:[#allocation5 + $0x104] sm:$0xf0]  ;;  %v4960_v30 = vld [vmem:[#allocation5 + $0x158] sm:$0xf0] }
 0x21e   :  { %904 = vmatpush.bf16.msrb.mxu2 %v5015_v22  ;;  %942 = vmatpush.bf16.msra.mxu0 %v5019_v29  ;;  %v5142_v22 = vld [vmem:[#allocation5 + $0xc0] sm:$0xf]  ;;  %v6770_v29 = vld [vmem:[#allocation5 + $0x154] sm:$0xf] }
 0x21f   :  { %v4963_v4 = vor.u32 %v6770_v29, %v4960_v30  ;;  %v5054_v30 = vld [vmem:[#allocation5 + $0x10] sm:$0xf] }
 0x220   :  { %884 = vmatpush.bf16.msra.mxu1 %v4959_v7  ;;  %v5143_v7 = vor.u32 %v6753_v24, %v5142_v22  ;;  %v6733_v22 = vld [vmem:[#allocation5 + $0x24] sm:$0xf0] }
 0x221   :  { %4915 = vmatmul.msk.bf16.gmra.mxu0 %vm178_vm0, %v7534_v5  ;;  %4911 = vmatmul.msk.bf16.gmra.mxu2 %vm178_vm0, %v7517_v3 }
 0x222   :  { %905 = vmatpush.bf16.msrb.mxu2 %v5007_v2  ;;  %943 = vmatpush.bf16.msra.mxu0 %v5011_v37  ;;  %v5003_v2 = vor.u32 %v6780_v31, %v5000_v32  ;;  %v5087_v37 = vor.u32 %v6739_v34, %v5086_v33  ;;  %v6731_v31 = vld [vmem:[#allocation5 + $0x14] sm:$0xf0]  ;;  %v6760_v32 = vld [vmem:[#allocation5 + $0x104] sm:$0xf]  ;;  %v6754_v33 = vld [vmem:[#allocation5 + $0xd4] sm:$0xf] }
 0x223   :  { %922 = vmatpush.bf16.msrb.mxu3 %v4963_v4  ;;  %v5055_v4 = vor.u32 %v6731_v31, %v5054_v30 }
 0x224   :  { %885 = vmatpush.bf16.msra.mxu1 %v4951_v35  ;;  %v5126_v35 = vld [vmem:[#allocation5 + $0xa0] sm:$0xf] }
 0x225   :  { %v5127_v42 = vor.u32 %v6749_v38, %v5126_v35  ;;  %v5152_v35 = vld [vmem:[#allocation5 + $0xd8] sm:$0xf0]  ;;  %v5046_v38 = vld [vmem:[#allocation5] sm:$0xf] }
 0x226   :  { %906 = vmatpush.bf16.msrb.mxu2 %v4999_v41  ;;  %v4952_v41 = vld [vmem:[#allocation5 + $0x148] sm:$0xf0]  ;;  %944 = vmatpush.bf16.msra.mxu0 %v5003_v2 }
 0x227   :  { %4913 = vmatmul.msk.bf16.gmra.mxu3 %vm178_vm0, %v7534_v5  ;;  %4909 = vmatmul.msk.bf16.gmra.mxu1 %vm178_vm0, %v7517_v3  ;;  %v5150_v5 = vld [vmem:[#allocation5 + $0xd0] sm:$0xf]  ;;  %v4919_v3 = vor.u32 %v6761_v12, %v4918_v10  ;;  %v4955_v43 = vor.u32 %v6768_v39, %v4952_v41  ;;  %v6735_v10 = vld [vmem:[#allocation5 + $0x34] sm:$0xf0]  ;;  %v5110_v12 = vld [vmem:[#allocation5 + $0x80] sm:$0xf] }
 0x228   :  { %886 = vmatpush.bf16.msra.mxu1 %v4943_v45  ;;  %v5151_v21 = vor.u32 %v6755_v16, %v5150_v5  ;;  %v6778_v45 = vld [vmem:[#allocation5 + $0x194] sm:$0xf]  ;;  %v6764_v5 = vld [vmem:[#allocation5 + $0x124] sm:$0xf]  ;;  %v4936_v16 = vld [vmem:[#allocation5 + $0x128] sm:$0xf0] }
 0x229   :  { %923 = vmatpush.bf16.msrb.mxu3 %v4955_v43  ;;  %v4920_v2 = vld [vmem:[#allocation5 + $0x108] sm:$0xf0]  ;;  %v6729_v39 = vld [vmem:[#allocation5 + $0x4] sm:$0xf0]  ;;  %v5104_v43 = vld [vmem:[#allocation5 + $0x78] sm:$0xf0] }
 0x22a   :  { %907 = vmatpush.bf16.msrb.mxu2 %v4991_v49  ;;  %v4995_v49 = vor.u32 %v6778_v45, %v4992_v46  ;;  %v4923_v34 = vor.u32 %v6760_v32, %v4920_v2  ;;  %v5047_v41 = vor.u32 %v6729_v39, %v5046_v38  ;;  %v6752_v45 = vld [vmem:[#allocation5 + $0xc4] sm:$0xf]  ;;  %v5048_v32 = vld [vmem:[#allocation5 + $0x8] sm:$0xf0] }
 0x22c   :  { %887 = vmatpush.bf16.msra.mxu1 %v4935_v57  ;;  %v5119_v57 = vor.u32 %v6747_v52, %v5118_v51  ;;  %945 = vmatpush.bf16.msra.mxu0 %v4995_v49  ;;  %v5147_v49 = vor.u32 %v6752_v45, %v5144_v48  ;;  %v5096_v51 = vld [vmem:[#allocation5 + $0x68] sm:$0xf0]  ;;  %v6750_v52 = vld [vmem:[#allocation5 + $0xb4] sm:$0xf] }
 0x22e   :  { %908 = vmatpush.bf16.msrb.mxu2 %v4983_v61  ;;  %v6776_v61 = vld [vmem:[#allocation5 + $0x184] sm:$0xf] }
 0x22f   :  { %v4987_v8 = vor.u32 %v6776_v61, %v4984_v6  ;;  %v5088_v61 = vld [vmem:[#allocation5 + $0x58] sm:$0xf0] }
 0x230   :  { %888 = vmatpush.bf16.msra.mxu1 %v4927_v9  ;;  %v5070_v9 = vld [vmem:[#allocation5 + $0x30] sm:$0xf] }
 0x231   :  { %v5071_v13 = vor.u32 %v6735_v10, %v5070_v9  ;;  %946 = vmatpush.bf16.msra.mxu0 %v4987_v8  ;;  %v5128_v8 = vld [vmem:[#allocation5 + $0xa8] sm:$0xf0] }
 0x232   :  { %1137 = vmatpush.bf16.msra.mxu2 %v5167_v1  ;;  %v4947_v1 = vor.u32 %v6766_v59, %v4944_v60  ;;  %v6738_v60 = vld [vmem:[#allocation5 + $0x54] sm:$0xf] }
 0x233   :  { %v5091_v6 = vor.u32 %v6738_v60, %v5088_v61  ;;  %v5298_v61 = vld [vmem:[#allocation5 + $0x2f0] sm:$0xf] }
 0x234   :  { %889 = vmatpush.bf16.msra.mxu1 %v4919_v3  ;;  %924 = vmatpush.bf16.msrb.mxu3 %v4947_v1  ;;  %v6758_v3 = vld [vmem:[#allocation5 + $0xf4] sm:$0xf]  ;;  %v6748_v1 = vld [vmem:[#allocation5 + $0xa4] sm:$0xf] }
 0x235   :  { %v5171_v20 = vor.u32 %v6758_v3, %v5168_v18  ;;  %v5131_v9 = vor.u32 %v6748_v1, %v5128_v8  ;;  %v6734_v3 = vld [vmem:[#allocation5 + $0x34] sm:$0xf]  ;;  %v6744_v18 = vld [vmem:[#allocation5 + $0x84] sm:$0xf]  ;;  %v6823_v1 = vld [vmem:[#allocation5 + $0x2f4] sm:$0xf0] }
 0x236   :  { %1138 = vmatpush.bf16.msra.mxu2 %v5159_v15  ;;  %v5111_v15 = vor.u32 %v6745_v14, %v5110_v12  ;;  %v6736_v12 = vld [vmem:[#allocation5 + $0x44] sm:$0xf]  ;;  %v6746_v14 = vld [vmem:[#allocation5 + $0x94] sm:$0xf]  ;;  %v5299_v8 = vor.u32 %v6823_v1, %v5298_v61  ;;  %v5268_v61 = vld [vmem:[#allocation5 + $0x2b8] sm:$0xf0] }
 0x237   :  { %1175 = vmatpush.bf16.msrb.mxu0 %v5171_v20 }
 0x238   :  { %1118 = vmatpush.bf16.msrb.mxu1 %v5103_v17  ;;  %v4939_v17 = vor.u32 %v6764_v5, %v4936_v16  ;;  %v5120_v5 = vld [vmem:[#allocation5 + $0x98] sm:$0xf0] }
 0x239   :  { %v5123_v16 = vor.u32 %v6746_v14, %v5120_v5  ;;  %v6820_v5 = vld [vmem:[#allocation5 + $0x2e4] sm:$0xf] }
 0x23a   :  { %1139 = vmatpush.bf16.msra.mxu2 %v5151_v21  ;;  %v5062_v21 = vld [vmem:[#allocation5 + $0x20] sm:$0xf]  ;;  %925 = vmatpush.bf16.msrb.mxu3 %v4939_v17  ;;  %v5072_v17 = vld [vmem:[#allocation5 + $0x38] sm:$0xf0] }
 0x23b   :  { %v5063_v24 = vor.u32 %v6733_v22, %v5062_v21  ;;  %v5075_v20 = vor.u32 %v6734_v3, %v5072_v17  ;;  %v5112_v21 = vld [vmem:[#allocation5 + $0x88] sm:$0xf0] }
 0x23c   :  { %1119 = vmatpush.bf16.msrb.mxu1 %v5095_v25  ;;  %v6762_v25 = vld [vmem:[#allocation5 + $0x114] sm:$0xf]  ;;  %v5292_v3 = vld [vmem:[#allocation5 + $0x2e8] sm:$0xf0] }
 0x23e   :  { %1140 = vmatpush.bf16.msra.mxu2 %v5143_v7  ;;  %v4928_v7 = vld [vmem:[#allocation5 + $0x118] sm:$0xf0] }
 0x23f   :  { %v4931_v27 = vor.u32 %v6762_v25, %v4928_v7  ;;  %v6732_v7 = vld [vmem:[#allocation5 + $0x24] sm:$0xf] }
 0x240   :  { %1120 = vmatpush.bf16.msrb.mxu1 %v5087_v37  ;;  %v5155_v37 = vor.u32 %v6754_v33, %v5152_v35 }
 0x241   :  { %926 = vmatpush.bf16.msrb.mxu3 %v4931_v27 }
 0x242   :  { %1141 = vmatpush.bf16.msra.mxu2 %v5135_v28  ;;  %v5160_v28 = vld [vmem:[#allocation5 + $0xe8] sm:$0xf0] }
 0x243   :  { %v5163_v29 = vor.u32 %v6756_v19, %v5160_v28  ;;  %v5064_v19 = vld [vmem:[#allocation5 + $0x28] sm:$0xf0]  ;;  %v6730_v28 = vld [vmem:[#allocation5 + $0x14] sm:$0xf] }
 0x244   :  { %1121 = vmatpush.bf16.msrb.mxu1 %v5079_v56  ;;  %v5099_v56 = vor.u32 %v6740_v50, %v5096_v51  ;;  %v5067_v27 = vor.u32 %v6732_v7, %v5064_v19  ;;  %v5282_v19 = vld [vmem:[#allocation5 + $0x2d0] sm:$0xf] }
 0x245   :  { %1176 = vmatpush.bf16.msrb.mxu0 %v5163_v29  ;;  %927 = vmatpush.bf16.msrb.mxu3 %v4923_v34  ;;  %v5056_v29 = vld [vmem:[#allocation5 + $0x18] sm:$0xf0] }
 0x246   :  { %1142 = vmatpush.bf16.msra.mxu2 %v5127_v42  ;;  %v6742_v42 = vld [vmem:[#allocation5 + $0x74] sm:$0xf]  ;;  %v5059_v31 = vor.u32 %v6730_v28, %v5056_v29 }
 0x247   :  { %v5107_v46 = vor.u32 %v6742_v42, %v5104_v43  ;;  %v6818_v28 = vld [vmem:[#allocation5 + $0x2d4] sm:$0xf] }
 0x248   :  { %1122 = vmatpush.bf16.msrb.mxu1 %v5071_v13  ;;  %v5080_v13 = vld [vmem:[#allocation5 + $0x48] sm:$0xf0] }
 0x249   :  { %1177 = vmatpush.bf16.msrb.mxu0 %v5155_v37  ;;  %1156 = vmatpush.bf16.msra.mxu3 %v5107_v46 }
 0x24a   :  { %1143 = vmatpush.bf16.msra.mxu2 %v5119_v57  ;;  %v5136_v57 = vld [vmem:[#allocation5 + $0xb8] sm:$0xf0] }
 0x24b   :  { %v5139_v59 = vor.u32 %v6750_v52, %v5136_v57 }
 0x24c   :  { %1123 = vmatpush.bf16.msrb.mxu1 %v5063_v24  ;;  %v5115_v24 = vor.u32 %v6744_v18, %v5112_v21  ;;  %v5295_v18 = vor.u32 %v6820_v5, %v5292_v3  ;;  %v6807_v21 = vld [vmem:[#allocation5 + $0x274] sm:$0xf0]  ;;  %v6813_v5 = vld [vmem:[#allocation5 + $0x2a4] sm:$0xf0] }
 0x24d   :  { %1178 = vmatpush.bf16.msrb.mxu0 %v5147_v49  ;;  %1157 = vmatpush.bf16.msra.mxu3 %v5099_v56 }
 0x24e   :  { %1144 = vmatpush.bf16.msra.mxu2 %v5111_v15  ;;  %v5083_v15 = vor.u32 %v6736_v12, %v5080_v13 }
 0x250   :  { %1124 = vmatpush.bf16.msrb.mxu1 %v5055_v4  ;;  %v6728_v4 = vld [vmem:[#allocation5 + $0x4] sm:$0xf] }
 0x251   :  { %1179 = vmatpush.bf16.msrb.mxu0 %v5139_v59  ;;  %1158 = vmatpush.bf16.msra.mxu3 %v5091_v6  ;;  %v5051_v33 = vor.u32 %v6728_v4, %v5048_v32  ;;  %v6822_v6 = vld [vmem:[#allocation5 + $0x2f4] sm:$0xf]  ;;  %v5226_v4 = vld [vmem:[#allocation5 + $0x260] sm:$0xf]  ;;  %v6805_v32 = vld [vmem:[#allocation5 + $0x264] sm:$0xf0] }
 0x254   :  { %1125 = vmatpush.bf16.msrb.mxu1 %v5047_v41 }
 0x255   :  { %1180 = vmatpush.bf16.msrb.mxu0 %v5131_v9  ;;  %1159 = vmatpush.bf16.msra.mxu3 %v5083_v15  ;;  %v5300_v9 = vld [vmem:[#allocation5 + $0x2f8] sm:$0xf0]  ;;  %v6821_v15 = vld [vmem:[#allocation5 + $0x2e4] sm:$0xf0] }
 0x259   :  { %1181 = vmatpush.bf16.msrb.mxu0 %v5123_v16  ;;  %1160 = vmatpush.bf16.msra.mxu3 %v5075_v20  ;;  %v5234_v20 = vld [vmem:[#allocation5 + $0x270] sm:$0xf] }
 0x25d   :  { %1182 = vmatpush.bf16.msrb.mxu0 %v5115_v24  ;;  %1161 = vmatpush.bf16.msra.mxu3 %v5067_v27  ;;  %v5235_v24 = vor.u32 %v6807_v21, %v5234_v20  ;;  %v6819_v27 = vld [vmem:[#allocation5 + $0x2d4] sm:$0xf0]  ;;  %v5202_v21 = vld [vmem:[#allocation5 + $0x230] sm:$0xf] }
 0x25e   :  { %v5283_v29 = vor.u32 %v6819_v27, %v5282_v19  ;;  %v5250_v27 = vld [vmem:[#allocation5 + $0x290] sm:$0xf] }
 0x261   :  { %1162 = vmatpush.bf16.msra.mxu3 %v5059_v31 }
 0x265   :  { %1163 = vmatpush.bf16.msra.mxu3 %v5051_v33  ;;  %v5227_v33 = vor.u32 %v6805_v32, %v5226_v4  ;;  %v5194_v32 = vld [vmem:[#allocation5 + $0x220] sm:$0xf] }
 0x28e   :  { %v675_v10 = vpop.f32.mrf.mxu0 }
 0x294   :  { %v601_v37 = vpop.f32.mrf.mxu2 }
 0x296   :  { %v677_v22 = vpop.f32.mrf.mxu0 }
 0x297   :  { %v686_v25 = vpack.c.bf16 %v677_v22, %v675_v10  ;;  %v6806_v22 = vld [vmem:[#allocation5 + $0x274] sm:$0xf] }
 0x299   :  { %909 = vmatmul.bf16.vlgmr.msrb.gmra.mxu2 %v686_v25  ;;  %947 = vmatmul.bf16.vlgmr.msra.gmra.mxu0 %v686_v25  ;;  %v5236_v25 = vld [vmem:[#allocation5 + $0x278] sm:$0xf0] }
 0x29a   :  { %1219 = vmatpush.bf16.msrb.mxu2 %v7706_v26  ;;  %v656_v30 = vpop.f32.mrf.mxu3  ;;  %1448 = vmatpush.bf16.msra.mxu0 %v5299_v8  ;;  %v5239_v7 = vor.u32 %v6806_v22, %v5236_v25  ;;  %v6801_v8 = vld [vmem:[#allocation5 + $0x244] sm:$0xf0]  ;;  %v6799_v22 = vld [vmem:[#allocation5 + $0x234] sm:$0xf0] }
 0x29b   :  { %v5203_v25 = vor.u32 %v6799_v22, %v5202_v21 }
 0x29c   :  { %v603_v41 = vpop.f32.mrf.mxu2 }
 0x29d   :  { %v612_v45 = vpack.c.bf16 %v603_v41, %v601_v37 }
 0x29e   :  { %1220 = vmatpush.bf16.msrb.mxu2 %v7710_v36  ;;  %v680_v2 = vpop.f32.mrf.mxu0  ;;  %v582_v36 = vpop.f32.mrf.mxu1 }
 0x2a2   :  { %v658_v34 = vpop.f32.mrf.mxu3 }
 0x2a3   :  { %v685_v35 = vpack.c.bf16 %v658_v34, %v656_v30  ;;  %v5284_v30 = vld [vmem:[#allocation5 + $0x2d8] sm:$0xf0]  ;;  %v5228_v34 = vld [vmem:[#allocation5 + $0x268] sm:$0xf0] }
 0x2a4   :  { %v606_v46 = vpop.f32.mrf.mxu2  ;;  %v5287_v31 = vor.u32 %v6818_v28, %v5284_v30  ;;  %v6811_v28 = vld [vmem:[#allocation5 + $0x294] sm:$0xf0] }
 0x2a5   :  { %890 = vmatmul.bf16.vlgmr.msra.gmra.mxu1 %v685_v35  ;;  %928 = vmatmul.bf16.vlgmr.msrb.gmra.mxu3 %v685_v35  ;;  %v5251_v30 = vor.u32 %v6811_v28, %v5250_v27 }
 0x2a6   :  { %1200 = vmatpush.bf16.msra.mxu1 %v7714_v40  ;;  %v682_v38 = vpop.f32.mrf.mxu0  ;;  %v584_v48 = vpop.f32.mrf.mxu1  ;;  %1429 = vmatpush.bf16.msrb.mxu3 %v5235_v24  ;;  %v6798_v24 = vld [vmem:[#allocation5 + $0x234] sm:$0xf] }
 0x2a7   :  { %v688_v26 = vpack.c.bf16 %v682_v38, %v680_v2  ;;  %v611_v40 = vpack.c.bf16 %v584_v48, %v582_v36  ;;  %v6804_v2 = vld [vmem:[#allocation5 + $0x264] sm:$0xf]  ;;  %v5274_v38 = vld [vmem:[#allocation5 + $0x2c0] sm:$0xf]  ;;  %v6803_v48 = vld [vmem:[#allocation5 + $0x254] sm:$0xf0] }
 0x2a8   :  { %v5231_v37 = vor.u32 %v6804_v2, %v5228_v34  ;;  %v6797_v2 = vld [vmem:[#allocation5 + $0x224] sm:$0xf0] }
 0x2a9   :  { %914 = vmatmul.bf16.gmra.mxu2 %v688_v26  ;;  %952 = vmatmul.bf16.gmra.mxu0 %v688_v26  ;;  %v6817_v26 = vld [vmem:[#allocation5 + $0x2c4] sm:$0xf0]  ;;  %v5195_v34 = vor.u32 %v6797_v2, %v5194_v32 }
 0x2aa   :  { %1201 = vmatpush.bf16.msra.mxu1 %v7722_v58  ;;  %v661_v39 = vpop.f32.mrf.mxu3  ;;  %1430 = vmatpush.bf16.msrb.mxu3 %v5227_v33  ;;  %v5275_v36 = vor.u32 %v6817_v26, %v5274_v38  ;;  %v6796_v33 = vld [vmem:[#allocation5 + $0x224] sm:$0xf]  ;;  %v5242_v26 = vld [vmem:[#allocation5 + $0x280] sm:$0xf] }
 0x2ac   :  { %v608_v49 = vpop.f32.mrf.mxu2 }
 0x2ad   :  { %v614_v51 = vpack.c.bf16 %v608_v49, %v606_v46  ;;  %v5218_v46 = vld [vmem:[#allocation5 + $0x250] sm:$0xf] }
 0x2ae   :  { %v587_v50 = vpop.f32.mrf.mxu1  ;;  %v5219_v49 = vor.u32 %v6803_v48, %v5218_v46  ;;  %v5244_v46 = vld [vmem:[#allocation5 + $0x288] sm:$0xf0] }
 0x2b0   :  { %1431 = vmatpush.bf16.msrb.mxu3 %v5219_v49  ;;  %v5186_v49 = vld [vmem:[#allocation5 + $0x210] sm:$0xf] }
 0x2b2   :  { %v663_v42 = vpop.f32.mrf.mxu3 }
 0x2b3   :  { %v687_v43 = vpack.c.bf16 %v663_v42, %v661_v39  ;;  %v6816_v39 = vld [vmem:[#allocation5 + $0x2c4] sm:$0xf]  ;;  %v5276_v42 = vld [vmem:[#allocation5 + $0x2c8] sm:$0xf0] }
 0x2b5   :  { %895 = vmatmul.bf16.gmra.mxu1 %v687_v43  ;;  %933 = vmatmul.bf16.gmra.mxu3 %v687_v43 }
 0x2b6   :  { %v589_v58 = vpop.f32.mrf.mxu1 }
 0x2b7   :  { %v613_v52 = vpack.c.bf16 %v589_v58, %v587_v50  ;;  %v5220_v50 = vld [vmem:[#allocation5 + $0x258] sm:$0xf0]  ;;  %v5266_v58 = vld [vmem:[#allocation5 + $0x2b0] sm:$0xf] }
 0x2b9   :  { %1145 = vmatmul.bf16.vlgmr.msra.gmra.mxu2 %v612_v45  ;;  %1183 = vmatmul.bf16.vlgmr.msrb.gmra.mxu0 %v612_v45  ;;  %v5279_v45 = vor.u32 %v6816_v39, %v5276_v42  ;;  %v6809_v39 = vld [vmem:[#allocation5 + $0x284] sm:$0xf0] }
 0x2c5   :  { %1126 = vmatmul.bf16.vlgmr.msrb.gmra.mxu1 %v611_v40  ;;  %1164 = vmatmul.bf16.vlgmr.msra.gmra.mxu3 %v611_v40  ;;  %v6802_v40 = vld [vmem:[#allocation5 + $0x254] sm:$0xf] }
 0x2c6   :  { %1467 = vmatpush.bf16.msrb.mxu1 %v5239_v7  ;;  %v5204_v7 = vld [vmem:[#allocation5 + $0x238] sm:$0xf0] }
 0x2c7   :  { %v5207_v19 = vor.u32 %v6798_v24, %v5204_v7 }
 0x2c9   :  { %1150 = vmatmul.bf16.gmra.mxu2 %v614_v51  ;;  %1188 = vmatmul.bf16.gmra.mxu0 %v614_v51  ;;  %v5223_v51 = vor.u32 %v6802_v40, %v5220_v50  ;;  %v6795_v50 = vld [vmem:[#allocation5 + $0x214] sm:$0xf0] }
 0x2ca   :  { %1468 = vmatpush.bf16.msrb.mxu1 %v5231_v37 }
 0x2ce   :  { %1469 = vmatpush.bf16.msrb.mxu1 %v5223_v51  ;;  %v6794_v51 = vld [vmem:[#allocation5 + $0x214] sm:$0xf] }
 0x2d5   :  { %1131 = vmatmul.bf16.gmra.mxu1 %v613_v52  ;;  %1169 = vmatmul.bf16.gmra.mxu3 %v613_v52  ;;  %v6815_v52 = vld [vmem:[#allocation5 + $0x2b4] sm:$0xf0] }
 0x2d9   :  { %5174 = vmatmul.msk.bf16.vlgmr.msrb.gmra.mxu2 %vm178_vm0, %v7622_v54 }
 0x2e5   :  { %5172 = vmatmul.msk.bf16.vlgmr.msra.gmra.mxu1 %vm178_vm0, %v7622_v54  ;;  %v5303_v54 = vor.u32 %v6822_v6, %v5300_v9  ;;  %v5210_v6 = vld [vmem:[#allocation5 + $0x240] sm:$0xf]  ;;  %v6800_v9 = vld [vmem:[#allocation5 + $0x244] sm:$0xf] }
 0x2e7   :  { %1486 = vmatpush.bf16.msra.mxu2 %v5303_v54 }
 0x2e9   :  { %5175 = vmatmul.msk.bf16.gmra.mxu2 %vm178_vm0, %v7629_v55 }
 0x2eb   :  { %1487 = vmatpush.bf16.msra.mxu2 %v5295_v18 }
 0x2ef   :  { %1488 = vmatpush.bf16.msra.mxu2 %v5287_v31  ;;  %v5252_v31 = vld [vmem:[#allocation5 + $0x298] sm:$0xf0] }
 0x2f3   :  { %1489 = vmatpush.bf16.msra.mxu2 %v5279_v45  ;;  %v5243_v45 = vor.u32 %v6809_v39, %v5242_v26 }
 0x2f5   :  { %5173 = vmatmul.msk.bf16.gmra.mxu1 %vm178_vm0, %v7629_v55  ;;  %v5290_v55 = vld [vmem:[#allocation5 + $0x2e0] sm:$0xf] }
 0x2f6   :  { %v5291_v16 = vor.u32 %v6821_v15, %v5290_v55  ;;  %v5258_v15 = vld [vmem:[#allocation5 + $0x2a0] sm:$0xf] }
 0x2f7   :  { %v5259_v3 = vor.u32 %v6813_v5, %v5258_v15 }
 0x2f8   :  { %1449 = vmatpush.bf16.msra.mxu0 %v5291_v16  ;;  %v6812_v16 = vld [vmem:[#allocation5 + $0x2a4] sm:$0xf] }
 0x2fc   :  { %1450 = vmatpush.bf16.msra.mxu0 %v5283_v29  ;;  %v6810_v29 = vld [vmem:[#allocation5 + $0x294] sm:$0xf] }
 0x2fd   :  { %v5255_v4 = vor.u32 %v6810_v29, %v5252_v31 }
 0x300   :  { %1451 = vmatpush.bf16.msra.mxu0 %v5275_v36  ;;  %v6808_v36 = vld [vmem:[#allocation5 + $0x284] sm:$0xf] }
 0x301   :  { %v5247_v40 = vor.u32 %v6808_v36, %v5244_v46 }
 0x316   :  { %v948_v10 = vpop.f32.mrf.mxu0 }
 0x31c   :  { %v910_v56 = vpop.f32.mrf.mxu2 }
 0x31e   :  { %v950_v29 = vpop.f32.mrf.mxu0 }
 0x322   :  { %v891_v57 = vpop.f32.mrf.mxu1 }
 0x323   :  { %v7750_v59 = vadd.f32 %v910_v56, %v891_v57  ;;  %v6814_v56 = vld [vmem:[#allocation5 + $0x2b4] sm:$0xf]  ;;  %v5267_v57 = vor.u32 %v6815_v52, %v5266_v58  ;;  %v5187_v52 = vor.u32 %v6795_v50, %v5186_v49 }
 0x324   :  { %v7752_v60 = vpop.f32.mrf.mxu2  ;;  %v5271_v1 = vor.u32 %v6814_v56, %v5268_v61  ;;  %v5188_v56 = vld [vmem:[#allocation5 + $0x218] sm:$0xf0]  ;;  %v6793_v61 = vld [vmem:[#allocation5 + $0x204] sm:$0xf0] }
 0x325   :  { %1452 = vmatpush.bf16.msra.mxu0 %v5267_v57  ;;  %v5191_v57 = vor.u32 %v6794_v51, %v5188_v56 }
 0x326   :  { %1490 = vmatpush.bf16.msra.mxu2 %v5271_v1  ;;  %v6792_v1 = vld [vmem:[#allocation5 + $0x204] sm:$0xf]  ;;  %v953_v31 = vpop.f32.mrf.mxu0 }
 0x328   :  { %v929_v12 = vpop.f32.mrf.mxu3 }
 0x329   :  { %v7754_v13 = vadd.f32 %v948_v10, %v929_v12  ;;  %v5211_v10 = vor.u32 %v6801_v8, %v5210_v6  ;;  %v5212_v12 = vld [vmem:[#allocation5 + $0x248] sm:$0xf0]  ;;  %1453 = vmatpush.bf16.msra.mxu0 %v5259_v3 }
 0x32a   :  { %v7756_v14 = vpop.f32.mrf.mxu1  ;;  %v5215_v55 = vor.u32 %v6800_v9, %v5212_v12  ;;  %v5180_v8 = vld [vmem:[#allocation5 + $0x208] sm:$0xf0] }
 0x32b   :  { %1432 = vmatpush.bf16.msrb.mxu3 %v5211_v10  ;;  %v5183_v10 = vor.u32 %v6792_v1, %v5180_v8 }
 0x32c   :  { %v915_v17 = vpop.f32.mrf.mxu2  ;;  %1470 = vmatpush.bf16.msrb.mxu1 %v5215_v55 }
 0x32d   :  { %1454 = vmatpush.bf16.msra.mxu0 %v5251_v30 }
 0x32e   :  { %v955_v32 = vpop.f32.mrf.mxu0 }
 0x32f   :  { %1433 = vmatpush.bf16.msrb.mxu3 %v5203_v25 }
 0x330   :  { %1471 = vmatpush.bf16.msrb.mxu1 %v5207_v19  ;;  %v931_v30 = vpop.f32.mrf.mxu3 }
 0x331   :  { %1455 = vmatpush.bf16.msra.mxu0 %v5243_v45 }
 0x332   :  { %v896_v35 = vpop.f32.mrf.mxu1 }
 0x333   :  { %v7758_v41 = vadd.f32 %v915_v17, %v896_v35  ;;  %v5260_v17 = vld [vmem:[#allocation5 + $0x2a8] sm:$0xf0]  ;;  %1434 = vmatpush.bf16.msrb.mxu3 %v5195_v34 }
 0x334   :  { %v7760_v43 = vpop.f32.mrf.mxu2  ;;  %v5263_v20 = vor.u32 %v6812_v16, %v5260_v17  ;;  %v5196_v35 = vld [vmem:[#allocation5 + $0x228] sm:$0xf0] }
 0x335   :  { %v5199_v38 = vor.u32 %v6796_v33, %v5196_v35 }
 0x336   :  { %1491 = vmatpush.bf16.msra.mxu2 %v5263_v20  ;;  %v1184_v33 = vpop.f32.mrf.mxu0 }
 0x337   :  { %1472 = vmatpush.bf16.msrb.mxu1 %v5199_v38  ;;  %1435 = vmatpush.bf16.msrb.mxu3 %v5187_v52 }
 0x33a   :  { %v7762_v54 = vpop.f32.mrf.mxu1  ;;  %1492 = vmatpush.bf16.msra.mxu2 %v5255_v4  ;;  %v934_v4 = vpop.f32.mrf.mxu3 }
 0x33b   :  { %1473 = vmatpush.bf16.msrb.mxu1 %v5191_v57  ;;  %v954_v52 = vadd.f32 %v953_v31, %v934_v4  ;;  %v951_v57 = vadd.f32 %v950_v29, %v931_v30  ;;  %v918_v29 = vadd.f32 %v7760_v43, %v7762_v54  ;;  %v7182_v43 = vld [vmem:[%s8266_s12] sm:$0x1f] }
 0x33c   :  { %v1146_v18 = vpop.f32.mrf.mxu2  ;;  %v1513_v54 = vperm.slane %v7182_v43, 1 }
 0x33e   :  { %1493 = vmatpush.bf16.msra.mxu2 %v5247_v40  ;;  %v1186_v35 = vpop.f32.mrf.mxu0 }
 0x33f   :  { %1474 = vmatpush.bf16.msrb.mxu1 %v5183_v10 }
 0x342   :  { %v1127_v37 = vpop.f32.mrf.mxu1  ;;  %v936_v2 = vpop.f32.mrf.mxu3 }
 0x343   :  { %v1128_v42 = vadd.f32 %v1127_v37, %v7750_v59  ;;  %v5178_v59 = vld [vmem:[#allocation5 + $0x200] sm:$0xf] }
 0x344   :  { %v7765_v48 = vpop.f32.mrf.mxu2  ;;  %v5179_v6 = vor.u32 %v6793_v61, %v5178_v59 }
 0x345   :  { %v7767_v58 = vadd.f32 %v1146_v18, %v1128_v42 }
 0x346   :  { %1436 = vmatpush.bf16.msrb.mxu3 %v5179_v6  ;;  %v1189_v38 = vpop.f32.mrf.mxu0 }
 0x34a   :  { %v7769_v9 = vpop.f32.mrf.mxu1  ;;  %v1165_v34 = vpop.f32.mrf.mxu3 }
 0x34b   :  { %v1166_v10 = vadd.f32 %v1165_v34, %v7754_v13 }
 0x34c   :  { %v1151_v12 = vpop.f32.mrf.mxu2 }
 0x34e   :  { %v1191_v39 = vpop.f32.mrf.mxu0 }
 0x352   :  { %v1132_v55 = vpop.f32.mrf.mxu1  ;;  %v1167_v37 = vpop.f32.mrf.mxu3 }
 0x353   :  { %v1133_v15 = vadd.f32 %v1132_v55, %v7758_v41  ;;  %v1168_v6 = vadd.f32 %v1167_v37, %v951_v57  ;;  %v7181_v37 = vld [vmem:[#allocation11 + $0x8] sm:$0x1f] }
 0x354   :  { %v7772_v5 = vpop.f32.mrf.mxu2 }
 0x355   :  { %v7774_v16 = vadd.f32 %v1151_v12, %v1133_v15  ;;  %v956_v12 = vadd.f32 %v955_v32, %v936_v2 }
 0x35a   :  { %v7776_v3 = vpop.f32.mrf.mxu1  ;;  %v1170_v26 = vpop.f32.mrf.mxu3 }
 0x35b   :  { %v1171_v59 = vadd.f32 %v1170_v26, %v954_v52 }
 0x35c   :  { %v1222_v17 = vpop.f32.mrf.mxu2 }
 0x35d   :  { %v1190_v55 = vadd.f32 %v1189_v38, %v1171_v59  ;;  %v1524_v38 = vperm.slane %v7181_v37, 1  ;;  %v5436_v37 = vld [vmem:[#allocation7 + $0x1f8] sm:$0xf0] }
 0x362   :  { %v1203_v18 = vpop.f32.mrf.mxu1  ;;  %v1172_v36 = vpop.f32.mrf.mxu3 }
 0x364   :  { %v1224_v20 = vpop.f32.mrf.mxu2 }
 0x365   :  { %v1233_v21 = vpack.c.bf16 %v1224_v20, %v1222_v17  ;;  %v913_v17 = vadd.f32 %v7752_v60, %v7756_v14 }
 0x367   :  { %1456 = vmatmul.bf16.vlgmr.msra.gmra.mxu0 %v1233_v21  ;;  %1494 = vmatmul.bf16.vlgmr.msra.gmra.mxu2 %v1233_v21  ;;  %v1187_v21 = vadd.f32 %v1186_v35, %v1168_v6 }
 0x36a   :  { %v1205_v22 = vpop.f32.mrf.mxu1 }
 0x36b   :  { %v1232_v24 = vpack.c.bf16 %v1205_v22, %v1203_v18  ;;  %v1173_v22 = vadd.f32 %v1172_v36, %v956_v12 }
 0x36c   :  { %v1227_v25 = vpop.f32.mrf.mxu2 }
 0x36d   :  { %1437 = vmatmul.bf16.vlgmr.msrb.gmra.mxu3 %v1232_v24  ;;  %1475 = vmatmul.bf16.vlgmr.msrb.gmra.mxu1 %v1232_v24  ;;  %v1192_v31 = vadd.f32 %v1191_v39, %v1173_v22 }
 0x372   :  { %v1208_v7 = vpop.f32.mrf.mxu1 }
 0x374   :  { %v1229_v19 = vpop.f32.mrf.mxu2 }
 0x375   :  { %v1235_v41 = vpack.c.bf16 %v1229_v19, %v1227_v25  ;;  %v1185_v25 = vadd.f32 %v1184_v33, %v1166_v10  ;;  %v1135_v33 = vadd.f32 %v7776_v3, %v918_v29  ;;  %v5370_v29 = vld [vmem:[#allocation7 + $0x170] sm:$0xf] }
 0x377   :  { %1461 = vmatmul.bf16.gmra.mxu0 %v1235_v41  ;;  %1499 = vmatmul.bf16.gmra.mxu2 %v1235_v41  ;;  %v7180_v41 = vld [vmem:[%s8266_s12 + $0x8] sm:$0x1f] }
 0x378   :  { %v1514_v13 = vperm.slane %v7180_v41, 1  ;;  %v5426_v41 = vld [vmem:[#allocation7 + $0x1e0] sm:$0xf] }
 0x37a   :  { %v1210_v27 = vpop.f32.mrf.mxu1 }
 0x37b   :  { %v1234_v28 = vpack.c.bf16 %v1210_v27, %v1208_v7  ;;  %v1130_v7 = vadd.f32 %v7769_v9, %v913_v17  ;;  %v6887_v17 = vld [vmem:[#allocation7 + $0x1f4] sm:$0xf0] }
 0x37d   :  { %1442 = vmatmul.bf16.gmra.mxu3 %v1234_v28  ;;  %1480 = vmatmul.bf16.gmra.mxu1 %v1234_v28  ;;  %v1149_v9 = vadd.f32 %v7765_v48, %v1130_v7  ;;  %v1154_v48 = vadd.f32 %v7772_v5, %v1135_v33 }
 0x3e4   :  { %v1457_v42 = vpop.f32.mrf.mxu0 }
 0x3ea   :  { %v1476_v45 = vpop.f32.mrf.mxu1  ;;  %v1495_v46 = vpop.f32.mrf.mxu2 }
 0x3eb   :  { %v1496_v18 = vadd.f32 %v1495_v46, %v1476_v45 }
 0x3ec   :  { %v1459_v51 = vpop.f32.mrf.mxu0 }
 0x3ed   :  { %v1506_v60 = vadd.f32 %v1496_v18, %v1185_v25 }
 0x3ef   :  { %v1516_v45 = vmul.f32 %v1514_v13, %v1506_v60  ;;  %v6871_v60 = vld [vmem:[#allocation7 + $0x174] sm:$0xf0] }
 0x3f0   :  { %v1438_v40 = vpop.f32.mrf.mxu3  ;;  %v5371_v33 = vor.u32 %v6871_v60, %v5370_v29  ;;  %v6862_v60 = vld [vmem:[#allocation7 + $0x134] sm:$0xf] }
 0x3f1   :  { %v1458_v34 = vadd.f32 %v1457_v42, %v1438_v40  ;;  %v1526_v59 = vadd.f32 %v1524_v38, %v1516_v45 }
 0x3f2   :  { %v1478_v49 = vpop.f32.mrf.mxu1  ;;  %v1497_v50 = vpop.f32.mrf.mxu2 }
 0x3f3   :  { %v1498_v15 = vadd.f32 %v1497_v50, %v1478_v49  ;;  %v1505_v3 = vadd.f32 %v1458_v34, %v7767_v58  ;;  %v5434_v58 = vld [vmem:[#allocation7 + $0x1f0] sm:$0xf]  ;;  %v5372_v34 = vld [vmem:[#allocation7 + $0x178] sm:$0xf0] }
 0x3f4   :  { %v1462_v20 = vpop.f32.mrf.mxu0 }
 0x3f5   :  { %v1508_v27 = vadd.f32 %v1498_v15, %v1187_v21  ;;  %v1515_v10 = vmul.f32 %v1513_v54, %v1505_v3  ;;  %v5364_v3 = vld [vmem:[#allocation7 + $0x168] sm:$0xf0] }
 0x3f7   :  { %v1518_v35 = vmul.f32 %v1514_v13, %v1508_v27 }
 0x3f8   :  { %v1440_v56 = vpop.f32.mrf.mxu3 }
 0x3f9   :  { %v1460_v4 = vadd.f32 %v1459_v51, %v1440_v56  ;;  %v7183_v56 = vld [vmem:[#allocation11] sm:$0x1f] }
 0x3fa   :  { %v1481_v61 = vpop.f32.mrf.mxu1  ;;  %v1500_v1 = vpop.f32.mrf.mxu2  ;;  %v1523_v57 = vperm.slane %v7183_v56, 1  ;;  %v6866_v56 = vld [vmem:[#allocation7 + $0x154] sm:$0xf] }
 0x3fb   :  { %v1501_v8 = vadd.f32 %v1500_v1, %v1481_v61  ;;  %v1507_v39 = vadd.f32 %v1460_v4, %v1149_v9  ;;  %v6883_v4 = vld [vmem:[#allocation7 + $0x1d4] sm:$0xf0]  ;;  %v7185_v9 = vld [vmem:[%s8255_s1] sm:$0xff] }
 0x3fc   :  { %v1464_v42 = vpop.f32.mrf.mxu0  ;;  %v1525_v22 = vadd.f32 %v1523_v57, %v1515_v10  ;;  %v6879_v10 = vld [vmem:[#allocation7 + $0x1b4] sm:$0xf0] }
 0x3fd   :  { %v1510_v24 = vadd.f32 %v1501_v8, %v1190_v55  ;;  %v1517_v61 = vmul.f32 %v1513_v54, %v1507_v39  ;;  %v5410_v39 = vld [vmem:[#allocation7 + $0x1c0] sm:$0xf] }
 0x3ff   :  { %v1520_v32 = vmul.f32 %v1514_v13, %v1510_v24  ;;  %v1527_v21 = vadd.f32 %v1523_v57, %v1517_v61  ;;  %v5435_v24 = vor.u32 %v6887_v17, %v5434_v58  ;;  %v6882_v61 = vld [vmem:[#allocation7 + $0x1d4] sm:$0xf]  ;;  %v6865_v58 = vld [vmem:[#allocation7 + $0x144] sm:$0xf0]  ;;  %v6864_v17 = vld [vmem:[#allocation7 + $0x144] sm:$0xf] }
 0x400   :  { %v1443_v19 = vpop.f32.mrf.mxu3 }
 0x401   :  { %v1463_v28 = vadd.f32 %v1462_v20, %v1443_v19  ;;  %v1530_v46 = vadd.f32 %v1524_v38, %v1520_v32  ;;  %v1534_v20 = vmax.f32 %v1526_v59, 0.0  ;;  %v6870_v32 = vld [vmem:[#allocation7 + $0x174] sm:$0xf]  ;;  %v5356_v59 = vld [vmem:[#allocation7 + $0x158] sm:$0xf0] }
 0x402   :  { %v1483_v14 = vpop.f32.mrf.mxu1  ;;  %v1502_v30 = vpop.f32.mrf.mxu2  ;;  %v5375_v45 = vor.u32 %v6870_v32, %v5372_v34  ;;  %v7187_v32 = vld [vmem:[%s8255_s1 + $0x8] sm:$0xff] }
 0x403   :  { %v1503_v2 = vadd.f32 %v1502_v30, %v1483_v14  ;;  %v1509_v26 = vadd.f32 %v1463_v28, %v7774_v16  ;;  %v1528_v16 = vadd.f32 %v1524_v38, %v1518_v35  ;;  %v1538_v1 = vmax.f32 %v1530_v46, 0.0  ;;  %v6886_v35 = vld [vmem:[#allocation7 + $0x1f4] sm:$0xf]  ;;  %v6881_v46 = vld [vmem:[#allocation7 + $0x1c4] sm:$0xf0] }
 0x404   :  { %v1535_v28 = vmax.f32 %v1527_v21, 0.0  ;;  %v1533_v14 = vmax.f32 %v1525_v22, 0.0  ;;  %v5439_v43 = vor.u32 %v6886_v35, %v5436_v37  ;;  %v6880_v21 = vld [vmem:[#allocation7 + $0x1c4] sm:$0xf]  ;;  %v5412_v22 = vld [vmem:[#allocation7 + $0x1c8] sm:$0xf0] }
 0x405   :  { %v1512_v36 = vadd.f32 %v1503_v2, %v1192_v31  ;;  %v1519_v50 = vmul.f32 %v1513_v54, %v1509_v26  ;;  %v1536_v5 = vmax.f32 %v1528_v16, 0.0  ;;  %v5418_v31 = vld [vmem:[#allocation7 + $0x1d0] sm:$0xf]  ;;  %v7184_v2 = vld [vmem:[%s8255_s1 + $0x10] sm:$0xff]  ;;  %v5362_v26 = vld [vmem:[#allocation7 + $0x160] sm:$0xf]  ;;  %v5415_v29 = vor.u32 %v6880_v21, %v5412_v22 }
 0x406   :  { %v5330_v37 = vld [vmem:[#allocation7 + $0x120] sm:$0xf]  ;;  %v6835_v21 = vld [vmem:[#allocation7 + $0x54] sm:$0xf0] }
 0x407   :  { %v1522_v49 = vmul.f32 %v1514_v13, %v1512_v36  ;;  %v1529_v12 = vadd.f32 %v1523_v57, %v1519_v50  ;;  %v7799_v19 = vpack.c.bf16 %v1536_v5, %v1534_v20  ;;  %v6885_v13 = vld [vmem:[#allocation7 + $0x1e4] sm:$0xf0]  ;;  %v5354_v50 = vld [vmem:[#allocation7 + $0x150] sm:$0xf]  ;;  %v5346_v5 = vld [vmem:[#allocation7 + $0x140] sm:$0xf] }
 0x408   :  { %v1445_v40 = vpop.f32.mrf.mxu3  ;;  %v5427_v30 = vor.u32 %v6885_v13, %v5426_v41  ;;  %v6869_v36 = vld [vmem:[#allocation7 + $0x164] sm:$0xf0]  ;;  %v5348_v20 = vld [vmem:[#allocation7 + $0x148] sm:$0xf0]  ;;  %v5338_v13 = vld [vmem:[#allocation7 + $0x130] sm:$0xf] }
 0x409   :  { %v1532_v51 = vadd.f32 %v1524_v38, %v1522_v49  ;;  %v1465_v52 = vadd.f32 %v1464_v42, %v1445_v40  ;;  %v1537_v25 = vmax.f32 %v1529_v12, 0.0  ;;  %v7815_v38 = vpack.c.bf16 %v1535_v28, %v1533_v14  ;;  %v6868_v49 = vld [vmem:[#allocation7 + $0x164] sm:$0xf]  ;;  %v5428_v40 = vld [vmem:[#allocation7 + $0x1e8] sm:$0xf0] }
 0x40a   :  { %v6884_v42 = vld [vmem:[#allocation7 + $0x1e4] sm:$0xf]  ;;  %v5359_v12 = vor.u32 %v6866_v56, %v5356_v59  ;;  %v5351_v41 = vor.u32 %v6864_v17, %v5348_v20  ;;  %v6863_v28 = vld [vmem:[#allocation7 + $0x134] sm:$0xf0]  ;;  %v6857_v56 = vld [vmem:[#allocation7 + $0x104] sm:$0xf0] }
 0x40b   :  { %v1540_v6 = vmax.f32 %v1532_v51, 0.0  ;;  %v1511_v8 = vadd.f32 %v1465_v52, %v1154_v48  ;;  %v5363_v48 = vor.u32 %v6869_v36, %v5362_v26  ;;  %v6867_v51 = vld [vmem:[#allocation7 + $0x154] sm:$0xf0]  ;;  %v5367_v52 = vor.u32 %v6868_v49, %v5364_v3  ;;  %v6861_v26 = vld [vmem:[#allocation7 + $0x124] sm:$0xf0] }
 0x40c   :  { %v5431_v16 = vor.u32 %v6884_v42, %v5428_v40  ;;  %v5339_v34 = vor.u32 %v6863_v28, %v5338_v13  ;;  %v6855_v49 = vld [vmem:[#allocation7 + $0xf4] sm:$0xf0]  ;;  %v6849_v17 = vld [vmem:[#allocation7 + $0xc4] sm:$0xf0]  ;;  %v5482_v20 = vld [vmem:[#allocation7 + $0x50] sm:$0xf] }
 0x40d   :  { %v1521_v55 = vmul.f32 %v1513_v54, %v1511_v8  ;;  %v7795_v15 = vpack.c.bf16 %v1540_v6, %v1538_v1  ;;  %v5419_v54 = vor.u32 %v6883_v4, %v5418_v31  ;;  %v5420_v1 = vld [vmem:[#allocation7 + $0x1d8] sm:$0xf0]  ;;  %v5355_v6 = vor.u32 %v6867_v51, %v5354_v50  ;;  %v5402_v8 = vld [vmem:[#allocation7 + $0x1b0] sm:$0xf]  ;;  %v7186_v4 = vld [vmem:[%s8255_s1 + $0x18] sm:$0xff] }
 0x40e   :  { %v5340_v31 = vld [vmem:[#allocation7 + $0x138] sm:$0xf0]  ;;  %v6859_v3 = vld [vmem:[#allocation7 + $0x114] sm:$0xf0]  ;;  %v5554_v51 = vld [vmem:[#allocation7 + $0xe0] sm:$0xf] }
 0x40f   :  { %v1531_v18 = vadd.f32 %v1523_v57, %v1521_v55  ;;  %1570 = vmatpush.bf16.msrb.mxu0 %v7795_v15  ;;  %1644 = vmatpush.bf16.msrb.mxu2 %v7795_v15  ;;  %v5411_v57 = vor.u32 %v6881_v46, %v5410_v39  ;;  %v5423_v55 = vor.u32 %v6882_v61, %v5420_v1  ;;  %v5562_v46 = vld [vmem:[#allocation7 + $0xf0] sm:$0xf]  ;;  %v6839_v59 = vld [vmem:[#allocation7 + $0x74] sm:$0xf0]  ;;  %v6833_v13 = vld [vmem:[#allocation7 + $0x44] sm:$0xf0] }
 0x410   :  { %v5343_v35 = vor.u32 %v6862_v60, %v5340_v31  ;;  %v5331_v39 = vor.u32 %v6861_v26, %v5330_v37  ;;  %v5563_v40 = vor.u32 %v6855_v49, %v5562_v46  ;;  %v5466_v60 = vld [vmem:[#allocation7 + $0x30] sm:$0xf]  ;;  %v6860_v31 = vld [vmem:[#allocation7 + $0x124] sm:$0xf]  ;;  %v5522_v37 = vld [vmem:[#allocation7 + $0xa0] sm:$0xf] }
 0x411   :  { %v1539_v7 = vmax.f32 %v1531_v18, 0.0  ;;  %v5403_v18 = vor.u32 %v6879_v10, %v5402_v8  ;;  %v6851_v8 = vld [vmem:[#allocation7 + $0xd4] sm:$0xf0]  ;;  %v6874_v46 = vld [vmem:[#allocation7 + $0x194] sm:$0xf] }
 0x412   :  { %v5388_v49 = vld [vmem:[#allocation7 + $0x198] sm:$0xf0] }
 0x413   :  { %1571 = vmatpush.bf16.msrb.mxu0 %v7799_v19  ;;  %1645 = vmatpush.bf16.msrb.mxu2 %v7799_v19  ;;  %v7803_v27 = vpack.c.bf16 %v1539_v7, %v1537_v25  ;;  %v6877_v25 = vld [vmem:[#allocation7 + $0x1a4] sm:$0xf0]  ;;  %v5347_v7 = vor.u32 %v6865_v58, %v5346_v5  ;;  %v5538_v58 = vld [vmem:[#allocation7 + $0xc0] sm:$0xf] }
 0x414   :  { %v5539_v22 = vor.u32 %v6849_v17, %v5538_v58  ;;  %v6838_v58 = vld [vmem:[#allocation7 + $0x74] sm:$0xf]  ;;  %v5500_v17 = vld [vmem:[#allocation7 + $0x78] sm:$0xf0] }
 0x415   :  { %1551 = vmatpush.bf16.msra.mxu3 %v7803_v27  ;;  %1625 = vmatpush.bf16.msra.mxu1 %v7803_v27 }
 0x416   :  { %5310 = vmatmul.msk.bf16.vlgmr.msrb.gmra.mxu2 %vm178_vm0, %v7184_v2  ;;  %5306 = vmatmul.msk.bf16.vlgmr.msrb.gmra.mxu0 %vm178_vm0, %v7185_v9 }
 0x417   :  { %1873 = vmatpush.bf16.msra.mxu0 %v5435_v24  ;;  %1911 = vmatpush.bf16.msra.mxu2 %v5439_v43  ;;  %v5394_v24 = vld [vmem:[#allocation7 + $0x1a0] sm:$0xf] }
 0x418   :  { %v5395_v14 = vor.u32 %v6877_v25, %v5394_v24  ;;  %v5378_v43 = vld [vmem:[#allocation7 + $0x180] sm:$0xf]  ;;  %v5530_v24 = vld [vmem:[#allocation7 + $0xb0] sm:$0xf]  ;;  %v6847_v25 = vld [vmem:[#allocation7 + $0xb4] sm:$0xf0] }
 0x419   :  { %1552 = vmatpush.bf16.msra.mxu3 %v7815_v38  ;;  %1626 = vmatpush.bf16.msra.mxu1 %v7815_v38  ;;  %v5531_v28 = vor.u32 %v6847_v25, %v5530_v24  ;;  %v6836_v24 = vld [vmem:[#allocation7 + $0x64] sm:$0xf]  ;;  %v5492_v25 = vld [vmem:[#allocation7 + $0x68] sm:$0xf0] }
 0x41b   :  { %1874 = vmatpush.bf16.msra.mxu0 %v5427_v30  ;;  %1912 = vmatpush.bf16.msra.mxu2 %v5431_v16  ;;  %v5386_v30 = vld [vmem:[#allocation7 + $0x190] sm:$0xf]  ;;  %v5314_v16 = vld [vmem:[#allocation7 + $0x100] sm:$0xf] }
 0x41c   :  { %5308 = vmatmul.msk.bf16.vlgmr.msra.gmra.mxu1 %vm178_vm0, %v7184_v2  ;;  %5304 = vmatmul.msk.bf16.vlgmr.msra.gmra.mxu3 %vm178_vm0, %v7185_v9  ;;  %v6875_v2 = vld [vmem:[#allocation7 + $0x194] sm:$0xf0]  ;;  %v6878_v9 = vld [vmem:[#allocation7 + $0x1b4] sm:$0xf]  ;;  %v5315_v1 = vor.u32 %v6857_v56, %v5314_v16  ;;  %v6856_v16 = vld [vmem:[#allocation7 + $0x104] sm:$0xf] }
 0x41d   :  { %1854 = vmatpush.bf16.msrb.mxu3 %v5371_v33  ;;  %1892 = vmatpush.bf16.msrb.mxu1 %v5375_v45  ;;  %v5404_v33 = vld [vmem:[#allocation7 + $0x1b8] sm:$0xf0]  ;;  %v5387_v36 = vor.u32 %v6875_v2, %v5386_v30  ;;  %v5316_v56 = vld [vmem:[#allocation7 + $0x108] sm:$0xf0] }
 0x41e   :  { %v5407_v45 = vor.u32 %v6878_v9, %v5404_v33  ;;  %v5396_v9 = vld [vmem:[#allocation7 + $0x1a8] sm:$0xf0] }
 0x41f   :  { %1875 = vmatpush.bf16.msra.mxu0 %v5419_v54  ;;  %1913 = vmatpush.bf16.msra.mxu2 %v5423_v55  ;;  %v6873_v54 = vld [vmem:[#allocation7 + $0x184] sm:$0xf0] }
 0x420   :  { %v5379_v42 = vor.u32 %v6873_v54, %v5378_v43  ;;  %v6837_v55 = vld [vmem:[#allocation7 + $0x64] sm:$0xf0]  ;;  %v5324_v43 = vld [vmem:[#allocation7 + $0x118] sm:$0xf0] }
 0x421   :  { %1855 = vmatpush.bf16.msrb.mxu3 %v5363_v48  ;;  %1893 = vmatpush.bf16.msrb.mxu1 %v5367_v52  ;;  %v5322_v48 = vld [vmem:[#allocation7 + $0x110] sm:$0xf]  ;;  %v6853_v52 = vld [vmem:[#allocation7 + $0xe4] sm:$0xf0] }
 0x422   :  { %v5323_v50 = vor.u32 %v6859_v3, %v5322_v48  ;;  %v5555_v61 = vor.u32 %v6853_v52, %v5554_v51  ;;  %v5450_v48 = vld [vmem:[#allocation7 + $0x10] sm:$0xf]  ;;  %v5391_v3 = vor.u32 %v6874_v46, %v5388_v49  ;;  %v6844_v49 = vld [vmem:[#allocation7 + $0xa4] sm:$0xf] }
 0x423   :  { %1876 = vmatpush.bf16.msra.mxu0 %v5411_v57  ;;  %1914 = vmatpush.bf16.msra.mxu2 %v5415_v29  ;;  %v5498_v57 = vld [vmem:[#allocation7 + $0x70] sm:$0xf] }
 0x424   :  { %v5499_v10 = vor.u32 %v6839_v59, %v5498_v57  ;;  %v6872_v57 = vld [vmem:[#allocation7 + $0x184] sm:$0xf]  ;;  %v5319_v59 = vor.u32 %v6856_v16, %v5316_v56  ;;  %v6842_v16 = vld [vmem:[#allocation7 + $0x94] sm:$0xf]  ;;  %v5516_v56 = vld [vmem:[#allocation7 + $0x98] sm:$0xf0] }
 0x425   :  { %1856 = vmatpush.bf16.msrb.mxu3 %v5355_v6  ;;  %1894 = vmatpush.bf16.msrb.mxu1 %v5359_v12  ;;  %v5546_v6 = vld [vmem:[#allocation7 + $0xd0] sm:$0xf]  ;;  %v5490_v12 = vld [vmem:[#allocation7 + $0x60] sm:$0xf] }
 0x426   :  { %5311 = vmatmul.msk.bf16.gmra.mxu2 %vm178_vm0, %v7186_v4  ;;  %5307 = vmatmul.msk.bf16.gmra.mxu0 %vm178_vm0, %v7187_v32  ;;  %v5547_v5 = vor.u32 %v6851_v8, %v5546_v6  ;;  %v5442_v6 = vld [vmem:[#allocation7] sm:$0xf]  ;;  %v6825_v8 = vld [vmem:[#allocation7 + $0x4] sm:$0xf0] }
 0x427   :  { %1877 = vmatpush.bf16.msra.mxu0 %v5403_v18  ;;  %1915 = vmatpush.bf16.msra.mxu2 %v5407_v45  ;;  %v5491_v18 = vor.u32 %v6837_v55, %v5490_v12  ;;  %v6858_v45 = vld [vmem:[#allocation7 + $0x114] sm:$0xf]  ;;  %v5443_v12 = vor.u32 %v6825_v8, %v5442_v6  ;;  %v6841_v55 = vld [vmem:[#allocation7 + $0x84] sm:$0xf0]  ;;  %v6840_v8 = vld [vmem:[#allocation7 + $0x84] sm:$0xf] }
 0x429   :  { %1857 = vmatpush.bf16.msrb.mxu3 %v5347_v7  ;;  %1895 = vmatpush.bf16.msrb.mxu1 %v5351_v41  ;;  %v5483_v7 = vor.u32 %v6835_v21, %v5482_v20  ;;  %v5474_v41 = vld [vmem:[#allocation7 + $0x40] sm:$0xf]  ;;  %v5503_v20 = vor.u32 %v6838_v58, %v5500_v17  ;;  %v5564_v21 = vld [vmem:[#allocation7 + $0xf8] sm:$0xf0] }
 0x42a   :  { %v5475_v29 = vor.u32 %v6833_v13, %v5474_v41  ;;  %v5495_v41 = vor.u32 %v6836_v24, %v5492_v25  ;;  %v5556_v13 = vld [vmem:[#allocation7 + $0xe8] sm:$0xf0] }
 0x42b   :  { %1878 = vmatpush.bf16.msra.mxu0 %v5395_v14  ;;  %v6831_v14 = vld [vmem:[#allocation7 + $0x34] sm:$0xf0] }
 0x42c   :  { %5309 = vmatmul.msk.bf16.gmra.mxu1 %vm178_vm0, %v7186_v4  ;;  %5305 = vmatmul.msk.bf16.gmra.mxu3 %vm178_vm0, %v7187_v32  ;;  %v5467_v30 = vor.u32 %v6831_v14, %v5466_v60  ;;  %v5332_v4 = vld [vmem:[#allocation7 + $0x128] sm:$0xf0]  ;;  %v6876_v32 = vld [vmem:[#allocation7 + $0x1a4] sm:$0xf]  ;;  %v5484_v60 = vld [vmem:[#allocation7 + $0x58] sm:$0xf0] }
 0x42d   :  { %1858 = vmatpush.bf16.msrb.mxu3 %v5339_v34  ;;  %1896 = vmatpush.bf16.msrb.mxu1 %v5343_v35  ;;  %v5335_v2 = vor.u32 %v6860_v31, %v5332_v4  ;;  %v5399_v33 = vor.u32 %v6876_v32, %v5396_v9  ;;  %v5458_v34 = vld [vmem:[#allocation7 + $0x20] sm:$0xf]  ;;  %v6829_v35 = vld [vmem:[#allocation7 + $0x24] sm:$0xf0]  ;;  %v6850_v14 = vld [vmem:[#allocation7 + $0xd4] sm:$0xf] }
 0x42e   :  { %v5459_v26 = vor.u32 %v6829_v35, %v5458_v34  ;;  %v5548_v31 = vld [vmem:[#allocation7 + $0xd8] sm:$0xf0]  ;;  %v6832_v32 = vld [vmem:[#allocation7 + $0x44] sm:$0xf]  ;;  %v5540_v34 = vld [vmem:[#allocation7 + $0xc8] sm:$0xf0] }
 0x42f   :  { %1879 = vmatpush.bf16.msra.mxu0 %v5387_v36  ;;  %v6845_v36 = vld [vmem:[#allocation7 + $0xa4] sm:$0xf0]  ;;  %1916 = vmatpush.bf16.msra.mxu2 %v5399_v33  ;;  %v5551_v4 = vor.u32 %v6850_v14, %v5548_v31  ;;  %v6848_v9 = vld [vmem:[#allocation7 + $0xc4] sm:$0xf] }
 0x430   :  { %v5523_v54 = vor.u32 %v6845_v36, %v5522_v37  ;;  %v5543_v35 = vor.u32 %v6848_v9, %v5540_v34  ;;  %v6830_v37 = vld [vmem:[#allocation7 + $0x34] sm:$0xf]  ;;  %v7188_v31 = vld [vmem:[%s8255_s1 + $0x20] sm:$0xff] }
 0x431   :  { %1859 = vmatpush.bf16.msrb.mxu3 %v5331_v39  ;;  %1897 = vmatpush.bf16.msrb.mxu1 %v5335_v2  ;;  %v5327_v39 = vor.u32 %v6858_v45, %v5324_v43  ;;  %v5476_v2 = vld [vmem:[#allocation7 + $0x48] sm:$0xf0]  ;;  %v6846_v36 = vld [vmem:[#allocation7 + $0xb4] sm:$0xf]  ;;  %v5532_v43 = vld [vmem:[#allocation7 + $0xb8] sm:$0xf0] }
 0x432   :  { %v5479_v33 = vor.u32 %v6832_v32, %v5476_v2  ;;  %v5535_v46 = vor.u32 %v6846_v36, %v5532_v43  ;;  %v5694_v36 = vld [vmem:[#allocation7 + $0x2f0] sm:$0xf]  ;;  %v6918_v43 = vld [vmem:[#allocation7 + $0x2f4] sm:$0xf] }
 0x433   :  { %1880 = vmatpush.bf16.msra.mxu0 %v5379_v42  ;;  %v6827_v42 = vld [vmem:[#allocation7 + $0x14] sm:$0xf0]  ;;  %1917 = vmatpush.bf16.msra.mxu2 %v5391_v3 }
 0x434   :  { %v5451_v51 = vor.u32 %v6827_v42, %v5450_v48  ;;  %v5524_v48 = vld [vmem:[#allocation7 + $0xa8] sm:$0xf0] }
 0x435   :  { %1860 = vmatpush.bf16.msrb.mxu3 %v5323_v50  ;;  %v6843_v50 = vld [vmem:[#allocation7 + $0x94] sm:$0xf0]  ;;  %1898 = vmatpush.bf16.msrb.mxu1 %v5327_v39  ;;  %v5460_v39 = vld [vmem:[#allocation7 + $0x28] sm:$0xf0]  ;;  %v5527_v42 = vor.u32 %v6844_v49, %v5524_v48 }
 0x437   :  { %2109 = vmatpush.bf16.msrb.mxu0 %v5563_v40  ;;  %v5514_v40 = vld [vmem:[#allocation7 + $0x90] sm:$0xf] }
 0x438   :  { %v5515_v52 = vor.u32 %v6843_v50, %v5514_v40  ;;  %v6826_v40 = vld [vmem:[#allocation7 + $0x14] sm:$0xf]  ;;  %v5452_v50 = vld [vmem:[#allocation7 + $0x18] sm:$0xf0] }
 0x439   :  { %1861 = vmatpush.bf16.msrb.mxu3 %v5315_v1  ;;  %1899 = vmatpush.bf16.msrb.mxu1 %v5319_v59  ;;  %v5519_v59 = vor.u32 %v6842_v16, %v5516_v56 }
 0x43b   :  { %2110 = vmatpush.bf16.msrb.mxu0 %v5555_v61  ;;  %v5380_v61 = vld [vmem:[#allocation7 + $0x188] sm:$0xf0] }
 0x43c   :  { %v5383_v1 = vor.u32 %v6872_v57, %v5380_v61  ;;  %v5455_v57 = vor.u32 %v6826_v40, %v5452_v50  ;;  %v6824_v61 = vld [vmem:[#allocation7 + $0x4] sm:$0xf] }
 0x43d   :  { %2090 = vmatpush.bf16.msra.mxu3 %v5499_v10  ;;  %v5506_v10 = vld [vmem:[#allocation7 + $0x80] sm:$0xf]  ;;  %2128 = vmatpush.bf16.msra.mxu1 %v5503_v20  ;;  %v6916_v40 = vld [vmem:[#allocation7 + $0x2e4] sm:$0xf] }
 0x43e   :  { %1918 = vmatpush.bf16.msra.mxu2 %v5383_v1  ;;  %v5444_v1 = vld [vmem:[#allocation7 + $0x8] sm:$0xf0] }
 0x43f   :  { %2111 = vmatpush.bf16.msrb.mxu0 %v5547_v5  ;;  %v5507_v5 = vor.u32 %v6841_v55, %v5506_v10  ;;  %v5447_v6 = vor.u32 %v6824_v61, %v5444_v1  ;;  %v5508_v10 = vld [vmem:[#allocation7 + $0x88] sm:$0xf0]  ;;  %v6902_v61 = vld [vmem:[#allocation7 + $0x274] sm:$0xf] }
 0x440   :  { %v5511_v17 = vor.u32 %v6840_v8, %v5508_v10  ;;  %v5678_v8 = vld [vmem:[#allocation7 + $0x2d0] sm:$0xf]  ;;  %v6915_v10 = vld [vmem:[#allocation7 + $0x2d4] sm:$0xf0] }
 0x441   :  { %2091 = vmatpush.bf16.msra.mxu3 %v5491_v18  ;;  %v6854_v18 = vld [vmem:[#allocation7 + $0xf4] sm:$0xf]  ;;  %2129 = vmatpush.bf16.msra.mxu1 %v5495_v41 }
 0x443   :  { %2112 = vmatpush.bf16.msrb.mxu0 %v5539_v22  ;;  %v5567_v22 = vor.u32 %v6854_v18, %v5564_v21 }
 0x445   :  { %2092 = vmatpush.bf16.msra.mxu3 %v5483_v7  ;;  %2147 = vmatpush.bf16.msrb.mxu2 %v5567_v22  ;;  %v6852_v7 = vld [vmem:[#allocation7 + $0xe4] sm:$0xf] }
 0x447   :  { %2113 = vmatpush.bf16.msrb.mxu0 %v5531_v28  ;;  %v5559_v28 = vor.u32 %v6852_v7, %v5556_v13 }
 0x449   :  { %2093 = vmatpush.bf16.msra.mxu3 %v5475_v29  ;;  %v6834_v29 = vld [vmem:[#allocation7 + $0x54] sm:$0xf]  ;;  %2148 = vmatpush.bf16.msrb.mxu2 %v5559_v28 }
 0x44b   :  { %2114 = vmatpush.bf16.msrb.mxu0 %v5523_v54  ;;  %v6828_v54 = vld [vmem:[#allocation7 + $0x24] sm:$0xf] }
 0x44c   :  { %v5463_v3 = vor.u32 %v6828_v54, %v5460_v39  ;;  %v5696_v39 = vld [vmem:[#allocation7 + $0x2f8] sm:$0xf0] }
 0x44d   :  { %2094 = vmatpush.bf16.msra.mxu3 %v5467_v30  ;;  %v5487_v30 = vor.u32 %v6834_v29, %v5484_v60  ;;  %2149 = vmatpush.bf16.msrb.mxu2 %v5551_v4  ;;  %v7189_v4 = vld [vmem:[%s8255_s1 + $0x28] sm:$0xff] }
 0x44f   :  { %2115 = vmatpush.bf16.msrb.mxu0 %v5515_v52  ;;  %2130 = vmatpush.bf16.msra.mxu1 %v5487_v30 }
 0x451   :  { %2095 = vmatpush.bf16.msra.mxu3 %v5459_v26  ;;  %2150 = vmatpush.bf16.msrb.mxu2 %v5543_v35  ;;  %v5468_v26 = vld [vmem:[#allocation7 + $0x38] sm:$0xf0] }
 0x452   :  { %v5471_v45 = vor.u32 %v6830_v37, %v5468_v26 }
 0x453   :  { %2116 = vmatpush.bf16.msrb.mxu0 %v5507_v5  ;;  %2131 = vmatpush.bf16.msra.mxu1 %v5479_v33 }
 0x455   :  { %2096 = vmatpush.bf16.msra.mxu3 %v5451_v51  ;;  %2151 = vmatpush.bf16.msrb.mxu2 %v5535_v46  ;;  %v5699_v46 = vor.u32 %v6918_v43, %v5696_v39  ;;  %v5664_v39 = vld [vmem:[#allocation7 + $0x2b8] sm:$0xf0] }
 0x457   :  { %2132 = vmatpush.bf16.msra.mxu1 %v5471_v45  ;;  %v6919_v45 = vld [vmem:[#allocation7 + $0x2f4] sm:$0xf0] }
 0x458   :  { %v5695_v54 = vor.u32 %v6919_v45, %v5694_v36  ;;  %v6911_v36 = vld [vmem:[#allocation7 + $0x2b4] sm:$0xf0] }
 0x459   :  { %2097 = vmatpush.bf16.msra.mxu3 %v5443_v12  ;;  %2152 = vmatpush.bf16.msrb.mxu2 %v5527_v42  ;;  %v6917_v42 = vld [vmem:[#allocation7 + $0x2e4] sm:$0xf0] }
 0x45b   :  { %2133 = vmatpush.bf16.msra.mxu1 %v5463_v3  ;;  %v5686_v3 = vld [vmem:[#allocation7 + $0x2e0] sm:$0xf] }
 0x45d   :  { %2153 = vmatpush.bf16.msrb.mxu2 %v5519_v59  ;;  %v6903_v59 = vld [vmem:[#allocation7 + $0x274] sm:$0xf0] }
 0x45f   :  { %2134 = vmatpush.bf16.msra.mxu1 %v5455_v57  ;;  %v5630_v57 = vld [vmem:[#allocation7 + $0x270] sm:$0xf] }
 0x460   :  { %v5631_v1 = vor.u32 %v6903_v59, %v5630_v57  ;;  %v5654_v57 = vld [vmem:[#allocation7 + $0x2a0] sm:$0xf]  ;;  %v6909_v59 = vld [vmem:[#allocation7 + $0x2a4] sm:$0xf0] }
 0x461   :  { %2154 = vmatpush.bf16.msrb.mxu2 %v5511_v17 }
 0x463   :  { %2135 = vmatpush.bf16.msra.mxu1 %v5447_v6  ;;  %v5632_v6 = vld [vmem:[#allocation7 + $0x278] sm:$0xf0] }
 0x493   :  { %v1573_v22 = vpop.f32.mrf.mxu0 }
 0x499   :  { %v1628_v51 = vpop.f32.mrf.mxu1  ;;  %v1647_v52 = vpop.f32.mrf.mxu2 }
 0x49b   :  { %v1575_v13 = vpop.f32.mrf.mxu0 }
 0x49c   :  { %v1584_v28 = vpack.c.bf16 %v1575_v13, %v1573_v22  ;;  %v5670_v13 = vld [vmem:[#allocation7 + $0x2c0] sm:$0xf] }
 0x49f   :  { %v1554_v21 = vpop.f32.mrf.mxu3 }
 0x4a1   :  { %v1630_v12 = vpop.f32.mrf.mxu1  ;;  %v1649_v55 = vpop.f32.mrf.mxu2 }
 0x4a2   :  { %v1657_v5 = vpack.c.bf16 %v1630_v12, %v1628_v51  ;;  %v1658_v58 = vpack.c.bf16 %v1649_v55, %v1647_v52  ;;  %v5687_v51 = vor.u32 %v6917_v42, %v5686_v3  ;;  %v5688_v52 = vld [vmem:[#allocation7 + $0x2e8] sm:$0xf0]  ;;  %v5635_v12 = vor.u32 %v6902_v61, %v5632_v6  ;;  %v5606_v3 = vld [vmem:[#allocation7 + $0x240] sm:$0xf]  ;;  %v6897_v42 = vld [vmem:[#allocation7 + $0x244] sm:$0xf0] }
 0x4a3   :  { %v5691_v56 = vor.u32 %v6916_v40, %v5688_v52  ;;  %v5679_v55 = vor.u32 %v6915_v10, %v5678_v8  ;;  %v6896_v40 = vld [vmem:[#allocation7 + $0x244] sm:$0xf]  ;;  %v5608_v52 = vld [vmem:[#allocation7 + $0x248] sm:$0xf0]  ;;  %v5655_v6 = vor.u32 %v6909_v59, %v5654_v57  ;;  %v6889_v57 = vld [vmem:[#allocation7 + $0x204] sm:$0xf0] }
 0x4a4   :  { %1862 = vmatmul.bf16.vlgmr.msrb.gmra.mxu3 %v1657_v5  ;;  %1881 = vmatmul.bf16.vlgmr.msra.gmra.mxu0 %v1658_v58  ;;  %v6908_v61 = vld [vmem:[#allocation7 + $0x2a4] sm:$0xf]  ;;  %v5656_v8 = vld [vmem:[#allocation7 + $0x2a8] sm:$0xf0] }
 0x4a5   :  { %1900 = vmatmul.bf16.vlgmr.msrb.gmra.mxu1 %v1657_v5  ;;  %1919 = vmatmul.bf16.vlgmr.msra.gmra.mxu2 %v1658_v58  ;;  %v6914_v5 = vld [vmem:[#allocation7 + $0x2d4] sm:$0xf]  ;;  %v5680_v58 = vld [vmem:[#allocation7 + $0x2d8] sm:$0xf0]  ;;  %v6888_v59 = vld [vmem:[#allocation7 + $0x204] sm:$0xf] }
 0x4a6   :  { %2172 = vmatpush.bf16.msrb.mxu3 %v7803_v27  ;;  %2191 = vmatpush.bf16.msra.mxu0 %v7795_v15  ;;  %v5683_v17 = vor.u32 %v6914_v5, %v5680_v58  ;;  %v6895_v5 = vld [vmem:[#allocation7 + $0x234] sm:$0xf0]  ;;  %v6894_v58 = vld [vmem:[#allocation7 + $0x234] sm:$0xf] }
 0x4a7   :  { %v1556_v27 = vpop.f32.mrf.mxu3  ;;  %2420 = vmatpush.bf16.msra.mxu2 %v5695_v54  ;;  %2401 = vmatpush.bf16.msrb.mxu1 %v5631_v1  ;;  %v6910_v54 = vld [vmem:[#allocation7 + $0x2b4] sm:$0xf] }
 0x4a8   :  { %v1583_v15 = vpack.c.bf16 %v1556_v27, %v1554_v21  ;;  %v6900_v21 = vld [vmem:[#allocation7 + $0x264] sm:$0xf] }
 0x4a9   :  { %v1633_v18 = vpop.f32.mrf.mxu1  ;;  %v1652_v20 = vpop.f32.mrf.mxu2 }
 0x4aa   :  { %2173 = vmatpush.bf16.msrb.mxu3 %v7815_v38  ;;  %2192 = vmatpush.bf16.msra.mxu0 %v7799_v19  ;;  %v1578_v38 = vpop.f32.mrf.mxu0 }
 0x4ab   :  { %2421 = vmatpush.bf16.msra.mxu2 %v5687_v51  ;;  %v5607_v51 = vor.u32 %v6897_v42, %v5606_v3  ;;  %v5582_v3 = vld [vmem:[#allocation7 + $0x210] sm:$0xf]  ;;  %v6891_v42 = vld [vmem:[#allocation7 + $0x214] sm:$0xf0] }
 0x4af   :  { %v1559_v29 = vpop.f32.mrf.mxu3  ;;  %2422 = vmatpush.bf16.msra.mxu2 %v5679_v55  ;;  %v5598_v55 = vld [vmem:[#allocation7 + $0x230] sm:$0xf] }
 0x4b1   :  { %v1635_v24 = vpop.f32.mrf.mxu1  ;;  %v1654_v25 = vpop.f32.mrf.mxu2 }
 0x4b2   :  { %v1659_v7 = vpack.c.bf16 %v1635_v24, %v1633_v18  ;;  %v1660_v41 = vpack.c.bf16 %v1654_v25, %v1652_v20  ;;  %v1580_v60 = vpop.f32.mrf.mxu0  ;;  %v5622_v18 = vld [vmem:[#allocation7 + $0x260] sm:$0xf]  ;;  %v6901_v20 = vld [vmem:[#allocation7 + $0x264] sm:$0xf0]  ;;  %v5624_v25 = vld [vmem:[#allocation7 + $0x268] sm:$0xf0] }
 0x4b3   :  { %v1586_v30 = vpack.c.bf16 %v1580_v60, %v1578_v38  ;;  %v5623_v24 = vor.u32 %v6901_v20, %v5622_v18  ;;  %v5627_v27 = vor.u32 %v6900_v21, %v5624_v25  ;;  %v5672_v60 = vld [vmem:[#allocation7 + $0x2c8] sm:$0xf0]  ;;  %v5599_v18 = vor.u32 %v6895_v5, %v5598_v55  ;;  %v5600_v20 = vld [vmem:[#allocation7 + $0x238] sm:$0xf0]  ;;  %v5646_v21 = vld [vmem:[#allocation7 + $0x290] sm:$0xf] }
 0x4b4   :  { %1867 = vmatmul.bf16.gmra.mxu3 %v1659_v7  ;;  %1886 = vmatmul.bf16.gmra.mxu0 %v1660_v41 }
 0x4b5   :  { %1905 = vmatmul.bf16.gmra.mxu1 %v1659_v7  ;;  %1924 = vmatmul.bf16.gmra.mxu2 %v1660_v41 }
 0x4b6   :  { %2402 = vmatpush.bf16.msrb.mxu1 %v5623_v24  ;;  %v5603_v24 = vor.u32 %v6894_v58, %v5600_v20 }
 0x4b7   :  { %v1561_v19 = vpop.f32.mrf.mxu3 }
 0x4b8   :  { %v1585_v14 = vpack.c.bf16 %v1561_v19, %v1559_v29 }
 0x4c4   :  { %2098 = vmatmul.bf16.vlgmr.msra.gmra.mxu3 %v1583_v15  ;;  %2117 = vmatmul.bf16.vlgmr.msrb.gmra.mxu0 %v1584_v28 }
 0x4c5   :  { %2136 = vmatmul.bf16.vlgmr.msra.gmra.mxu1 %v1583_v15  ;;  %2155 = vmatmul.bf16.vlgmr.msrb.gmra.mxu2 %v1584_v28  ;;  %v6913_v15 = vld [vmem:[#allocation7 + $0x2c4] sm:$0xf0]  ;;  %v6912_v28 = vld [vmem:[#allocation7 + $0x2c4] sm:$0xf] }
 0x4c6   :  { %2458 = vmatpush.bf16.msrb.mxu0 %v5699_v46  ;;  %2439 = vmatpush.bf16.msra.mxu3 %v5635_v12  ;;  %v5671_v19 = vor.u32 %v6913_v15, %v5670_v13  ;;  %v5667_v46 = vor.u32 %v6910_v54, %v5664_v39  ;;  %v5659_v12 = vor.u32 %v6908_v61, %v5656_v8  ;;  %v5590_v15 = vld [vmem:[#allocation7 + $0x220] sm:$0xf]  ;;  %v5640_v54 = vld [vmem:[#allocation7 + $0x288] sm:$0xf0] }
 0x4c7   :  { %v5576_v8 = vld [vmem:[#allocation7 + $0x208] sm:$0xf0] }
 0x4c8   :  { %2423 = vmatpush.bf16.msra.mxu2 %v5671_v19  ;;  %v6892_v19 = vld [vmem:[#allocation7 + $0x224] sm:$0xf] }
 0x4ca   :  { %2459 = vmatpush.bf16.msrb.mxu0 %v5691_v56  ;;  %2440 = vmatpush.bf16.msra.mxu3 %v5627_v27  ;;  %v5611_v56 = vor.u32 %v6896_v40, %v5608_v52  ;;  %v5648_v27 = vld [vmem:[#allocation7 + $0x298] sm:$0xf0]  ;;  %v5583_v40 = vor.u32 %v6891_v42, %v5582_v3 }
 0x4ce   :  { %2460 = vmatpush.bf16.msrb.mxu0 %v5683_v17 }
 0x4d4   :  { %2103 = vmatmul.bf16.gmra.mxu3 %v1585_v14  ;;  %2122 = vmatmul.bf16.gmra.mxu0 %v1586_v30 }
 0x4d5   :  { %2141 = vmatmul.bf16.gmra.mxu1 %v1585_v14  ;;  %2160 = vmatmul.bf16.gmra.mxu2 %v1586_v30  ;;  %v5675_v30 = vor.u32 %v6912_v28, %v5672_v60  ;;  %v6893_v28 = vld [vmem:[#allocation7 + $0x224] sm:$0xf0] }
 0x4d7   :  { %2461 = vmatpush.bf16.msrb.mxu0 %v5675_v30  ;;  %v5591_v30 = vor.u32 %v6893_v28, %v5590_v15 }
 0x4db   :  { %2462 = vmatpush.bf16.msrb.mxu0 %v5667_v46 }
 0x4df   :  { %2463 = vmatpush.bf16.msrb.mxu0 %v5659_v12 }
 0x4e4   :  { %5568 = vmatmul.msk.bf16.vlgmr.msrb.gmra.mxu3 %vm178_vm0, %v7188_v31  ;;  %5570 = vmatmul.msk.bf16.vlgmr.msra.gmra.mxu0 %vm178_vm0, %v7188_v31  ;;  %v5614_v31 = vld [vmem:[#allocation7 + $0x250] sm:$0xf] }
 0x4f4   :  { %5569 = vmatmul.msk.bf16.gmra.mxu3 %vm178_vm0, %v7189_v4  ;;  %5571 = vmatmul.msk.bf16.gmra.mxu0 %vm178_vm0, %v7189_v4  ;;  %v6899_v4 = vld [vmem:[#allocation7 + $0x254] sm:$0xf0] }
 0x521   :  { %v1882_v32 = vpop.f32.mrf.mxu0 }
 0x522   :  { %v1901_v2 = vpop.f32.mrf.mxu1 }
 0x527   :  { %v1863_v9 = vpop.f32.mrf.mxu3 }
 0x528   :  { %v7845_v33 = vadd.f32 %v1882_v32, %v1863_v9  ;;  %v1920_v34 = vpop.f32.mrf.mxu2  ;;  %v6898_v32 = vld [vmem:[#allocation7 + $0x254] sm:$0xf]  ;;  %v5616_v9 = vld [vmem:[#allocation7 + $0x258] sm:$0xf0] }
 0x529   :  { %v7847_v35 = vadd.f32 %v1920_v34, %v1901_v2  ;;  %v7849_v37 = vpop.f32.mrf.mxu0  ;;  %v5615_v2 = vor.u32 %v6899_v4, %v5614_v31  ;;  %v5662_v34 = vld [vmem:[#allocation7 + $0x2b0] sm:$0xf]  ;;  %v5619_v45 = vor.u32 %v6898_v32, %v5616_v9  ;;  %v6905_v9 = vld [vmem:[#allocation7 + $0x284] sm:$0xf0] }
 0x52a   :  { %v7851_v26 = vpop.f32.mrf.mxu1  ;;  %v5663_v43 = vor.u32 %v6911_v36, %v5662_v34  ;;  %v6904_v34 = vld [vmem:[#allocation7 + $0x284] sm:$0xf] }
 0x52b   :  { %2403 = vmatpush.bf16.msrb.mxu1 %v5615_v2  ;;  %2441 = vmatpush.bf16.msra.mxu3 %v5619_v45  ;;  %v5638_v2 = vld [vmem:[#allocation7 + $0x280] sm:$0xf]  ;;  %v5643_v46 = vor.u32 %v6904_v34, %v5640_v54 }
 0x52c   :  { %2424 = vmatpush.bf16.msra.mxu2 %v5663_v43  ;;  %v5639_v43 = vor.u32 %v6905_v9, %v5638_v2 }
 0x52f   :  { %v7853_v49 = vpop.f32.mrf.mxu3  ;;  %2404 = vmatpush.bf16.msrb.mxu1 %v5607_v51  ;;  %2442 = vmatpush.bf16.msra.mxu3 %v5611_v56  ;;  %v5584_v51 = vld [vmem:[#allocation7 + $0x218] sm:$0xf0]  ;;  %v5574_v56 = vld [vmem:[#allocation7 + $0x200] sm:$0xf] }
 0x530   :  { %v7855_v48 = vpop.f32.mrf.mxu2  ;;  %2425 = vmatpush.bf16.msra.mxu2 %v5655_v6  ;;  %v5575_v6 = vor.u32 %v6889_v57, %v5574_v56  ;;  %v1885_v3 = vadd.f32 %v7849_v37, %v7853_v49 }
 0x531   :  { %v1887_v50 = vpop.f32.mrf.mxu0 }
 0x532   :  { %v1906_v16 = vpop.f32.mrf.mxu1 }
 0x533   :  { %2405 = vmatpush.bf16.msrb.mxu1 %v5599_v18  ;;  %2443 = vmatpush.bf16.msra.mxu3 %v5603_v24 }
 0x537   :  { %v1868_v22 = vpop.f32.mrf.mxu3  ;;  %2406 = vmatpush.bf16.msrb.mxu1 %v5591_v30 }
 0x538   :  { %v7857_v7 = vadd.f32 %v1887_v50, %v1868_v22  ;;  %v1925_v41 = vpop.f32.mrf.mxu2  ;;  %v6907_v22 = vld [vmem:[#allocation7 + $0x294] sm:$0xf0] }
 0x539   :  { %v7859_v29 = vadd.f32 %v1925_v41, %v1906_v16  ;;  %v7861_v38 = vpop.f32.mrf.mxu0  ;;  %v5647_v25 = vor.u32 %v6907_v22, %v5646_v21  ;;  %v6906_v41 = vld [vmem:[#allocation7 + $0x294] sm:$0xf] }
 0x53a   :  { %v7863_v14 = vpop.f32.mrf.mxu1  ;;  %v5651_v13 = vor.u32 %v6906_v41, %v5648_v27 }
 0x53b   :  { %2426 = vmatpush.bf16.msra.mxu2 %v5647_v25  ;;  %2407 = vmatpush.bf16.msrb.mxu1 %v5583_v40 }
 0x53c   :  { %2464 = vmatpush.bf16.msrb.mxu0 %v5651_v13 }
 0x53f   :  { %v7865_v50 = vpop.f32.mrf.mxu3  ;;  %2427 = vmatpush.bf16.msra.mxu2 %v5639_v43  ;;  %2408 = vmatpush.bf16.msrb.mxu1 %v5575_v6 }
 0x540   :  { %v7867_v16 = vpop.f32.mrf.mxu2  ;;  %2465 = vmatpush.bf16.msrb.mxu0 %v5643_v46  ;;  %v1890_v6 = vadd.f32 %v7861_v38, %v7865_v50 }
 0x541   :  { %v2118_v1 = vpop.f32.mrf.mxu0 }
 0x542   :  { %v2137_v10 = vpop.f32.mrf.mxu1 }
 0x543   :  { %v2138_v17 = vadd.f32 %v2137_v10, %v7847_v35  ;;  %v5592_v35 = vld [vmem:[#allocation7 + $0x228] sm:$0xf0] }
 0x544   :  { %v5595_v32 = vor.u32 %v6892_v19, %v5592_v35 }
 0x546   :  { %2444 = vmatpush.bf16.msra.mxu3 %v5595_v32 }
 0x547   :  { %v2099_v60 = vpop.f32.mrf.mxu3 }
 0x548   :  { %v2100_v31 = vadd.f32 %v2099_v60, %v7845_v33  ;;  %v2156_v4 = vpop.f32.mrf.mxu2  ;;  %v6890_v33 = vld [vmem:[#allocation7 + $0x214] sm:$0xf] }
 0x549   :  { %v7871_v36 = vadd.f32 %v2156_v4, %v2138_v17  ;;  %v7873_v45 = vpop.f32.mrf.mxu0  ;;  %v5587_v52 = vor.u32 %v6890_v33, %v5584_v51 }
 0x54a   :  { %v7875_v39 = vadd.f32 %v2118_v1, %v2100_v31  ;;  %v5579_v1 = vor.u32 %v6888_v59, %v5576_v8  ;;  %v2139_v19 = vpop.f32.mrf.mxu1 }
 0x54b   :  { %2445 = vmatpush.bf16.msra.mxu3 %v5587_v52 }
 0x54f   :  { %v2101_v61 = vpop.f32.mrf.mxu3  ;;  %2446 = vmatpush.bf16.msra.mxu3 %v5579_v1  ;;  %v1923_v1 = vadd.f32 %v7855_v48, %v7851_v26 }
 0x550   :  { %v2158_v60 = vpop.f32.mrf.mxu2  ;;  %v2102_v42 = vadd.f32 %v2101_v61, %v1885_v3 }
 0x551   :  { %v2123_v10 = vpop.f32.mrf.mxu0  ;;  %v2140_v61 = vadd.f32 %v2139_v19, %v1923_v1 }
 0x552   :  { %v2142_v30 = vpop.f32.mrf.mxu1  ;;  %v2121_v57 = vadd.f32 %v7873_v45, %v2102_v42  ;;  %v6967_v42 = vld [vmem:[#allocation8 + $0x164] sm:$0xf0] }
 0x553   :  { %v2143_v37 = vadd.f32 %v2142_v30, %v7859_v29  ;;  %v7190_v29 = vld [vmem:[%s8266_s12] sm:$0x1f] }
 0x557   :  { %v2104_v12 = vpop.f32.mrf.mxu3 }
 0x558   :  { %v2105_v55 = vadd.f32 %v2104_v12, %v7857_v7  ;;  %v2161_v35 = vpop.f32.mrf.mxu2 }
 0x559   :  { %v7878_v5 = vpop.f32.mrf.mxu0 }
 0x55a   :  { %v2124_v58 = vadd.f32 %v2123_v10, %v2105_v55  ;;  %v2144_v31 = vpop.f32.mrf.mxu1 }
 0x55f   :  { %v2106_v17 = vpop.f32.mrf.mxu3 }
 0x560   :  { %v2163_v4 = vpop.f32.mrf.mxu2  ;;  %v2107_v49 = vadd.f32 %v2106_v17, %v1890_v6  ;;  %v2493_v17 = vperm.slane %v7190_v29, 2  ;;  %v6966_v29 = vld [vmem:[#allocation8 + $0x164] sm:$0xf] }
 0x561   :  { %v2194_v18 = vpop.f32.mrf.mxu0 }
 0x562   :  { %v2126_v48 = vadd.f32 %v7878_v5, %v2107_v49  ;;  %v7191_v5 = vld [vmem:[%s8266_s12 + $0x8] sm:$0x1f] }
 0x563   :  { %v2494_v19 = vperm.slane %v7191_v5, 2  ;;  %v6961_v5 = vld [vmem:[#allocation8 + $0x134] sm:$0xf0] }
 0x567   :  { %v2175_v20 = vpop.f32.mrf.mxu3 }
 0x569   :  { %v2196_v21 = vpop.f32.mrf.mxu0 }
 0x56a   :  { %v2205_v22 = vpack.c.bf16 %v2196_v21, %v2194_v18  ;;  %v2162_v21 = vadd.f32 %v2161_v35, %v2143_v37 }
 0x56c   :  { %2428 = vmatmul.bf16.vlgmr.msra.gmra.mxu2 %v2205_v22  ;;  %2466 = vmatmul.bf16.vlgmr.msrb.gmra.mxu0 %v2205_v22 }
 0x56f   :  { %v2177_v24 = vpop.f32.mrf.mxu3 }
 0x570   :  { %v2204_v25 = vpack.c.bf16 %v2177_v24, %v2175_v20  ;;  %v2159_v24 = vadd.f32 %v2158_v60, %v2140_v61  ;;  %v7902_v60 = vld [vmem:[#allocation11] sm:$0x1f] }
 0x571   :  { %v2199_v41 = vpop.f32.mrf.mxu0  ;;  %v2503_v30 = vperm.slane %v7902_v60, 2 }
 0x572   :  { %2409 = vmatmul.bf16.vlgmr.msrb.gmra.mxu1 %v2204_v25  ;;  %2447 = vmatmul.bf16.vlgmr.msra.gmra.mxu3 %v2204_v25 }
 0x577   :  { %v2180_v27 = vpop.f32.mrf.mxu3 }
 0x579   :  { %v2201_v13 = vpop.f32.mrf.mxu0 }
 0x57a   :  { %v2207_v15 = vpack.c.bf16 %v2201_v13, %v2199_v41  ;;  %v1928_v41 = vadd.f32 %v7867_v16, %v7863_v14 }
 0x57c   :  { %2433 = vmatmul.bf16.gmra.mxu2 %v2207_v15  ;;  %2471 = vmatmul.bf16.gmra.mxu0 %v2207_v15 }
 0x57f   :  { %v2182_v7 = vpop.f32.mrf.mxu3 }
 0x580   :  { %v2206_v28 = vpack.c.bf16 %v2182_v7, %v2180_v27 }
 0x582   :  { %2414 = vmatmul.bf16.gmra.mxu1 %v2206_v28  ;;  %2452 = vmatmul.bf16.gmra.mxu3 %v2206_v28 }
 0x5e9   :  { %v2467_v32 = vpop.f32.mrf.mxu0 }
 0x5ef   :  { %v2410_v2 = vpop.f32.mrf.mxu1  ;;  %v2429_v9 = vpop.f32.mrf.mxu2 }
 0x5f0   :  { %v2430_v59 = vadd.f32 %v2429_v9, %v2410_v2  ;;  %v5772_v2 = vld [vmem:[#allocation8 + $0x170] sm:$0xf]  ;;  %v6969_v9 = vld [vmem:[#allocation8 + $0x174] sm:$0xf0] }
 0x5f1   :  { %v2469_v46 = vpop.f32.mrf.mxu0  ;;  %v5773_v3 = vor.u32 %v6969_v9, %v5772_v2  ;;  %v6982_v9 = vld [vmem:[#allocation8 + $0x1e4] sm:$0xf] }
 0x5f2   :  { %v2477_v55 = vadd.f32 %v2430_v59, %v7875_v39  ;;  %v6965_v59 = vld [vmem:[#allocation8 + $0x154] sm:$0xf0] }
 0x5f3   :  { %2831 = vmatpush.bf16.msra.mxu0 %v5773_v3  ;;  %v6962_v3 = vld [vmem:[#allocation8 + $0x144] sm:$0xf] }
 0x5f5   :  { %v2448_v34 = vpop.f32.mrf.mxu3 }
 0x5f6   :  { %v2468_v38 = vadd.f32 %v2467_v32, %v2448_v34  ;;  %v5764_v34 = vld [vmem:[#allocation8 + $0x160] sm:$0xf] }
 0x5f7   :  { %v2412_v43 = vpop.f32.mrf.mxu1  ;;  %v2431_v54 = vpop.f32.mrf.mxu2 }
 0x5f8   :  { %v2432_v40 = vadd.f32 %v2431_v54, %v2412_v43  ;;  %v2478_v7 = vadd.f32 %v2468_v38, %v7871_v36 }
 0x5f9   :  { %v2472_v12 = vpop.f32.mrf.mxu0 }
 0x5fa   :  { %v2479_v10 = vadd.f32 %v2432_v40, %v2121_v57  ;;  %v5756_v57 = vld [vmem:[#allocation8 + $0x150] sm:$0xf] }
 0x5fc   :  { %v2487_v50 = vadd.f32 %v2479_v10, %v7693_v0  ;;  %v2145_v0 = vadd.f32 %v2144_v31, %v1928_v41 }
 0x5fd   :  { %v2450_v33 = vpop.f32.mrf.mxu3 }
 0x5fe   :  { %v2470_v18 = vadd.f32 %v2469_v46, %v2450_v33  ;;  %v2497_v28 = vmul.f32 %v2493_v17, %v2487_v50  ;;  %v2164_v16 = vadd.f32 %v2163_v4, %v2145_v0  ;;  %v2486_v33 = vadd.f32 %v2478_v7, %v7682_v53  ;;  %v6984_v0 = vld [vmem:[#allocation8 + $0x1f4] sm:$0xf]  ;;  %v5838_v7 = vld [vmem:[#allocation8 + $0x1f8] sm:$0xf0] }
 0x5ff   :  { %v2415_v51 = vpop.f32.mrf.mxu1  ;;  %v2434_v52 = vpop.f32.mrf.mxu2  ;;  %v5765_v4 = vor.u32 %v6967_v42, %v5764_v34  ;;  %v5830_v34 = vld [vmem:[#allocation8 + $0x1e8] sm:$0xf0] }
 0x600   :  { %v2435_v56 = vadd.f32 %v2434_v52, %v2415_v51  ;;  %v2480_v27 = vadd.f32 %v2470_v18, %v2159_v24  ;;  %v2507_v40 = vadd.f32 %v2503_v30, %v2497_v28  ;;  %v6968_v18 = vld [vmem:[#allocation8 + $0x174] sm:$0xf]  ;;  %v5748_v24 = vld [vmem:[#allocation8 + $0x140] sm:$0xf]  ;;  %v5740_v28 = vld [vmem:[#allocation8 + $0x130] sm:$0xf] }
 0x601   :  { %v2474_v32 = vpop.f32.mrf.mxu0  ;;  %2832 = vmatpush.bf16.msra.mxu0 %v5765_v4  ;;  %v5741_v2 = vor.u32 %v6961_v5, %v5740_v28  ;;  %v5750_v42 = vld [vmem:[#allocation8 + $0x148] sm:$0xf0]  ;;  %v6980_v4 = vld [vmem:[#allocation8 + $0x1d4] sm:$0xf]  ;;  %v5796_v5 = vld [vmem:[#allocation8 + $0x1a0] sm:$0xf] }
 0x602   :  { %v2481_v8 = vadd.f32 %v2435_v56, %v2124_v58  ;;  %v2488_v31 = vadd.f32 %v2480_v27, %v7680_v47  ;;  %v7909_v47 = vld [vmem:[#allocation11 + $0x8] sm:$0x1f]  ;;  %v2515_v53 = vmax.f32 %v2507_v40, 0.0  ;;  %v5820_v40 = vld [vmem:[#allocation8 + $0x1d0] sm:$0xf] }
 0x603   :  { %v2504_v56 = vperm.slane %v7909_v47, 2 }
 0x604   :  { %v2489_v45 = vadd.f32 %v2481_v8, %v7689_v62  ;;  %v2485_v62 = vadd.f32 %v2477_v55, %v7698_v11  ;;  %v2498_v52 = vmul.f32 %v2494_v19, %v2488_v31  ;;  %v5757_v55 = vor.u32 %v6965_v59, %v5756_v57  ;;  %v6957_v57 = vld [vmem:[#allocation8 + $0x114] sm:$0xf0] }
 0x605   :  { %v2453_v20 = vpop.f32.mrf.mxu3  ;;  %v5841_v31 = vor.u32 %v6984_v0, %v5838_v7  ;;  %v5753_v59 = vor.u32 %v6962_v3, %v5750_v42  ;;  %v6956_v0 = vld [vmem:[#allocation8 + $0x114] sm:$0xf]  ;;  %v5726_v7 = vld [vmem:[#allocation8 + $0x118] sm:$0xf0] }
 0x606   :  { %v2473_v22 = vadd.f32 %v2472_v12, %v2453_v20  ;;  %v2499_v13 = vmul.f32 %v2493_v17, %v2489_v45  ;;  %v2495_v35 = vmul.f32 %v2493_v17, %v2485_v62  ;;  %v2496_v12 = vmul.f32 %v2494_v19, %v2486_v33  ;;  %v5774_v20 = vld [vmem:[#allocation8 + $0x178] sm:$0xf0]  ;;  %2833 = vmatpush.bf16.msra.mxu0 %v5757_v55  ;;  %v5836_v62 = vld [vmem:[#allocation8 + $0x1f0] sm:$0xf]  ;;  %v6955_v55 = vld [vmem:[#allocation8 + $0x104] sm:$0xf0] }
 0x607   :  { %v2417_v58 = vpop.f32.mrf.mxu1  ;;  %v2436_v26 = vpop.f32.mrf.mxu2  ;;  %v5777_v38 = vor.u32 %v6968_v18, %v5774_v20  ;;  %v5900_v18 = vld [vmem:[#allocation8 + $0x70] sm:$0xf] }
 0x608   :  { %v2482_v39 = vadd.f32 %v2473_v22, %v2162_v21  ;;  %v2437_v25 = vadd.f32 %v2436_v26, %v2417_v58  ;;  %v2509_v43 = vadd.f32 %v2503_v30, %v2499_v13  ;;  %v2505_v10 = vadd.f32 %v2503_v30, %v2495_v35  ;;  %v6985_v13 = vld [vmem:[#allocation8 + $0x1f4] sm:$0xf0]  ;;  %v5828_v35 = vld [vmem:[#allocation8 + $0x1e0] sm:$0xf] }
 0x609   :  { %v2508_v21 = vadd.f32 %v2504_v56, %v2498_v52  ;;  %v5822_v52 = vld [vmem:[#allocation8 + $0x1d8] sm:$0xf0] }
 0x60a   :  { %v2483_v15 = vadd.f32 %v2437_v25, %v2126_v48  ;;  %v2490_v14 = vadd.f32 %v2482_v39, %v7678_v44  ;;  %v2517_v6 = vmax.f32 %v2509_v43, 0.0  ;;  %v2513_v22 = vmax.f32 %v2505_v10, 0.0  ;;  %v6920_v39 = vld [vmem:[%s8256_s2] sm:$0xff]  ;;  %v7925_v25 = vld [vmem:[%s8256_s2 + $0x8] sm:$0xff]  ;;  %v5732_v43 = vld [vmem:[#allocation8 + $0x120] sm:$0xf] }
 0x60b   :  { %v2506_v48 = vadd.f32 %v2504_v56, %v2496_v12  ;;  %v2516_v41 = vmax.f32 %v2508_v21, 0.0  ;;  %v5812_v10 = vld [vmem:[#allocation8 + $0x1c0] sm:$0xf]  ;;  %v5825_v12 = vor.u32 %v6980_v4, %v5822_v52  ;;  %v6978_v21 = vld [vmem:[#allocation8 + $0x1c4] sm:$0xf] }
 0x60c   :  { %v2491_v11 = vadd.f32 %v2483_v15, %v7702_v23  ;;  %v2500_v44 = vmul.f32 %v2494_v19, %v2490_v14  ;;  %v7917_v26 = vpack.c.bf16 %v2515_v53, %v2513_v22  ;;  %v6964_v14 = vld [vmem:[#allocation8 + $0x154] sm:$0xf]  ;;  %v6979_v53 = vld [vmem:[#allocation8 + $0x1c4] sm:$0xf0]  ;;  %v6936_v22 = vld [vmem:[#allocation8 + $0x74] sm:$0xf0] }
 0x60d   :  { %v2455_v36 = vpop.f32.mrf.mxu3  ;;  %v5956_v4 = vld [vmem:[#allocation8 + $0xe0] sm:$0xf] }
 0x60e   :  { %v2501_v54 = vmul.f32 %v2493_v17, %v2491_v11  ;;  %v2475_v46 = vadd.f32 %v2474_v32, %v2455_v36  ;;  %v2510_v37 = vadd.f32 %v2504_v56, %v2500_v44  ;;  %v5766_v17 = vld [vmem:[#allocation8 + $0x168] sm:$0xf0]  ;;  %v5758_v11 = vld [vmem:[#allocation8 + $0x158] sm:$0xf0]  ;;  %v6983_v36 = vld [vmem:[#allocation8 + $0x1e4] sm:$0xf0]  ;;  %v5833_v44 = vor.u32 %v6982_v9, %v5830_v34 }
 0x60f   :  { %v5829_v33 = vor.u32 %v6983_v36, %v5828_v35  ;;  %v6932_v35 = vld [vmem:[#allocation8 + $0x54] sm:$0xf0]  ;;  %v5788_v36 = vld [vmem:[#allocation8 + $0x190] sm:$0xf]  ;;  %v5780_v34 = vld [vmem:[#allocation8 + $0x180] sm:$0xf] }
 0x610   :  { %v2511_v51 = vadd.f32 %v2503_v30, %v2501_v54  ;;  %v2484_v23 = vadd.f32 %v2475_v46, %v2164_v16  ;;  %v2518_v50 = vmax.f32 %v2510_v37, 0.0  ;;  %v2514_v30 = vmax.f32 %v2506_v48, 0.0  ;;  %v6959_v54 = vld [vmem:[#allocation8 + $0x124] sm:$0xf0] }
 0x611   :  { %v5837_v16 = vor.u32 %v6985_v13, %v5836_v62  ;;  %v5761_v46 = vor.u32 %v6964_v14, %v5758_v11  ;;  %v6976_v62 = vld [vmem:[#allocation8 + $0x1b4] sm:$0xf]  ;;  %v5806_v13 = vld [vmem:[#allocation8 + $0x1b8] sm:$0xf0]  ;;  %v5729_v11 = vor.u32 %v6956_v0, %v5726_v7 }
 0x612   :  { %v2519_v8 = vmax.f32 %v2511_v51, 0.0  ;;  %v2492_v1 = vadd.f32 %v2484_v23, %v7691_v63  ;;  %v6963_v63 = vld [vmem:[#allocation8 + $0x144] sm:$0xf0]  ;;  %v7936_v32 = vpack.c.bf16 %v2516_v41, %v2514_v30  ;;  %v6981_v51 = vld [vmem:[#allocation8 + $0x1d4] sm:$0xf0]  ;;  %v5733_v23 = vor.u32 %v6959_v54, %v5732_v43 }
 0x613   :  { %v5749_v15 = vor.u32 %v6963_v63, %v5748_v24  ;;  %v6958_v24 = vld [vmem:[#allocation8 + $0x124] sm:$0xf]  ;;  %v5734_v63 = vld [vmem:[#allocation8 + $0x128] sm:$0xf0]  ;;  %v5809_v30 = vor.u32 %v6976_v62, %v5806_v13  ;;  %v6971_v43 = vld [vmem:[#allocation8 + $0x184] sm:$0xf0] }
 0x614   :  { %v2502_v49 = vmul.f32 %v2494_v19, %v2492_v1  ;;  %v7913_v61 = vpack.c.bf16 %v2519_v8, %v2517_v6  ;;  %v5769_v19 = vor.u32 %v6966_v29, %v5766_v17  ;;  %v6960_v6 = vld [vmem:[#allocation8 + $0x134] sm:$0xf]  ;;  %v5742_v8 = vld [vmem:[#allocation8 + $0x138] sm:$0xf0]  ;;  %v5821_v1 = vor.u32 %v6981_v51, %v5820_v40  ;;  %v5964_v54 = vld [vmem:[#allocation8 + $0xf0] sm:$0xf] }
 0x615   :  { %2834 = vmatpush.bf16.msra.mxu0 %v5749_v15  ;;  %v5745_v20 = vor.u32 %v6960_v6, %v5742_v8  ;;  %v5901_v17 = vor.u32 %v6936_v22, %v5900_v18  ;;  %v5737_v41 = vor.u32 %v6958_v24, %v5734_v63  ;;  %v6934_v15 = vld [vmem:[#allocation8 + $0x64] sm:$0xf0]  ;;  %v5781_v3 = vor.u32 %v6971_v43, %v5780_v34  ;;  %v6954_v51 = vld [vmem:[#allocation8 + $0x104] sm:$0xf]  ;;  %v6948_v18 = vld [vmem:[#allocation8 + $0xd4] sm:$0xf0] }
 0x616   :  { %v2512_v45 = vadd.f32 %v2504_v56, %v2502_v49  ;;  %2541 = vmatpush.bf16.msra.mxu1 %v7913_v61  ;;  %2614 = vmatpush.bf16.msrb.mxu3 %v7913_v61  ;;  %v5724_v56 = vld [vmem:[#allocation8 + $0x110] sm:$0xf]  ;;  %v5716_v49 = vld [vmem:[#allocation8 + $0x100] sm:$0xf]  ;;  %v6930_v40 = vld [vmem:[#allocation8 + $0x44] sm:$0xf0] }
 0x617   :  { %v5725_v37 = vor.u32 %v6957_v57, %v5724_v56  ;;  %v5717_v48 = vor.u32 %v6955_v55, %v5716_v49  ;;  %v6950_v56 = vld [vmem:[#allocation8 + $0xe4] sm:$0xf0]  ;;  %v6935_v57 = vld [vmem:[#allocation8 + $0x74] sm:$0xf]  ;;  %v5948_v55 = vld [vmem:[#allocation8 + $0xd0] sm:$0xf] }
 0x618   :  { %v2520_v58 = vmax.f32 %v2512_v45, 0.0  ;;  %v5814_v45 = vld [vmem:[#allocation8 + $0x1c8] sm:$0xf0]  ;;  %v5957_v6 = vor.u32 %v6950_v56, %v5956_v4  ;;  %v6972_v22 = vld [vmem:[#allocation8 + $0x194] sm:$0xf] }
 0x619   :  { %2835 = vmatpush.bf16.msra.mxu0 %v5741_v2  ;;  %v5817_v29 = vor.u32 %v6978_v21, %v5814_v45  ;;  %v6973_v2 = vld [vmem:[#allocation8 + $0x194] sm:$0xf0]  ;;  %v5949_v21 = vor.u32 %v6948_v18, %v5948_v55  ;;  %v5894_v45 = vld [vmem:[#allocation8 + $0x68] sm:$0xf0]  ;;  %v5790_v24 = vld [vmem:[#allocation8 + $0x198] sm:$0xf0] }
 0x61a   :  { %2542 = vmatpush.bf16.msra.mxu1 %v7917_v26  ;;  %2615 = vmatpush.bf16.msrb.mxu3 %v7917_v26  ;;  %v7929_v27 = vpack.c.bf16 %v2520_v58, %v2518_v50  ;;  %v5804_v50 = vld [vmem:[#allocation8 + $0x1b0] sm:$0xf]  ;;  %v6977_v58 = vld [vmem:[#allocation8 + $0x1b4] sm:$0xf0]  ;;  %v5789_v9 = vor.u32 %v6973_v2, %v5788_v36  ;;  %v5886_v62 = vld [vmem:[#allocation8 + $0x58] sm:$0xf0] }
 0x61b   :  { %v5805_v28 = vor.u32 %v6977_v58, %v5804_v50  ;;  %v5860_v50 = vld [vmem:[#allocation8 + $0x20] sm:$0xf]  ;;  %v6926_v58 = vld [vmem:[#allocation8 + $0x24] sm:$0xf0]  ;;  %v6970_v13 = vld [vmem:[#allocation8 + $0x184] sm:$0xf] }
 0x61c   :  { %2555 = vmatpush.bf16.msrb.mxu2 %v7929_v27  ;;  %v5878_v2 = vld [vmem:[#allocation8 + $0x48] sm:$0xf0]  ;;  %v6922_v34 = vld [vmem:[#allocation8 + $0x4] sm:$0xf0]  ;;  %v6949_v43 = vld [vmem:[#allocation8 + $0xe4] sm:$0xf] }
 0x61d   :  { %5704 = vmatmul.msk.bf16.vlgmr.msra.gmra.mxu1 %vm178_vm0, %v6920_v39  ;;  %5712 = vmatmul.msk.bf16.vlgmr.msrb.gmra.mxu3 %vm178_vm0, %v7925_v25  ;;  %v5950_v4 = vld [vmem:[#allocation8 + $0xd8] sm:$0xf0]  ;;  %v6938_v55 = vld [vmem:[#allocation8 + $0x84] sm:$0xf0]  ;;  %v6923_v18 = vld [vmem:[#allocation8 + $0x14] sm:$0xf] }
 0x61e   :  { %2859 = vmatpush.bf16.msra.mxu3 %v5777_v38  ;;  %2628 = vmatpush.bf16.msrb.mxu1 %v7929_v27  ;;  %v5813_v38 = vor.u32 %v6979_v53, %v5812_v10  ;;  %v5798_v10 = vld [vmem:[#allocation8 + $0x1a8] sm:$0xf0] }
 0x61f   :  { %2836 = vmatpush.bf16.msra.mxu0 %v5733_v23  ;;  %v5718_v23 = vld [vmem:[#allocation8 + $0x108] sm:$0xf0] }
 0x620   :  { %2556 = vmatpush.bf16.msrb.mxu2 %v7936_v32  ;;  %v5721_v52 = vor.u32 %v6954_v51, %v5718_v23  ;;  %v5870_v51 = vld [vmem:[#allocation8 + $0x38] sm:$0xf0]  ;;  %v6947_v23 = vld [vmem:[#allocation8 + $0xd4] sm:$0xf] }
 0x621   :  { %v5953_v56 = vor.u32 %v6947_v23, %v5950_v4  ;;  %v6022_v4 = vld [vmem:[#allocation8 + $0x258] sm:$0xf0] }
 0x622   :  { %2860 = vmatpush.bf16.msra.mxu3 %v5769_v19  ;;  %2629 = vmatpush.bf16.msrb.mxu1 %v7936_v32  ;;  %v6975_v19 = vld [vmem:[#allocation8 + $0x1a4] sm:$0xf0] }
 0x623   :  { %5705 = vmatmul.msk.bf16.vlgmr.msrb.gmra.mxu2 %vm178_vm0, %v6920_v39  ;;  %2837 = vmatpush.bf16.msra.mxu0 %v5725_v37  ;;  %v5892_v39 = vld [vmem:[#allocation8 + $0x60] sm:$0xf]  ;;  %v6928_v37 = vld [vmem:[#allocation8 + $0x34] sm:$0xf0] }
 0x624   :  { %2845 = vmatpush.bf16.msra.mxu2 %v5837_v16  ;;  %v5893_v14 = vor.u32 %v6934_v15, %v5892_v39  ;;  %v5884_v16 = vld [vmem:[#allocation8 + $0x50] sm:$0xf]  ;;  %v6931_v39 = vld [vmem:[#allocation8 + $0x54] sm:$0xf]  ;;  %v5782_v15 = vld [vmem:[#allocation8 + $0x188] sm:$0xf0] }
 0x625   :  { %v5889_v0 = vor.u32 %v6931_v39, %v5886_v62  ;;  %v5785_v7 = vor.u32 %v6970_v13, %v5782_v15  ;;  %v5918_v62 = vld [vmem:[#allocation8 + $0x98] sm:$0xf0]  ;;  %v6937_v15 = vld [vmem:[#allocation8 + $0x84] sm:$0xf] }
 0x626   :  { %2873 = vmatpush.bf16.msra.mxu1 %v5841_v31  ;;  %2861 = vmatpush.bf16.msra.mxu3 %v5761_v46  ;;  %v5797_v31 = vor.u32 %v6975_v19, %v5796_v5  ;;  %v6952_v46 = vld [vmem:[#allocation8 + $0xf4] sm:$0xf0]  ;;  %v6951_v19 = vld [vmem:[#allocation8 + $0xf4] sm:$0xf] }
 0x627   :  { %2838 = vmatpush.bf16.msra.mxu0 %v5717_v48  ;;  %v5965_v42 = vor.u32 %v6952_v46, %v5964_v54  ;;  %v5861_v48 = vor.u32 %v6926_v58, %v5860_v50  ;;  %v6924_v5 = vld [vmem:[#allocation8 + $0x14] sm:$0xf0]  ;;  %v5958_v46 = vld [vmem:[#allocation8 + $0xe8] sm:$0xf0] }
 0x628   :  { %2846 = vmatpush.bf16.msra.mxu2 %v5829_v33  ;;  %v5876_v33 = vld [vmem:[#allocation8 + $0x40] sm:$0xf]  ;;  %v5846_v50 = vld [vmem:[#allocation8 + $0x8] sm:$0xf0] }
 0x62a   :  { %2874 = vmatpush.bf16.msra.mxu1 %v5833_v44  ;;  %2862 = vmatpush.bf16.msra.mxu3 %v5753_v59  ;;  %v5877_v44 = vor.u32 %v6930_v40, %v5876_v33  ;;  %v5902_v59 = vld [vmem:[#allocation8 + $0x78] sm:$0xf0]  ;;  %v6942_v33 = vld [vmem:[#allocation8 + $0xa4] sm:$0xf0]  ;;  %v6927_v40 = vld [vmem:[#allocation8 + $0x34] sm:$0xf] }
 0x62b   :  { %3047 = vmatpush.bf16.msrb.mxu0 %v5901_v17  ;;  %v5905_v8 = vor.u32 %v6935_v57, %v5902_v59  ;;  %v6946_v17 = vld [vmem:[#allocation8 + $0xc4] sm:$0xf0]  ;;  %v5916_v57 = vld [vmem:[#allocation8 + $0x90] sm:$0xf]  ;;  %v6940_v59 = vld [vmem:[#allocation8 + $0x94] sm:$0xf0] }
 0x62c   :  { %2847 = vmatpush.bf16.msra.mxu2 %v5821_v1  ;;  %v6974_v1 = vld [vmem:[#allocation8 + $0x1a4] sm:$0xf] }
 0x62d   :  { %5713 = vmatmul.msk.bf16.vlgmr.msrb.gmra.mxu1 %vm178_vm0, %v7925_v25  ;;  %v5885_v25 = vor.u32 %v6932_v35, %v5884_v16  ;;  %v5801_v53 = vor.u32 %v6974_v1, %v5798_v10  ;;  %v5932_v16 = vld [vmem:[#allocation8 + $0xb0] sm:$0xf]  ;;  %v6944_v35 = vld [vmem:[#allocation8 + $0xb4] sm:$0xf0]  ;;  %v5862_v1 = vld [vmem:[#allocation8 + $0x28] sm:$0xf0] }
 0x62e   :  { %2875 = vmatpush.bf16.msra.mxu1 %v5825_v12  ;;  %2863 = vmatpush.bf16.msra.mxu3 %v5745_v20  ;;  %v5868_v12 = vld [vmem:[#allocation8 + $0x30] sm:$0xf]  ;;  %v6933_v20 = vld [vmem:[#allocation8 + $0x64] sm:$0xf]  ;;  %v5933_v36 = vor.u32 %v6944_v35, %v5932_v16 }
 0x62f   :  { %3048 = vmatpush.bf16.msrb.mxu0 %v5893_v14  ;;  %v5869_v49 = vor.u32 %v6928_v37, %v5868_v12  ;;  %v5897_v63 = vor.u32 %v6933_v20, %v5894_v45  ;;  %v5966_v14 = vld [vmem:[#allocation8 + $0xf8] sm:$0xf0]  ;;  %v6945_v12 = vld [vmem:[#allocation8 + $0xc4] sm:$0xf] }
 0x630   :  { %2848 = vmatpush.bf16.msra.mxu2 %v5813_v38  ;;  %v5793_v38 = vor.u32 %v6972_v22, %v5790_v24  ;;  %v6943_v22 = vld [vmem:[#allocation8 + $0xb4] sm:$0xf]  ;;  %v5934_v24 = vld [vmem:[#allocation8 + $0xb8] sm:$0xf0] }
 0x632   :  { %2876 = vmatpush.bf16.msra.mxu1 %v5817_v29  ;;  %2864 = vmatpush.bf16.msra.mxu3 %v5737_v41  ;;  %v5940_v29 = vld [vmem:[#allocation8 + $0xc0] sm:$0xf] }
 0x633   :  { %3049 = vmatpush.bf16.msrb.mxu0 %v5885_v25  ;;  %v5941_v41 = vor.u32 %v6946_v17, %v5940_v29  ;;  %v5926_v29 = vld [vmem:[#allocation8 + $0xa8] sm:$0xf0] }
 0x634   :  { %2849 = vmatpush.bf16.msra.mxu2 %v5805_v28  ;;  %v5852_v28 = vld [vmem:[#allocation8 + $0x10] sm:$0xf] }
 0x636   :  { %2877 = vmatpush.bf16.msra.mxu1 %v5809_v30  ;;  %2865 = vmatpush.bf16.msra.mxu3 %v5729_v11  ;;  %v5853_v30 = vor.u32 %v6924_v5, %v5852_v28  ;;  %v5969_v11 = vor.u32 %v6951_v19, %v5966_v14 }
 0x637   :  { %3050 = vmatpush.bf16.msrb.mxu0 %v5877_v44 }
 0x638   :  { %2850 = vmatpush.bf16.msra.mxu2 %v5797_v31  ;;  %v6929_v31 = vld [vmem:[#allocation8 + $0x44] sm:$0xf] }
 0x639   :  { %v5881_v25 = vor.u32 %v6929_v31, %v5878_v2 }
 0x63a   :  { %2866 = vmatpush.bf16.msra.mxu3 %v5721_v52  ;;  %2878 = vmatpush.bf16.msra.mxu1 %v5801_v53  ;;  %v5873_v52 = vor.u32 %v6927_v40, %v5870_v51  ;;  %v5942_v53 = vld [vmem:[#allocation8 + $0xc8] sm:$0xf0]  ;;  %v6020_v40 = vld [vmem:[#allocation8 + $0x250] sm:$0xf]  ;;  %v6997_v51 = vld [vmem:[#allocation8 + $0x254] sm:$0xf] }
 0x63b   :  { %3051 = vmatpush.bf16.msrb.mxu0 %v5869_v49  ;;  %v5945_v37 = vor.u32 %v6945_v12, %v5942_v53  ;;  %v5908_v49 = vld [vmem:[#allocation8 + $0x80] sm:$0xf]  ;;  %v7018_v12 = vld [vmem:[#allocation8 + $0x2f4] sm:$0xf0]  ;;  %v7017_v53 = vld [vmem:[#allocation8 + $0x2f4] sm:$0xf] }
 0x63c   :  { %2851 = vmatpush.bf16.msra.mxu2 %v5789_v9  ;;  %v5844_v9 = vld [vmem:[#allocation8] sm:$0xf]  ;;  %v5909_v20 = vor.u32 %v6938_v55, %v5908_v49  ;;  %v6102_v49 = vld [vmem:[#allocation8 + $0x2f8] sm:$0xf0]  ;;  %v6004_v55 = vld [vmem:[#allocation8 + $0x230] sm:$0xf] }
 0x63d   :  { %v5845_v54 = vor.u32 %v6922_v34, %v5844_v9  ;;  %v6038_v34 = vld [vmem:[#allocation8 + $0x278] sm:$0xf0] }
 0x63e   :  { %3075 = vmatpush.bf16.msrb.mxu3 %v5905_v8  ;;  %2879 = vmatpush.bf16.msra.mxu1 %v5793_v38  ;;  %v5917_v8 = vor.u32 %v6940_v59, %v5916_v57  ;;  %v6921_v38 = vld [vmem:[#allocation8 + $0x4] sm:$0xf]  ;;  %v6996_v57 = vld [vmem:[#allocation8 + $0x244] sm:$0xf0] }
 0x63f   :  { %3052 = vmatpush.bf16.msrb.mxu0 %v5861_v48  ;;  %v5849_v58 = vor.u32 %v6921_v38, %v5846_v50  ;;  %v6941_v48 = vld [vmem:[#allocation8 + $0xa4] sm:$0xf]  ;;  %v7016_v38 = vld [vmem:[#allocation8 + $0x2e4] sm:$0xf0] }
 0x640   :  { %2852 = vmatpush.bf16.msra.mxu2 %v5781_v3  ;;  %v5961_v3 = vor.u32 %v6949_v43, %v5958_v46  ;;  %v5929_v39 = vor.u32 %v6941_v48, %v5926_v29  ;;  %v6028_v43 = vld [vmem:[#allocation8 + $0x260] sm:$0xf]  ;;  %v6999_v46 = vld [vmem:[#allocation8 + $0x264] sm:$0xf]  ;;  %v6094_v29 = vld [vmem:[#allocation8 + $0x2e8] sm:$0xf0] }
 0x641   :  { %v6995_v59 = vld [vmem:[#allocation8 + $0x244] sm:$0xf] }
 0x642   :  { %3076 = vmatpush.bf16.msrb.mxu3 %v5897_v63  ;;  %2880 = vmatpush.bf16.msra.mxu1 %v5785_v7  ;;  %v5937_v63 = vor.u32 %v6943_v22, %v5934_v24  ;;  %v6006_v22 = vld [vmem:[#allocation8 + $0x238] sm:$0xf0]  ;;  %v7015_v50 = vld [vmem:[#allocation8 + $0x2e4] sm:$0xf] }
 0x643   :  { %3053 = vmatpush.bf16.msrb.mxu0 %v5853_v30 }
 0x644   :  { %3061 = vmatpush.bf16.msrb.mxu2 %v5965_v42  ;;  %v5924_v42 = vld [vmem:[#allocation8 + $0xa0] sm:$0xf] }
 0x645   :  { %v5925_v44 = vor.u32 %v6942_v33, %v5924_v42  ;;  %v6030_v42 = vld [vmem:[#allocation8 + $0x268] sm:$0xf0] }
 0x646   :  { %3077 = vmatpush.bf16.msrb.mxu3 %v5889_v0  ;;  %3089 = vmatpush.bf16.msrb.mxu1 %v5969_v11  ;;  %v5910_v0 = vld [vmem:[#allocation8 + $0x88] sm:$0xf0]  ;;  %v6033_v33 = vor.u32 %v6999_v46, %v6030_v42  ;;  %v6988_v46 = vld [vmem:[#allocation8 + $0x204] sm:$0xf0]  ;;  %v6068_v42 = vld [vmem:[#allocation8 + $0x2b0] sm:$0xf] }
 0x647   :  { %3054 = vmatpush.bf16.msrb.mxu0 %v5845_v54  ;;  %v5913_v28 = vor.u32 %v6937_v15, %v5910_v0  ;;  %v7000_v54 = vld [vmem:[#allocation8 + $0x264] sm:$0xf0]  ;;  %v5998_v15 = vld [vmem:[#allocation8 + $0x228] sm:$0xf0] }
 0x648   :  { %3062 = vmatpush.bf16.msrb.mxu2 %v5957_v6  ;;  %v6925_v6 = vld [vmem:[#allocation8 + $0x24] sm:$0xf] }
 0x649   :  { %v5865_v10 = vor.u32 %v6925_v6, %v5862_v1 }
 0x64a   :  { %3078 = vmatpush.bf16.msrb.mxu3 %v5881_v25  ;;  %3090 = vmatpush.bf16.msrb.mxu1 %v5961_v3  ;;  %v7001_v25 = vld [vmem:[#allocation8 + $0x274] sm:$0xf]  ;;  %v6029_v3 = vor.u32 %v7000_v54, %v6028_v43  ;;  %v6078_v43 = vld [vmem:[#allocation8 + $0x2c8] sm:$0xf0]  ;;  %v5980_v54 = vld [vmem:[#allocation8 + $0x200] sm:$0xf] }
 0x64c   :  { %3063 = vmatpush.bf16.msrb.mxu2 %v5949_v21  ;;  %v5854_v21 = vld [vmem:[#allocation8 + $0x18] sm:$0xf0] }
 0x64d   :  { %v5857_v45 = vor.u32 %v6923_v18, %v5854_v21  ;;  %v6994_v18 = vld [vmem:[#allocation8 + $0x234] sm:$0xf0] }
 0x64e   :  { %3079 = vmatpush.bf16.msrb.mxu3 %v5873_v52  ;;  %3091 = vmatpush.bf16.msrb.mxu1 %v5953_v56  ;;  %v6025_v52 = vor.u32 %v6997_v51, %v6022_v4  ;;  %v6012_v56 = vld [vmem:[#allocation8 + $0x240] sm:$0xf]  ;;  %v6005_v21 = vor.u32 %v6994_v18, %v6004_v55  ;;  %v6987_v4 = vld [vmem:[#allocation8 + $0x204] sm:$0xf] }
 0x64f   :  { %v6013_v6 = vor.u32 %v6996_v57, %v6012_v56 }
 0x650   :  { %3064 = vmatpush.bf16.msrb.mxu2 %v5941_v41  ;;  %v6939_v41 = vld [vmem:[#allocation8 + $0x94] sm:$0xf] }
 0x651   :  { %v5921_v13 = vor.u32 %v6939_v41, %v5918_v62  ;;  %v6097_v41 = vor.u32 %v7015_v50, %v6094_v29  ;;  %v7003_v50 = vld [vmem:[#allocation8 + $0x284] sm:$0xf] }
 0x652   :  { %3080 = vmatpush.bf16.msrb.mxu3 %v5865_v10  ;;  %3092 = vmatpush.bf16.msrb.mxu1 %v5945_v37  ;;  %v6100_v10 = vld [vmem:[#allocation8 + $0x2f0] sm:$0xf] }
 0x653   :  { %v6101_v37 = vor.u32 %v7018_v12, %v6100_v10 }
 0x654   :  { %3065 = vmatpush.bf16.msrb.mxu2 %v5933_v36 }
 0x656   :  { %3081 = vmatpush.bf16.msrb.mxu3 %v5857_v45  ;;  %3093 = vmatpush.bf16.msrb.mxu1 %v5937_v63  ;;  %v6993_v45 = vld [vmem:[#allocation8 + $0x234] sm:$0xf]  ;;  %v6092_v63 = vld [vmem:[#allocation8 + $0x2e0] sm:$0xf] }
 0x657   :  { %v6009_v24 = vor.u32 %v6993_v45, %v6006_v22  ;;  %v6093_v48 = vor.u32 %v7016_v38, %v6092_v63  ;;  %v6044_v63 = vld [vmem:[#allocation8 + $0x280] sm:$0xf]  ;;  %v7004_v38 = vld [vmem:[#allocation8 + $0x284] sm:$0xf0] }
 0x658   :  { %3066 = vmatpush.bf16.msrb.mxu2 %v5925_v44  ;;  %v6998_v44 = vld [vmem:[#allocation8 + $0x254] sm:$0xf0] }
 0x659   :  { %v6021_v23 = vor.u32 %v6998_v44, %v6020_v40  ;;  %v7009_v40 = vld [vmem:[#allocation8 + $0x2b4] sm:$0xf]  ;;  %v5981_v44 = vor.u32 %v6988_v46, %v5980_v54 }
 0x65a   :  { %3082 = vmatpush.bf16.msrb.mxu3 %v5849_v58  ;;  %3094 = vmatpush.bf16.msrb.mxu1 %v5929_v39  ;;  %v6992_v39 = vld [vmem:[#allocation8 + $0x224] sm:$0xf0] }
 0x65c   :  { %3067 = vmatpush.bf16.msrb.mxu2 %v5917_v8  ;;  %v6014_v8 = vld [vmem:[#allocation8 + $0x248] sm:$0xf0] }
 0x65d   :  { %v6017_v1 = vor.u32 %v6995_v59, %v6014_v8  ;;  %v6060_v59 = vld [vmem:[#allocation8 + $0x2a0] sm:$0xf]  ;;  %v7007_v8 = vld [vmem:[#allocation8 + $0x2a4] sm:$0xf] }
 0x65e   :  { %3095 = vmatpush.bf16.msrb.mxu1 %v5921_v13  ;;  %v6991_v13 = vld [vmem:[#allocation8 + $0x224] sm:$0xf] }
 0x65f   :  { %v6001_v0 = vor.u32 %v6991_v13, %v5998_v15 }
 0x660   :  { %3068 = vmatpush.bf16.msrb.mxu2 %v5909_v20  ;;  %v6105_v20 = vor.u32 %v7017_v53, %v6102_v49  ;;  %v6062_v53 = vld [vmem:[#allocation8 + $0x2a8] sm:$0xf0]  ;;  %v7006_v49 = vld [vmem:[#allocation8 + $0x294] sm:$0xf0] }
 0x661   :  { %v6065_v18 = vor.u32 %v7007_v8, %v6062_v53 }
 0x662   :  { %3096 = vmatpush.bf16.msrb.mxu1 %v5913_v28  ;;  %v7014_v28 = vld [vmem:[#allocation8 + $0x2d4] sm:$0xf0] }
 0x69a   :  { %v2544_v17 = vpop.f32.mrf.mxu1 }
 0x6a0   :  { %v2617_v7 = vpop.f32.mrf.mxu3 }
 0x6a2   :  { %v2546_v5 = vpop.f32.mrf.mxu1 }
 0x6a3   :  { %v2563_v31 = vpack.c.bf16 %v2546_v5, %v2544_v17  ;;  %v5996_v17 = vld [vmem:[#allocation8 + $0x220] sm:$0xf]  ;;  %v7013_v5 = vld [vmem:[#allocation8 + $0x2d4] sm:$0xf] }
 0x6a4   :  { %v5997_v62 = vor.u32 %v6992_v39, %v5996_v17  ;;  %v6045_v17 = vor.u32 %v7004_v38, %v6044_v63  ;;  %v6046_v39 = vld [vmem:[#allocation8 + $0x288] sm:$0xf0]  ;;  %v7068_v63 = vld [vmem:[#allocation10 + $0x174] sm:$0xf0]  ;;  %v7067_v38 = vld [vmem:[#allocation10 + $0x174] sm:$0xf] }
 0x6a6   :  { %v2558_v35 = vpop.f32.mrf.mxu2 }
 0x6a8   :  { %v2619_v19 = vpop.f32.mrf.mxu3 }
 0x6a9   :  { %v7943_v30 = vpack.c.bf16 %v2619_v19, %v2617_v7  ;;  %v6084_v7 = vld [vmem:[#allocation8 + $0x2d0] sm:$0xf] }
 0x6aa   :  { %v2631_v14 = vpop.f32.mrf.mxu1  ;;  %v6085_v19 = vor.u32 %v7014_v28, %v6084_v7 }
 0x6ab   :  { %2839 = vmatmul.bf16.vlgmr.msra.gmra.mxu0 %v7943_v30  ;;  %2867 = vmatmul.bf16.vlgmr.msra.gmra.mxu3 %v7943_v30 }
 0x6ac   :  { %3120 = vmatpush.bf16.msra.mxu0 %v7913_v61  ;;  %v6986_v61 = vld [vmem:[%s8256_s2 + $0x10] sm:$0xff] }
 0x6ae   :  { %v2560_v36 = vpop.f32.mrf.mxu2 }
 0x6af   :  { %v2564_v2 = vpack.c.bf16 %v2560_v36, %v2558_v35  ;;  %v6990_v35 = vld [vmem:[#allocation8 + $0x214] sm:$0xf0] }
 0x6b0   :  { %3121 = vmatpush.bf16.msra.mxu0 %v7917_v26  ;;  %v6036_v26 = vld [vmem:[#allocation8 + $0x270] sm:$0xf] }
 0x6b2   :  { %v2633_v11 = vpop.f32.mrf.mxu1 }
 0x6b3   :  { %v7949_v16 = vpack.c.bf16 %v2633_v11, %v2631_v14  ;;  %v6086_v14 = vld [vmem:[#allocation8 + $0x2d8] sm:$0xf0]  ;;  %v5988_v11 = vld [vmem:[#allocation8 + $0x210] sm:$0xf] }
 0x6b4   :  { %v5989_v36 = vor.u32 %v6990_v35, %v5988_v11 }
 0x6b5   :  { %2853 = vmatmul.bf16.vlgmr.msra.gmra.mxu2 %v7949_v16  ;;  %2881 = vmatmul.bf16.vlgmr.msra.gmra.mxu1 %v7949_v16 }
 0x6b6   :  { %3134 = vmatpush.bf16.msra.mxu2 %v7929_v27  ;;  %v7002_v27 = vld [vmem:[#allocation8 + $0x274] sm:$0xf0] }
 0x6b7   :  { %v6037_v9 = vor.u32 %v7002_v27, %v6036_v26  ;;  %v6076_v27 = vld [vmem:[#allocation8 + $0x2c0] sm:$0xf] }
 0x6b9   :  { %3337 = vmatpush.bf16.msra.mxu3 %v6037_v9  ;;  %v7011_v9 = vld [vmem:[#allocation8 + $0x2c4] sm:$0xf] }
 0x6ba   :  { %3135 = vmatpush.bf16.msra.mxu2 %v7936_v32  ;;  %v6041_v32 = vor.u32 %v7001_v25, %v6038_v34  ;;  %v7012_v25 = vld [vmem:[#allocation8 + $0x2c4] sm:$0xf0] }
 0x6bb   :  { %3055 = vmatmul.bf16.vlgmr.msrb.gmra.mxu0 %v2563_v31  ;;  %3083 = vmatmul.bf16.vlgmr.msrb.gmra.mxu3 %v2563_v31  ;;  %v6089_v31 = vor.u32 %v7013_v5, %v6086_v14 }
 0x6bc   :  { %3365 = vmatpush.bf16.msra.mxu1 %v6041_v32  ;;  %3351 = vmatpush.bf16.msrb.mxu0 %v6101_v37  ;;  %v6077_v32 = vor.u32 %v7012_v25, %v6076_v27  ;;  %v6052_v37 = vld [vmem:[#allocation8 + $0x290] sm:$0xf] }
 0x6bd   :  { %3338 = vmatpush.bf16.msra.mxu3 %v6029_v3  ;;  %v6081_v3 = vor.u32 %v7011_v9, %v6078_v43  ;;  %v6053_v45 = vor.u32 %v7006_v49, %v6052_v37 }
 0x6c0   :  { %3366 = vmatpush.bf16.msra.mxu1 %v6033_v33  ;;  %3352 = vmatpush.bf16.msrb.mxu0 %v6093_v48  ;;  %v7010_v33 = vld [vmem:[#allocation8 + $0x2b4] sm:$0xf0] }
 0x6c1   :  { %3339 = vmatpush.bf16.msra.mxu3 %v6021_v23  ;;  %v6069_v51 = vor.u32 %v7010_v33, %v6068_v42  ;;  %v6070_v23 = vld [vmem:[#allocation8 + $0x2b8] sm:$0xf0]  ;;  %v7194_v42 = vld [vmem:[%s8266_s12] sm:$0x1f] }
 0x6c2   :  { %v6073_v56 = vor.u32 %v7009_v40, %v6070_v23  ;;  %v3397_v33 = vperm.slane %v7194_v42, 3  ;;  %v7081_v42 = vld [vmem:[#allocation10 + $0x1e4] sm:$0xf] }
 0x6c4   :  { %3367 = vmatpush.bf16.msra.mxu1 %v6025_v52  ;;  %3353 = vmatpush.bf16.msrb.mxu0 %v6085_v19  ;;  %v5982_v52 = vld [vmem:[#allocation8 + $0x208] sm:$0xf0] }
 0x6c5   :  { %3069 = vmatmul.bf16.vlgmr.msrb.gmra.mxu2 %v2564_v2  ;;  %3097 = vmatmul.bf16.vlgmr.msrb.gmra.mxu1 %v2564_v2  ;;  %v6989_v2 = vld [vmem:[#allocation8 + $0x214] sm:$0xf]  ;;  %v5985_v57 = vor.u32 %v6987_v4, %v5982_v52 }
 0x6c6   :  { %3340 = vmatpush.bf16.msra.mxu3 %v6013_v6  ;;  %3379 = vmatpush.bf16.msrb.mxu2 %v6105_v20  ;;  %v7008_v6 = vld [vmem:[#allocation8 + $0x2a4] sm:$0xf0]  ;;  %v7005_v20 = vld [vmem:[#allocation8 + $0x294] sm:$0xf] }
 0x6c7   :  { %v6061_v12 = vor.u32 %v7008_v6, %v6060_v59 }
 0x6c8   :  { %3368 = vmatpush.bf16.msra.mxu1 %v6017_v1  ;;  %3354 = vmatpush.bf16.msrb.mxu0 %v6077_v32 }
 0x6ca   :  { %3341 = vmatpush.bf16.msra.mxu3 %v6005_v21  ;;  %3380 = vmatpush.bf16.msrb.mxu2 %v6097_v41  ;;  %v6054_v21 = vld [vmem:[#allocation8 + $0x298] sm:$0xf0] }
 0x6cb   :  { %5976 = vmatmul.msk.bf16.vlgmr.msra.gmra.mxu0 %vm178_vm0, %v6986_v61 }
 0x6cc   :  { %3369 = vmatpush.bf16.msra.mxu1 %v6009_v24  ;;  %3355 = vmatpush.bf16.msrb.mxu0 %v6069_v51  ;;  %v6057_v24 = vor.u32 %v7005_v20, %v6054_v21  ;;  %v6176_v21 = vld [vmem:[#allocation10 + $0x170] sm:$0xf] }
 0x6ce   :  { %3342 = vmatpush.bf16.msra.mxu3 %v5997_v62  ;;  %3381 = vmatpush.bf16.msrb.mxu2 %v6089_v31  ;;  %v6049_v62 = vor.u32 %v7003_v50, %v6046_v39  ;;  %v6178_v50 = vld [vmem:[#allocation10 + $0x178] sm:$0xf0]  ;;  %v6177_v39 = vor.u32 %v7068_v63, %v6176_v21  ;;  %v6136_v63 = vld [vmem:[#allocation10 + $0x120] sm:$0xf] }
 0x6d0   :  { %3370 = vmatpush.bf16.msra.mxu1 %v6001_v0  ;;  %3356 = vmatpush.bf16.msrb.mxu0 %v6061_v12 }
 0x6d2   :  { %3343 = vmatpush.bf16.msra.mxu3 %v5989_v36  ;;  %3382 = vmatpush.bf16.msrb.mxu2 %v6081_v3 }
 0x6d4   :  { %3357 = vmatpush.bf16.msrb.mxu0 %v6053_v45 }
 0x6d5   :  { %5977 = vmatmul.msk.bf16.vlgmr.msra.gmra.mxu2 %vm178_vm0, %v6986_v61  ;;  %v5990_v61 = vld [vmem:[#allocation8 + $0x218] sm:$0xf0] }
 0x6d6   :  { %v5993_v26 = vor.u32 %v6989_v2, %v5990_v61  ;;  %3344 = vmatpush.bf16.msra.mxu3 %v5981_v44  ;;  %3383 = vmatpush.bf16.msrb.mxu2 %v6073_v56 }
 0x6d8   :  { %3371 = vmatpush.bf16.msra.mxu1 %v5993_v26  ;;  %3358 = vmatpush.bf16.msrb.mxu0 %v6045_v17 }
 0x6da   :  { %3384 = vmatpush.bf16.msrb.mxu2 %v6065_v18  ;;  %v3404_v18 = vperm.slane %v7909_v47, 3  ;;  %v7066_v47 = vld [vmem:[#allocation10 + $0x164] sm:$0xf0] }
 0x6dc   :  { %3372 = vmatpush.bf16.msra.mxu1 %v5985_v57  ;;  %v3403_v57 = vperm.slane %v7902_v60, 3 }
 0x6de   :  { %3385 = vmatpush.bf16.msrb.mxu2 %v6057_v24 }
 0x6e2   :  { %3386 = vmatpush.bf16.msrb.mxu2 %v6049_v62  ;;  %v6181_v62 = vor.u32 %v7067_v38, %v6178_v50  ;;  %v7058_v38 = vld [vmem:[#allocation10 + $0x124] sm:$0xf0] }
 0x728   :  { %v7960_v58 = vpop.f32.mrf.mxu0 }
 0x72e   :  { %v2868_v31 = vpop.f32.mrf.mxu3 }
 0x730   :  { %v2842_v34 = vpop.f32.mrf.mxu0 }
 0x732   :  { %v2882_v36 = vpop.f32.mrf.mxu1 }
 0x733   :  { %v2883_v46 = vadd.f32 %v2882_v36, %v2868_v31  ;;  %v6242_v31 = vld [vmem:[#allocation10 + $0x1f8] sm:$0xf0] }
 0x736   :  { %v2870_v2 = vpop.f32.mrf.mxu3 }
 0x738   :  { %v2854_v1 = vpop.f32.mrf.mxu2  ;;  %v3056_v10 = vpop.f32.mrf.mxu0 }
 0x739   :  { %v2855_v55 = vadd.f32 %v2854_v1, %v7960_v58  ;;  %v7195_v1 = vld [vmem:[%s8266_s12 + $0x8] sm:$0x1f] }
 0x73a   :  { %v2884_v61 = vpop.f32.mrf.mxu1 }
 0x73b   :  { %v3057_v22 = vadd.f32 %v3056_v10, %v2855_v55  ;;  %v2885_v6 = vadd.f32 %v2884_v61, %v2870_v2  ;;  %v3398_v10 = vperm.slane %v7195_v1, 3  ;;  %v6226_v1 = vld [vmem:[#allocation10 + $0x1d8] sm:$0xf0] }
 0x73e   :  { %v3084_v26 = vpop.f32.mrf.mxu3 }
 0x73f   :  { %v3085_v44 = vadd.f32 %v3084_v26, %v2883_v46 }
 0x740   :  { %v2856_v48 = vpop.f32.mrf.mxu2  ;;  %v3058_v29 = vpop.f32.mrf.mxu0 }
 0x741   :  { %v2857_v41 = vadd.f32 %v2856_v48, %v2842_v34 }
 0x742   :  { %v3098_v27 = vpop.f32.mrf.mxu1 }
 0x743   :  { %v3059_v58 = vadd.f32 %v3058_v29, %v2857_v41  ;;  %v3099_v52 = vadd.f32 %v3098_v27, %v3085_v44  ;;  %v6168_v41 = vld [vmem:[#allocation10 + $0x160] sm:$0xf]  ;;  %v6160_v27 = vld [vmem:[#allocation10 + $0x150] sm:$0xf] }
 0x744   :  { %v6169_v36 = vor.u32 %v7066_v47, %v6168_v41  ;;  %v6152_v44 = vld [vmem:[#allocation10 + $0x140] sm:$0xf]  ;;  %v6137_v47 = vor.u32 %v7058_v38, %v6136_v63  ;;  %v6272_v63 = vld [vmem:[#allocation10 + $0x30] sm:$0xf]  ;;  %v7027_v38 = vld [vmem:[#allocation10 + $0x34] sm:$0xf0] }
 0x746   :  { %v3086_v25 = vpop.f32.mrf.mxu3 }
 0x747   :  { %v3087_v53 = vadd.f32 %v3086_v25, %v2885_v6  ;;  %v7064_v25 = vld [vmem:[#allocation10 + $0x154] sm:$0xf0] }
 0x748   :  { %v3070_v13 = vpop.f32.mrf.mxu2  ;;  %v3123_v15 = vpop.f32.mrf.mxu0  ;;  %v7080_v6 = vld [vmem:[#allocation10 + $0x1d4] sm:$0xf0] }
 0x749   :  { %v3071_v0 = vadd.f32 %v3070_v13, %v3057_v22 }
 0x74a   :  { %v3100_v9 = vpop.f32.mrf.mxu1 }
 0x74b   :  { %v3101_v45 = vadd.f32 %v3100_v9, %v3087_v53  ;;  %v7060_v53 = vld [vmem:[#allocation10 + $0x134] sm:$0xf0] }
 0x750   :  { %v3072_v7 = vpop.f32.mrf.mxu2  ;;  %v3125_v28 = vpop.f32.mrf.mxu0 }
 0x751   :  { %v3073_v5 = vadd.f32 %v3072_v7, %v3059_v58  ;;  %v3142_v19 = vpack.c.bf16 %v3125_v28, %v3123_v15  ;;  %v6170_v7 = vld [vmem:[#allocation10 + $0x168] sm:$0xf0]  ;;  %v7052_v28 = vld [vmem:[#allocation2 + $0x8] sm:$0xff] }
 0x753   :  { %3345 = vmatmul.bf16.vlgmr.msra.gmra.mxu3 %v3142_v19  ;;  %3373 = vmatmul.bf16.vlgmr.msra.gmra.mxu1 %v3142_v19  ;;  %v6240_v19 = vld [vmem:[#allocation10 + $0x1f0] sm:$0xf] }
 0x758   :  { %v3137_v14 = vpop.f32.mrf.mxu2 }
 0x760   :  { %v3139_v11 = vpop.f32.mrf.mxu2 }
 0x761   :  { %v3143_v35 = vpack.c.bf16 %v3139_v11, %v3137_v14  ;;  %v7084_v11 = vld [vmem:[#allocation10 + $0x1f4] sm:$0xf0] }
 0x762   :  { %v6241_v9 = vor.u32 %v7084_v11, %v6240_v19  ;;  %v6200_v19 = vld [vmem:[#allocation10 + $0x1a0] sm:$0xf]  ;;  %v6130_v11 = vld [vmem:[#allocation10 + $0x118] sm:$0xf0] }
 0x763   :  { %3359 = vmatmul.bf16.vlgmr.msrb.gmra.mxu0 %v3143_v35  ;;  %3387 = vmatmul.bf16.vlgmr.msrb.gmra.mxu2 %v3143_v35  ;;  %v7083_v35 = vld [vmem:[#allocation10 + $0x1f4] sm:$0xf] }
 0x7d0   :  { %v3374_v54 = vpop.f32.mrf.mxu1 }
 0x7d6   :  { %v3346_v34 = vpop.f32.mrf.mxu3 }
 0x7d8   :  { %v3376_v55 = vpop.f32.mrf.mxu1 }
 0x7de   :  { %v3348_v23 = vpop.f32.mrf.mxu3 }
 0x7e0   :  { %v3360_v32 = vpop.f32.mrf.mxu0 }
 0x7e1   :  { %v3361_v43 = vadd.f32 %v3360_v32, %v3346_v34  ;;  %v6232_v34 = vld [vmem:[#allocation10 + $0x1e0] sm:$0xf]  ;;  %v7063_v32 = vld [vmem:[#allocation10 + $0x154] sm:$0xf] }
 0x7e3   :  { %v3393_v3 = vadd.f32 %v3361_v43, %v3071_v0  ;;  %v7065_v0 = vld [vmem:[#allocation10 + $0x164] sm:$0xf]  ;;  %v6162_v43 = vld [vmem:[#allocation10 + $0x158] sm:$0xf0] }
 0x7e4   :  { %v6173_v2 = vor.u32 %v7065_v0, %v6170_v7  ;;  %v6128_v0 = vld [vmem:[#allocation10 + $0x110] sm:$0xf]  ;;  %v7056_v7 = vld [vmem:[#allocation10 + $0x114] sm:$0xf0] }
 0x7e5   :  { %v3399_v56 = vmul.f32 %v3397_v33, %v3393_v3  ;;  %v7082_v3 = vld [vmem:[#allocation10 + $0x1e4] sm:$0xf0] }
 0x7e6   :  { %v3388_v40 = vpop.f32.mrf.mxu2 }
 0x7e7   :  { %v3389_v51 = vadd.f32 %v3388_v40, %v3374_v54  ;;  %v3405_v37 = vadd.f32 %v3403_v57, %v3399_v56  ;;  %v6245_v54 = vor.u32 %v7083_v35, %v6242_v31  ;;  %v6161_v40 = vor.u32 %v7064_v25, %v6160_v27  ;;  %v7061_v56 = vld [vmem:[#allocation10 + $0x144] sm:$0xf]  ;;  %v7074_v31 = vld [vmem:[#allocation10 + $0x1a4] sm:$0xf0] }
 0x7e8   :  { %v3362_v4 = vpop.f32.mrf.mxu0  ;;  %v7054_v27 = vld [vmem:[#allocation10 + $0x104] sm:$0xf0] }
 0x7e9   :  { %v3363_v59 = vadd.f32 %v3362_v4, %v3348_v23  ;;  %v3394_v8 = vadd.f32 %v3389_v51, %v3099_v52  ;;  %v3409_v48 = vmax.f32 %v3405_v37, 0.0  ;;  %v7062_v51 = vld [vmem:[#allocation10 + $0x144] sm:$0xf0]  ;;  %v6165_v23 = vor.u32 %v7063_v32, %v6162_v43  ;;  %v6224_v52 = vld [vmem:[#allocation10 + $0x1d0] sm:$0xf] }
 0x7ea   :  { %v6233_v4 = vor.u32 %v7082_v3, %v6232_v34  ;;  %v6201_v34 = vor.u32 %v7074_v31, %v6200_v19  ;;  %v7053_v32 = vld [vmem:[#allocation10 + $0x104] sm:$0xf]  ;;  %v6122_v43 = vld [vmem:[#allocation10 + $0x108] sm:$0xf0]  ;;  %v7035_v3 = vld [vmem:[#allocation10 + $0x74] sm:$0xf0] }
 0x7eb   :  { %v3395_v12 = vadd.f32 %v3363_v59, %v3073_v5  ;;  %v3400_v22 = vmul.f32 %v3398_v10, %v3394_v8  ;;  %v7019_v5 = vld [vmem:[#allocation2] sm:$0xff]  ;;  %v7079_v8 = vld [vmem:[#allocation10 + $0x1d4] sm:$0xf]  ;;  %v6290_v19 = vld [vmem:[#allocation10 + $0x58] sm:$0xf0] }
 0x7ec   :  { %v6229_v21 = vor.u32 %v7079_v8, %v6226_v1  ;;  %v6368_v1 = vld [vmem:[#allocation10 + $0xf0] sm:$0xf]  ;;  %v6344_v31 = vld [vmem:[#allocation10 + $0xc0] sm:$0xf] }
 0x7ed   :  { %v3401_v49 = vmul.f32 %v3397_v33, %v3395_v12  ;;  %v3406_v58 = vadd.f32 %v3404_v18, %v3400_v22  ;;  %v6234_v33 = vld [vmem:[#allocation10 + $0x1e8] sm:$0xf0]  ;;  %v6144_v12 = vld [vmem:[#allocation10 + $0x130] sm:$0xf]  ;;  %v7077_v22 = vld [vmem:[#allocation10 + $0x1c4] sm:$0xf] }
 0x7ee   :  { %v3390_v20 = vpop.f32.mrf.mxu2  ;;  %v6237_v59 = vor.u32 %v7081_v42, %v6234_v33  ;;  %v6192_v42 = vld [vmem:[#allocation10 + $0x190] sm:$0xf]  ;;  %v7072_v33 = vld [vmem:[#allocation10 + $0x194] sm:$0xf0] }
 0x7ef   :  { %v3407_v60 = vadd.f32 %v3403_v57, %v3401_v49  ;;  %v3391_v24 = vadd.f32 %v3390_v20, %v3376_v55  ;;  %v3410_v61 = vmax.f32 %v3406_v58, 0.0  ;;  %v6154_v57 = vld [vmem:[#allocation10 + $0x148] sm:$0xf0]  ;;  %v6225_v49 = vor.u32 %v7080_v6, %v6224_v52  ;;  %v6216_v55 = vld [vmem:[#allocation10 + $0x1c0] sm:$0xf] }
 0x7f0   :  { %v6157_v37 = vor.u32 %v7061_v56, %v6154_v57  ;;  %v6146_v20 = vld [vmem:[#allocation10 + $0x138] sm:$0xf0]  ;;  %v7075_v58 = vld [vmem:[#allocation10 + $0x1b4] sm:$0xf]  ;;  %v6296_v52 = vld [vmem:[#allocation10 + $0x60] sm:$0xf]  ;;  %v6193_v56 = vor.u32 %v7072_v33, %v6192_v42 }
 0x7f1   :  { %v3411_v29 = vmax.f32 %v3407_v60, 0.0  ;;  %v3396_v17 = vadd.f32 %v3391_v24, %v3101_v45  ;;  %v7078_v45 = vld [vmem:[#allocation10 + $0x1c4] sm:$0xf0]  ;;  %v6218_v60 = vld [vmem:[#allocation10 + $0x1c8] sm:$0xf0]  ;;  %v6145_v24 = vor.u32 %v7060_v53, %v6144_v12 }
 0x7f2   :  { %v6221_v41 = vor.u32 %v7077_v22, %v6218_v60  ;;  %v7033_v57 = vld [vmem:[#allocation10 + $0x64] sm:$0xf0]  ;;  %v6248_v42 = vld [vmem:[#allocation10] sm:$0xf] }
 0x7f3   :  { %v3402_v13 = vmul.f32 %v3398_v10, %v3396_v17  ;;  %v7971_v15 = vpack.c.bf16 %v3411_v29, %v3409_v48  ;;  %v6153_v10 = vor.u32 %v7062_v51, %v6152_v44  ;;  %v6217_v48 = vor.u32 %v7078_v45, %v6216_v55  ;;  %v6208_v29 = vld [vmem:[#allocation10 + $0x1b0] sm:$0xf]  ;;  %v7057_v17 = vld [vmem:[#allocation10 + $0x124] sm:$0xf]  ;;  %v6306_v44 = vld [vmem:[#allocation10 + $0x78] sm:$0xf0] }
 0x7f4   :  { %v7070_v6 = vld [vmem:[#allocation10 + $0x184] sm:$0xf0]  ;;  %v6297_v12 = vor.u32 %v7033_v57, %v6296_v52  ;;  %v6280_v45 = vld [vmem:[#allocation10 + $0x40] sm:$0xf]  ;;  %v6274_v52 = vld [vmem:[#allocation10 + $0x38] sm:$0xf0] }
 0x7f5   :  { %v3408_v14 = vadd.f32 %v3404_v18, %v3402_v13  ;;  %3433 = vmatpush.bf16.msrb.mxu3 %v7971_v15  ;;  %3506 = vmatpush.bf16.msrb.mxu1 %v7971_v15  ;;  %v7059_v18 = vld [vmem:[#allocation10 + $0x134] sm:$0xf]  ;;  %v6210_v13 = vld [vmem:[#allocation10 + $0x1b8] sm:$0xf0]  ;;  %v7029_v22 = vld [vmem:[#allocation10 + $0x44] sm:$0xf0] }
 0x7f6   :  { %v6149_v50 = vor.u32 %v7059_v18, %v6146_v20  ;;  %v6213_v35 = vor.u32 %v7075_v58, %v6210_v13  ;;  %v6360_v18 = vld [vmem:[#allocation10 + $0xe0] sm:$0xf]  ;;  %v7049_v20 = vld [vmem:[#allocation10 + $0xe4] sm:$0xf0]  ;;  %v7047_v13 = vld [vmem:[#allocation10 + $0xd4] sm:$0xf0] }
 0x7f7   :  { %v3412_v26 = vmax.f32 %v3408_v14, 0.0  ;;  %v7055_v14 = vld [vmem:[#allocation10 + $0x114] sm:$0xf]  ;;  %v6361_v60 = vor.u32 %v7049_v20, %v6360_v18  ;;  %v7021_v33 = vld [vmem:[#allocation10 + $0x4] sm:$0xf0] }
 0x7f8   :  { %6116 = vmatmul.msk.bf16.vlgmr.msrb.gmra.mxu1 %vm3422_vm2, %v7052_v28  ;;  %6110 = vmatmul.msk.bf16.vlgmr.msrb.gmra.mxu3 %vm3422_vm2, %v7019_v5  ;;  %v6133_v25 = vor.u32 %v7055_v14, %v6130_v11  ;;  %v6256_v14 = vld [vmem:[#allocation10 + $0x10] sm:$0xf]  ;;  %v7039_v20 = vld [vmem:[#allocation10 + $0x94] sm:$0xf0] }
 0x7f9   :  { %3722 = vmatpush.bf16.msra.mxu3 %v6177_v39  ;;  %3750 = vmatpush.bf16.msra.mxu1 %v6181_v62  ;;  %v7977_v46 = vpack.c.bf16 %v3412_v26, %v3410_v61  ;;  %v6138_v39 = vld [vmem:[#allocation10 + $0x128] sm:$0xf0]  ;;  %v7076_v62 = vld [vmem:[#allocation10 + $0x1b4] sm:$0xf0]  ;;  %v6129_v61 = vor.u32 %v7056_v7, %v6128_v0  ;;  %v6120_v26 = vld [vmem:[#allocation10 + $0x100] sm:$0xf] }
 0x7fa   :  { %v6121_v51 = vor.u32 %v7054_v27, %v6120_v26  ;;  %v6194_v0 = vld [vmem:[#allocation10 + $0x198] sm:$0xf0]  ;;  %v7069_v26 = vld [vmem:[#allocation10 + $0x184] sm:$0xf]  ;;  %v6186_v27 = vld [vmem:[#allocation10 + $0x188] sm:$0xf0] }
 0x7fb   :  { %3447 = vmatpush.bf16.msra.mxu0 %v7977_v46  ;;  %3520 = vmatpush.bf16.msra.mxu2 %v7977_v46  ;;  %v6320_v18 = vld [vmem:[#allocation10 + $0x90] sm:$0xf] }
 0x7fd   :  { %3723 = vmatpush.bf16.msra.mxu3 %v6169_v36  ;;  %3751 = vmatpush.bf16.msra.mxu1 %v6173_v2  ;;  %v7073_v36 = vld [vmem:[#allocation10 + $0x1a4] sm:$0xf]  ;;  %v6202_v2 = vld [vmem:[#allocation10 + $0x1a8] sm:$0xf0] }
 0x7fe   :  { %6117 = vmatmul.msk.bf16.vlgmr.msra.gmra.mxu2 %vm3422_vm2, %v7052_v28  ;;  %6111 = vmatmul.msk.bf16.vlgmr.msra.gmra.mxu0 %vm3422_vm2, %v7019_v5  ;;  %v6141_v28 = vor.u32 %v7057_v17, %v6138_v39  ;;  %v6209_v5 = vor.u32 %v7076_v62, %v6208_v29  ;;  %v6298_v29 = vld [vmem:[#allocation10 + $0x68] sm:$0xf0]  ;;  %v6264_v39 = vld [vmem:[#allocation10 + $0x20] sm:$0xf]  ;;  %v6352_v62 = vld [vmem:[#allocation10 + $0xd0] sm:$0xf] }
 0x7ff   :  { %3736 = vmatpush.bf16.msrb.mxu0 %v6241_v9  ;;  %3764 = vmatpush.bf16.msrb.mxu2 %v6245_v54  ;;  %v6304_v9 = vld [vmem:[#allocation10 + $0x70] sm:$0xf]  ;;  %v6205_v54 = vor.u32 %v7073_v36, %v6202_v2  ;;  %v6353_v7 = vor.u32 %v7047_v13, %v6352_v62  ;;  %v7045_v36 = vld [vmem:[#allocation10 + $0xc4] sm:$0xf0]  ;;  %v7042_v62 = vld [vmem:[#allocation10 + $0xb4] sm:$0xf] }
 0x800   :  { %v6338_v13 = vld [vmem:[#allocation10 + $0xb8] sm:$0xf0] }
 0x801   :  { %3724 = vmatpush.bf16.msra.mxu3 %v6161_v40  ;;  %3752 = vmatpush.bf16.msra.mxu1 %v6165_v23  ;;  %v7034_v40 = vld [vmem:[#allocation10 + $0x74] sm:$0xf]  ;;  %v6125_v23 = vor.u32 %v7053_v32, %v6122_v43 }
 0x802   :  { %v6309_v8 = vor.u32 %v7034_v40, %v6306_v44  ;;  %v7050_v32 = vld [vmem:[#allocation10 + $0xf4] sm:$0xf]  ;;  %v6336_v40 = vld [vmem:[#allocation10 + $0xb0] sm:$0xf]  ;;  %v6249_v44 = vor.u32 %v7021_v33, %v6248_v42  ;;  %v7085_v42 = vld [vmem:[#allocation2 + $0x10] sm:$0xff] }
 0x803   :  { %3737 = vmatpush.bf16.msrb.mxu0 %v6233_v4  ;;  %3765 = vmatpush.bf16.msrb.mxu2 %v6237_v59  ;;  %v6305_v4 = vor.u32 %v7035_v3, %v6304_v9  ;;  %v6184_v59 = vld [vmem:[#allocation10 + $0x180] sm:$0xf]  ;;  %v7028_v9 = vld [vmem:[#allocation10 + $0x44] sm:$0xf]  ;;  %v7101_v33 = vld [vmem:[#allocation10 + $0x274] sm:$0xf0] }
 0x804   :  { %v6185_v53 = vor.u32 %v7070_v6, %v6184_v59  ;;  %v6362_v59 = vld [vmem:[#allocation10 + $0xe8] sm:$0xf0]  ;;  %v6328_v6 = vld [vmem:[#allocation10 + $0xa0] sm:$0xf] }
 0x805   :  { %3725 = vmatpush.bf16.msra.mxu3 %v6153_v10  ;;  %3753 = vmatpush.bf16.msra.mxu1 %v6157_v37  ;;  %v7051_v10 = vld [vmem:[#allocation10 + $0xf4] sm:$0xf0]  ;;  %v6288_v37 = vld [vmem:[#allocation10 + $0x50] sm:$0xf] }
 0x806   :  { %v6369_v55 = vor.u32 %v7051_v10, %v6368_v1 }
 0x807   :  { %3738 = vmatpush.bf16.msrb.mxu0 %v6225_v49  ;;  %3766 = vmatpush.bf16.msrb.mxu2 %v6229_v21  ;;  %v7031_v49 = vld [vmem:[#allocation10 + $0x54] sm:$0xf0] }
 0x808   :  { %v6289_v21 = vor.u32 %v7031_v49, %v6288_v37  ;;  %v7046_v37 = vld [vmem:[#allocation10 + $0xd4] sm:$0xf] }
 0x809   :  { %3726 = vmatpush.bf16.msra.mxu3 %v6145_v24  ;;  %3754 = vmatpush.bf16.msra.mxu1 %v6149_v50  ;;  %v6281_v24 = vor.u32 %v7029_v22, %v6280_v45  ;;  %v6273_v50 = vor.u32 %v7027_v38, %v6272_v63  ;;  %v6321_v45 = vor.u32 %v7039_v20, %v6320_v18  ;;  %v7022_v22 = vld [vmem:[#allocation10 + $0x14] sm:$0xf]  ;;  %v6346_v38 = vld [vmem:[#allocation10 + $0xc8] sm:$0xf0]  ;;  %v6424_v20 = vld [vmem:[#allocation10 + $0x258] sm:$0xf0] }
 0x80b   :  { %3739 = vmatpush.bf16.msrb.mxu0 %v6217_v48  ;;  %3767 = vmatpush.bf16.msrb.mxu2 %v6221_v41  ;;  %v7032_v48 = vld [vmem:[#allocation10 + $0x64] sm:$0xf]  ;;  %v7025_v41 = vld [vmem:[#allocation10 + $0x24] sm:$0xf0] }
 0x80c   :  { %v6301_v17 = vor.u32 %v7032_v48, %v6298_v29  ;;  %v6265_v58 = vor.u32 %v7025_v41, %v6264_v39  ;;  %v6312_v48 = vld [vmem:[#allocation10 + $0x80] sm:$0xf]  ;;  %v7037_v29 = vld [vmem:[#allocation10 + $0x84] sm:$0xf0]  ;;  %v7020_v39 = vld [vmem:[#allocation10 + $0x4] sm:$0xf] }
 0x80d   :  { %3727 = vmatpush.bf16.msra.mxu3 %v6137_v47  ;;  %3755 = vmatpush.bf16.msra.mxu1 %v6141_v28  ;;  %v7071_v47 = vld [vmem:[#allocation10 + $0x194] sm:$0xf]  ;;  %v6250_v41 = vld [vmem:[#allocation10 + $0x8] sm:$0xf0] }
 0x80e   :  { %v6197_v28 = vor.u32 %v7071_v47, %v6194_v0  ;;  %v6341_v47 = vor.u32 %v7042_v62, %v6338_v13  ;;  %v7040_v0 = vld [vmem:[#allocation10 + $0xa4] sm:$0xf]  ;;  %v6486_v62 = vld [vmem:[#allocation10 + $0x2d0] sm:$0xf]  ;;  %v7112_v13 = vld [vmem:[#allocation10 + $0x2d4] sm:$0xf] }
 0x80f   :  { %3740 = vmatpush.bf16.msrb.mxu0 %v6209_v5  ;;  %3768 = vmatpush.bf16.msrb.mxu2 %v6213_v35  ;;  %v7030_v5 = vld [vmem:[#allocation10 + $0x54] sm:$0xf]  ;;  %v7023_v35 = vld [vmem:[#allocation10 + $0x14] sm:$0xf0] }
 0x810   :  { %v6293_v11 = vor.u32 %v7030_v5, %v6290_v19  ;;  %v6257_v2 = vor.u32 %v7023_v35, %v6256_v14  ;;  %v7038_v5 = vld [vmem:[#allocation10 + $0x94] sm:$0xf]  ;;  %v6322_v19 = vld [vmem:[#allocation10 + $0x98] sm:$0xf0]  ;;  %v7036_v35 = vld [vmem:[#allocation10 + $0x84] sm:$0xf] }
 0x811   :  { %3728 = vmatpush.bf16.msra.mxu3 %v6129_v61  ;;  %3756 = vmatpush.bf16.msra.mxu1 %v6133_v25  ;;  %v6345_v61 = vor.u32 %v7045_v36, %v6344_v31  ;;  %v6189_v25 = vor.u32 %v7069_v26, %v6186_v27  ;;  %v6325_v14 = vor.u32 %v7038_v5, %v6322_v19  ;;  %v6314_v31 = vld [vmem:[#allocation10 + $0x88] sm:$0xf0]  ;;  %v7093_v5 = vld [vmem:[#allocation10 + $0x234] sm:$0xf0]  ;;  %v7092_v19 = vld [vmem:[#allocation10 + $0x234] sm:$0xf] }
 0x812   :  { %v6317_v36 = vor.u32 %v7036_v35, %v6314_v31  ;;  %v6478_v31 = vld [vmem:[#allocation10 + $0x2c0] sm:$0xf] }
 0x813   :  { %3741 = vmatpush.bf16.msrb.mxu0 %v6201_v34  ;;  %3769 = vmatpush.bf16.msrb.mxu2 %v6205_v54  ;;  %v6282_v34 = vld [vmem:[#allocation10 + $0x48] sm:$0xf0]  ;;  %v6370_v54 = vld [vmem:[#allocation10 + $0xf8] sm:$0xf0] }
 0x814   :  { %v6285_v43 = vor.u32 %v7028_v9, %v6282_v34  ;;  %v6373_v3 = vor.u32 %v7050_v32, %v6370_v54 }
 0x815   :  { %3729 = vmatpush.bf16.msra.mxu3 %v6121_v51  ;;  %3757 = vmatpush.bf16.msra.mxu1 %v6125_v23  ;;  %v7043_v51 = vld [vmem:[#allocation10 + $0xb4] sm:$0xf0] }
 0x816   :  { %v6337_v23 = vor.u32 %v7043_v51, %v6336_v40  ;;  %v7100_v40 = vld [vmem:[#allocation10 + $0x274] sm:$0xf]  ;;  %v6440_v51 = vld [vmem:[#allocation10 + $0x278] sm:$0xf0] }
 0x817   :  { %3742 = vmatpush.bf16.msrb.mxu0 %v6193_v56  ;;  %3770 = vmatpush.bf16.msrb.mxu2 %v6197_v28  ;;  %v7048_v56 = vld [vmem:[#allocation10 + $0xe4] sm:$0xf] }
 0x818   :  { %v6365_v1 = vor.u32 %v7048_v56, %v6362_v59  ;;  %v6502_v59 = vld [vmem:[#allocation10 + $0x2f0] sm:$0xf] }
 0x819   :  { %3938 = vmatpush.bf16.msrb.mxu3 %v6305_v4  ;;  %3966 = vmatpush.bf16.msrb.mxu1 %v6309_v8  ;;  %v7026_v4 = vld [vmem:[#allocation10 + $0x34] sm:$0xf]  ;;  %v7041_v8 = vld [vmem:[#allocation10 + $0xa4] sm:$0xf0] }
 0x81a   :  { %v6277_v57 = vor.u32 %v7026_v4, %v6274_v52  ;;  %v6329_v10 = vor.u32 %v7041_v8, %v6328_v6  ;;  %v7099_v4 = vld [vmem:[#allocation10 + $0x264] sm:$0xf0]  ;;  %v7098_v52 = vld [vmem:[#allocation10 + $0x264] sm:$0xf]  ;;  %v7117_v6 = vld [vmem:[#allocation10 + $0x2f4] sm:$0xf0] }
 0x81b   :  { %3743 = vmatpush.bf16.msrb.mxu0 %v6185_v53  ;;  %3771 = vmatpush.bf16.msrb.mxu2 %v6189_v25  ;;  %v6266_v53 = vld [vmem:[#allocation10 + $0x28] sm:$0xf0] }
 0x81d   :  { %3939 = vmatpush.bf16.msrb.mxu3 %v6297_v12  ;;  %3967 = vmatpush.bf16.msrb.mxu1 %v6301_v17  ;;  %v7024_v12 = vld [vmem:[#allocation10 + $0x24] sm:$0xf]  ;;  %v6313_v17 = vor.u32 %v7037_v29, %v6312_v48  ;;  %v7095_v48 = vld [vmem:[#allocation10 + $0x244] sm:$0xf0] }
 0x81e   :  { %v6269_v49 = vor.u32 %v7024_v12, %v6266_v53  ;;  %v6504_v12 = vld [vmem:[#allocation10 + $0x2f8] sm:$0xf0]  ;;  %v7094_v29 = vld [vmem:[#allocation10 + $0x244] sm:$0xf] }
 0x81f   :  { %3952 = vmatpush.bf16.msra.mxu0 %v6369_v55  ;;  %3980 = vmatpush.bf16.msra.mxu2 %v6373_v3  ;;  %v6354_v55 = vld [vmem:[#allocation10 + $0xd8] sm:$0xf0] }
 0x821   :  { %3940 = vmatpush.bf16.msrb.mxu3 %v6289_v21  ;;  %3968 = vmatpush.bf16.msrb.mxu1 %v6293_v11  ;;  %v6357_v21 = vor.u32 %v7046_v37, %v6354_v55  ;;  %v6422_v37 = vld [vmem:[#allocation10 + $0x250] sm:$0xf]  ;;  %v7096_v55 = vld [vmem:[#allocation10 + $0x254] sm:$0xf] }
 0x823   :  { %3953 = vmatpush.bf16.msra.mxu0 %v6361_v60  ;;  %3981 = vmatpush.bf16.msra.mxu2 %v6365_v1  ;;  %v6258_v60 = vld [vmem:[#allocation10 + $0x18] sm:$0xf0]  ;;  %v6503_v1 = vor.u32 %v7117_v6, %v6502_v59  ;;  %v7107_v59 = vld [vmem:[#allocation10 + $0x2a4] sm:$0xf0]  ;;  %v7106_v6 = vld [vmem:[#allocation10 + $0x2a4] sm:$0xf] }
 0x824   :  { %v6261_v63 = vor.u32 %v7022_v22, %v6258_v60  ;;  %v7115_v22 = vld [vmem:[#allocation10 + $0x2e4] sm:$0xf0]  ;;  %v7114_v60 = vld [vmem:[#allocation10 + $0x2e4] sm:$0xf] }
 0x825   :  { %3941 = vmatpush.bf16.msrb.mxu3 %v6281_v24  ;;  %3969 = vmatpush.bf16.msrb.mxu1 %v6285_v43  ;;  %v7044_v24 = vld [vmem:[#allocation10 + $0xc4] sm:$0xf] }
 0x827   :  { %3954 = vmatpush.bf16.msra.mxu0 %v6353_v7  ;;  %3982 = vmatpush.bf16.msra.mxu2 %v6357_v21  ;;  %v6330_v7 = vld [vmem:[#allocation10 + $0xa8] sm:$0xf0]  ;;  %v6427_v21 = vor.u32 %v7096_v55, %v6424_v20  ;;  %v6566_v20 = vld [vmem:[%s8264_s10 + $0x70] sm:$0xf] }
 0x828   :  { %v6333_v28 = vor.u32 %v7040_v0, %v6330_v7  ;;  %v6488_v0 = vld [vmem:[#allocation10 + $0x2d8] sm:$0xf0]  ;;  %v6384_v55 = vld [vmem:[#allocation10 + $0x208] sm:$0xf0] }
 0x829   :  { %3942 = vmatpush.bf16.msrb.mxu3 %v6273_v50  ;;  %3970 = vmatpush.bf16.msrb.mxu1 %v6277_v57  ;;  %v6349_v50 = vor.u32 %v7044_v24, %v6346_v38  ;;  %v6432_v57 = vld [vmem:[#allocation10 + $0x268] sm:$0xf0]  ;;  %v6491_v7 = vor.u32 %v7112_v13, %v6488_v0  ;;  %v6446_v0 = vld [vmem:[#allocation10 + $0x280] sm:$0xf] }
 0x82a   :  { %v6435_v8 = vor.u32 %v7098_v52, %v6432_v57  ;;  %v6392_v52 = vld [vmem:[#allocation10 + $0x218] sm:$0xf0]  ;;  %v6462_v57 = vld [vmem:[#allocation10 + $0x2a0] sm:$0xf] }
 0x82b   :  { %3955 = vmatpush.bf16.msra.mxu0 %v6345_v61  ;;  %3983 = vmatpush.bf16.msra.mxu2 %v6349_v50  ;;  %v6414_v50 = vld [vmem:[#allocation10 + $0x240] sm:$0xf] }
 0x82d   :  { %3943 = vmatpush.bf16.msrb.mxu3 %v6265_v58  ;;  %3971 = vmatpush.bf16.msrb.mxu1 %v6269_v49  ;;  %v6253_v58 = vor.u32 %v7020_v39, %v6250_v41  ;;  %v7097_v49 = vld [vmem:[#allocation10 + $0x254] sm:$0xf0]  ;;  %v6416_v39 = vld [vmem:[#allocation10 + $0x248] sm:$0xf0] }
 0x82e   :  { %v6423_v18 = vor.u32 %v7097_v49, %v6422_v37  ;;  %v6419_v41 = vor.u32 %v7094_v29, %v6416_v39  ;;  %v7086_v49 = vld [vmem:[#allocation10 + $0x204] sm:$0xf]  ;;  %v6456_v29 = vld [vmem:[#allocation10 + $0x298] sm:$0xf0]  ;;  %v6558_v39 = vld [vmem:[%s8264_s10 + $0x60] sm:$0xf] }
 0x82f   :  { %3956 = vmatpush.bf16.msra.mxu0 %v6337_v23  ;;  %3984 = vmatpush.bf16.msra.mxu2 %v6341_v47  ;;  %v6443_v23 = vor.u32 %v7100_v40, %v6440_v51  ;;  %v6472_v40 = vld [vmem:[#allocation10 + $0x2b8] sm:$0xf0]  ;;  %v6390_v51 = vld [vmem:[#allocation10 + $0x210] sm:$0xf] }
 0x831   :  { %3944 = vmatpush.bf16.msrb.mxu3 %v6257_v2  ;;  %3972 = vmatpush.bf16.msrb.mxu1 %v6261_v63  ;;  %v6496_v63 = vld [vmem:[#allocation10 + $0x2e8] sm:$0xf0] }
 0x832   :  { %v6499_v38 = vor.u32 %v7114_v60, %v6496_v63  ;;  %v6568_v60 = vld [vmem:[%s8264_s10 + $0x78] sm:$0xf0]  ;;  %v7105_v63 = vld [vmem:[#allocation10 + $0x294] sm:$0xf0] }
 0x833   :  { %3957 = vmatpush.bf16.msra.mxu0 %v6329_v10  ;;  %3985 = vmatpush.bf16.msra.mxu2 %v6333_v28  ;;  %v7116_v10 = vld [vmem:[#allocation10 + $0x2f4] sm:$0xf]  ;;  %v6406_v28 = vld [vmem:[#allocation10 + $0x230] sm:$0xf] }
 0x834   :  { %v6507_v53 = vor.u32 %v7116_v10, %v6504_v12  ;;  %v6382_v10 = vld [vmem:[#allocation10 + $0x200] sm:$0xf]  ;;  %v7087_v12 = vld [vmem:[#allocation10 + $0x204] sm:$0xf0] }
 0x835   :  { %3945 = vmatpush.bf16.msrb.mxu3 %v6249_v44  ;;  %3973 = vmatpush.bf16.msrb.mxu1 %v6253_v58  ;;  %v7113_v58 = vld [vmem:[#allocation10 + $0x2d4] sm:$0xf0]  ;;  %v6383_v37 = vor.u32 %v7087_v12, %v6382_v10  ;;  %v6616_v12 = vld [vmem:[%s8264_s10 + $0xd8] sm:$0xf0] }
 0x836   :  { %v6487_v47 = vor.u32 %v7113_v58, %v6486_v62  ;;  %v7130_v62 = vld [vmem:[%s8264_s10 + $0x64] sm:$0xf] }
 0x837   :  { %3958 = vmatpush.bf16.msra.mxu0 %v6321_v45  ;;  %3986 = vmatpush.bf16.msra.mxu2 %v6325_v14  ;;  %v6494_v45 = vld [vmem:[#allocation10 + $0x2e0] sm:$0xf]  ;;  %v6407_v14 = vor.u32 %v7093_v5, %v6406_v28 }
 0x838   :  { %v6495_v24 = vor.u32 %v7115_v22, %v6494_v45  ;;  %v7132_v45 = vld [vmem:[%s8264_s10 + $0x74] sm:$0xf] }
 0x83b   :  { %3959 = vmatpush.bf16.msra.mxu0 %v6313_v17  ;;  %3987 = vmatpush.bf16.msra.mxu2 %v6317_v36  ;;  %v6415_v17 = vor.u32 %v7095_v48, %v6414_v50  ;;  %v7111_v36 = vld [vmem:[#allocation10 + $0x2c4] sm:$0xf0]  ;;  %v7104_v48 = vld [vmem:[#allocation10 + $0x294] sm:$0xf] }
 0x875   :  { %v3508_v11 = vpop.f32.mrf.mxu1 }
 0x87b   :  { %v3435_v27 = vpop.f32.mrf.mxu3  ;;  %v3449_v32 = vpop.f32.mrf.mxu0 }
 0x87d   :  { %v3510_v2 = vpop.f32.mrf.mxu1 }
 0x87e   :  { %v3527_v61 = vpack.c.bf16 %v3510_v2, %v3508_v11  ;;  %v6408_v11 = vld [vmem:[#allocation10 + $0x238] sm:$0xf0]  ;;  %v7110_v2 = vld [vmem:[#allocation10 + $0x2c4] sm:$0xf] }
 0x87f   :  { %v6411_v35 = vor.u32 %v7092_v19, %v6408_v11  ;;  %v7102_v19 = vld [vmem:[#allocation10 + $0x284] sm:$0xf]  ;;  %v6630_v11 = vld [vmem:[%s8264_s10 + $0xf0] sm:$0xf] }
 0x880   :  { %3730 = vmatmul.bf16.vlgmr.msra.gmra.mxu3 %v3527_v61  ;;  %3758 = vmatmul.bf16.vlgmr.msra.gmra.mxu1 %v3527_v61  ;;  %v6479_v61 = vor.u32 %v7111_v36, %v6478_v31  ;;  %v7149_v31 = vld [vmem:[%s8264_s10 + $0xf4] sm:$0xf0]  ;;  %v7148_v36 = vld [vmem:[%s8264_s10 + $0xf4] sm:$0xf] }
 0x881   :  { %4012 = vmatpush.bf16.msra.mxu3 %v7971_v15  ;;  %v3522_v26 = vpop.f32.mrf.mxu2  ;;  %v6438_v15 = vld [vmem:[#allocation10 + $0x270] sm:$0xf] }
 0x882   :  { %v6439_v44 = vor.u32 %v7101_v33, %v6438_v15  ;;  %v7108_v15 = vld [vmem:[#allocation10 + $0x2b4] sm:$0xf] }
 0x883   :  { %v3437_v34 = vpop.f32.mrf.mxu3  ;;  %v3451_v54 = vpop.f32.mrf.mxu0 }
 0x884   :  { %v3454_v43 = vpack.c.bf16 %v3437_v34, %v3435_v27  ;;  %v3455_v3 = vpack.c.bf16 %v3451_v54, %v3449_v32  ;;  %4228 = vmatpush.bf16.msra.mxu1 %v6439_v44  ;;  %v7090_v34 = vld [vmem:[#allocation10 + $0x224] sm:$0xf]  ;;  %v6475_v44 = vor.u32 %v7108_v15, %v6472_v40  ;;  %v6624_v40 = vld [vmem:[%s8264_s10 + $0xe8] sm:$0xf0] }
 0x889   :  { %v3524_v25 = vpop.f32.mrf.mxu2 }
 0x88a   :  { %v3528_v9 = vpack.c.bf16 %v3524_v25, %v3522_v26  ;;  %v6480_v26 = vld [vmem:[#allocation10 + $0x2c8] sm:$0xf0]  ;;  %v6398_v25 = vld [vmem:[#allocation10 + $0x220] sm:$0xf] }
 0x88b   :  { %v6483_v27 = vor.u32 %v7110_v2, %v6480_v26  ;;  %v6632_v2 = vld [vmem:[%s8264_s10 + $0xf8] sm:$0xf0] }
 0x88c   :  { %3744 = vmatmul.bf16.vlgmr.msrb.gmra.mxu0 %v3528_v9  ;;  %3772 = vmatmul.bf16.vlgmr.msrb.gmra.mxu2 %v3528_v9  ;;  %v7091_v9 = vld [vmem:[#allocation10 + $0x224] sm:$0xf0]  ;;  %v6635_v26 = vor.u32 %v7148_v36, %v6632_v2  ;;  %v7120_v36 = vld [vmem:[%s8264_s10 + $0x14] sm:$0xf]  ;;  %v6520_v2 = vld [vmem:[%s8264_s10 + $0x18] sm:$0xf0] }
 0x88d   :  { %4026 = vmatpush.bf16.msrb.mxu0 %v7977_v46  ;;  %v6430_v46 = vld [vmem:[#allocation10 + $0x260] sm:$0xf]  ;;  %4242 = vmatpush.bf16.msrb.mxu2 %v6503_v1  ;;  %v6399_v32 = vor.u32 %v7091_v9, %v6398_v25  ;;  %v6464_v1 = vld [vmem:[#allocation10 + $0x2a8] sm:$0xf0]  ;;  %v7128_v9 = vld [vmem:[%s8264_s10 + $0x54] sm:$0xf] }
 0x88e   :  { %v6431_v56 = vor.u32 %v7099_v4, %v6430_v46  ;;  %v7088_v46 = vld [vmem:[#allocation10 + $0x214] sm:$0xf]  ;;  %v7129_v25 = vld [vmem:[%s8264_s10 + $0x54] sm:$0xf0] }
 0x890   :  { %3946 = vmatmul.bf16.vlgmr.msrb.gmra.mxu3 %v3454_v43  ;;  %3974 = vmatmul.bf16.vlgmr.msrb.gmra.mxu1 %v3454_v43  ;;  %v6400_v43 = vld [vmem:[#allocation10 + $0x228] sm:$0xf0] }
 0x891   :  { %4256 = vmatpush.bf16.msrb.mxu3 %v6443_v23  ;;  %4229 = vmatpush.bf16.msra.mxu1 %v6431_v56  ;;  %v6403_v54 = vor.u32 %v7090_v34, %v6400_v43  ;;  %v7089_v23 = vld [vmem:[#allocation10 + $0x214] sm:$0xf0]  ;;  %v6395_v56 = vor.u32 %v7088_v46, %v6392_v52  ;;  %v7127_v46 = vld [vmem:[%s8264_s10 + $0x44] sm:$0xf0] }
 0x892   :  { %4243 = vmatpush.bf16.msrb.mxu2 %v6495_v24  ;;  %v6391_v4 = vor.u32 %v7089_v23, %v6390_v51  ;;  %v6454_v24 = vld [vmem:[#allocation10 + $0x290] sm:$0xf]  ;;  %v6542_v23 = vld [vmem:[%s8264_s10 + $0x40] sm:$0xf] }
 0x893   :  { %v6455_v50 = vor.u32 %v7105_v63, %v6454_v24 }
 0x895   :  { %4257 = vmatpush.bf16.msrb.mxu3 %v6435_v8  ;;  %4230 = vmatpush.bf16.msra.mxu1 %v6423_v18  ;;  %v6463_v8 = vor.u32 %v7107_v59, %v6462_v57  ;;  %v6387_v18 = vor.u32 %v7086_v49, %v6384_v55  ;;  %v6544_v57 = vld [vmem:[%s8264_s10 + $0x48] sm:$0xf0]  ;;  %v7125_v49 = vld [vmem:[%s8264_s10 + $0x34] sm:$0xf0]  ;;  %v7124_v55 = vld [vmem:[%s8264_s10 + $0x34] sm:$0xf] }
 0x896   :  { %4244 = vmatpush.bf16.msrb.mxu2 %v6487_v47  ;;  %v6560_v47 = vld [vmem:[%s8264_s10 + $0x68] sm:$0xf0] }
 0x897   :  { %v6563_v28 = vor.u32 %v7130_v62, %v6560_v47 }
 0x899   :  { %4258 = vmatpush.bf16.msrb.mxu3 %v6427_v21  ;;  %4231 = vmatpush.bf16.msra.mxu1 %v6415_v17  ;;  %v7133_v21 = vld [vmem:[%s8264_s10 + $0x74] sm:$0xf0]  ;;  %v6459_v17 = vor.u32 %v7104_v48, %v6456_v29  ;;  %v6526_v29 = vld [vmem:[%s8264_s10 + $0x20] sm:$0xf] }
 0x89a   :  { %4245 = vmatpush.bf16.msrb.mxu2 %v6479_v61  ;;  %v6567_v22 = vor.u32 %v7133_v21, %v6566_v20  ;;  %v6631_v61 = vor.u32 %v7149_v31, %v6630_v11  ;;  %v6536_v20 = vld [vmem:[%s8264_s10 + $0x38] sm:$0xf0]  ;;  %v7121_v11 = vld [vmem:[%s8264_s10 + $0x14] sm:$0xf0] }
 0x89b   :  { %v6539_v21 = vor.u32 %v7124_v55, %v6536_v20 }
 0x89c   :  { %3960 = vmatmul.bf16.vlgmr.msra.gmra.mxu0 %v3455_v3  ;;  %3988 = vmatmul.bf16.vlgmr.msra.gmra.mxu2 %v3455_v3  ;;  %v6470_v3 = vld [vmem:[#allocation10 + $0x2b0] sm:$0xf] }
 0x89d   :  { %4270 = vmatpush.bf16.msra.mxu0 %v6507_v53  ;;  %4259 = vmatpush.bf16.msrb.mxu3 %v6419_v41  ;;  %v6467_v53 = vor.u32 %v7106_v6, %v6464_v1  ;;  %v7131_v41 = vld [vmem:[%s8264_s10 + $0x64] sm:$0xf0]  ;;  %v6614_v6 = vld [vmem:[%s8264_s10 + $0xd0] sm:$0xf]  ;;  %v7144_v1 = vld [vmem:[%s8264_s10 + $0xd4] sm:$0xf] }
 0x89e   :  { %4232 = vmatpush.bf16.msra.mxu1 %v6407_v14  ;;  %v6559_v13 = vor.u32 %v7131_v41, %v6558_v39  ;;  %v6448_v14 = vld [vmem:[#allocation10 + $0x288] sm:$0xf0] }
 0x89f   :  { %v7122_v39 = vld [vmem:[%s8264_s10 + $0x24] sm:$0xf] }
 0x8a0   :  { %6378 = vmatmul.msk.bf16.vlgmr.msra.gmra.mxu3 %vm3422_vm2, %v7085_v42 }
 0x8a1   :  { %4271 = vmatpush.bf16.msra.mxu0 %v6499_v38  ;;  %4260 = vmatpush.bf16.msrb.mxu3 %v6411_v35  ;;  %v6571_v38 = vor.u32 %v7132_v45, %v6568_v60  ;;  %v6451_v35 = vor.u32 %v7102_v19, %v6448_v14  ;;  %v6606_v45 = vld [vmem:[%s8264_s10 + $0xc0] sm:$0xf]  ;;  %v7142_v60 = vld [vmem:[%s8264_s10 + $0xc4] sm:$0xf]  ;;  %v6600_v19 = vld [vmem:[%s8264_s10 + $0xb8] sm:$0xf0] }
 0x8a2   :  { %4233 = vmatpush.bf16.msra.mxu1 %v6399_v32  ;;  %v6552_v32 = vld [vmem:[%s8264_s10 + $0x58] sm:$0xf0]  ;;  %v6518_v14 = vld [vmem:[%s8264_s10 + $0x10] sm:$0xf] }
 0x8a3   :  { %v6555_v43 = vor.u32 %v7128_v9, %v6552_v32  ;;  %v6519_v31 = vor.u32 %v7121_v11, %v6518_v14  ;;  %v6592_v9 = vld [vmem:[%s8264_s10 + $0xa8] sm:$0xf0]  ;;  %v7156_v11 = vld [vmem:[%s8265_s11 + $0x30] sm:$0xff] }
 0x8a5   :  { %4272 = vmatpush.bf16.msra.mxu0 %v6491_v7  ;;  %4261 = vmatpush.bf16.msrb.mxu3 %v6403_v54  ;;  %v7103_v7 = vld [vmem:[#allocation10 + $0x284] sm:$0xf0] }
 0x8a6   :  { %4234 = vmatpush.bf16.msra.mxu1 %v6391_v4  ;;  %v6447_v5 = vor.u32 %v7103_v7, %v6446_v0  ;;  %v6622_v54 = vld [vmem:[%s8264_s10 + $0xe0] sm:$0xf]  ;;  %v7126_v4 = vld [vmem:[%s8264_s10 + $0x44] sm:$0xf]  ;;  %v6598_v0 = vld [vmem:[%s8264_s10 + $0xb0] sm:$0xf] }
 0x8a7   :  { %v6547_v59 = vor.u32 %v7126_v4, %v6544_v57  ;;  %v7141_v7 = vld [vmem:[%s8264_s10 + $0xb4] sm:$0xf0]  ;;  %v6584_v4 = vld [vmem:[%s8264_s10 + $0x98] sm:$0xf0] }
 0x8a9   :  { %4273 = vmatpush.bf16.msra.mxu0 %v6483_v27  ;;  %4262 = vmatpush.bf16.msrb.mxu3 %v6395_v56  ;;  %v6550_v27 = vld [vmem:[%s8264_s10 + $0x50] sm:$0xf]  ;;  %v6543_v56 = vor.u32 %v7127_v46, %v6542_v23  ;;  %v7136_v46 = vld [vmem:[%s8264_s10 + $0x94] sm:$0xf] }
 0x8aa   :  { %4235 = vmatpush.bf16.msra.mxu1 %v6383_v37  ;;  %v6551_v34 = vor.u32 %v7129_v25, %v6550_v27  ;;  %v6534_v37 = vld [vmem:[%s8264_s10 + $0x30] sm:$0xf]  ;;  %v7139_v27 = vld [vmem:[%s8264_s10 + $0xa4] sm:$0xf0]  ;;  %v7138_v25 = vld [vmem:[%s8264_s10 + $0xa4] sm:$0xf] }
 0x8ab   :  { %v6595_v32 = vor.u32 %v7138_v25, %v6592_v9  ;;  %v7155_v9 = vld [vmem:[%s8265_s11 + $0x28] sm:$0xff] }
 0x8ac   :  { %6379 = vmatmul.msk.bf16.vlgmr.msrb.gmra.mxu0 %vm3422_vm2, %v7085_v42  ;;  %v7109_v42 = vld [vmem:[#allocation10 + $0x2b4] sm:$0xf0] }
 0x8ad   :  { %v6471_v33 = vor.u32 %v7109_v42, %v6470_v3  ;;  %4274 = vmatpush.bf16.msra.mxu0 %v6475_v44  ;;  %4263 = vmatpush.bf16.msrb.mxu3 %v6387_v18  ;;  %v7147_v3 = vld [vmem:[%s8264_s10 + $0xe4] sm:$0xf0]  ;;  %v7146_v42 = vld [vmem:[%s8264_s10 + $0xe4] sm:$0xf]  ;;  %v6535_v18 = vor.u32 %v7125_v49, %v6534_v37 }
 0x8ae   :  { %4480 = vmatpush.bf16.msrb.mxu1 %v6567_v22  ;;  %v6627_v51 = vor.u32 %v7146_v42, %v6624_v40  ;;  %v7143_v22 = vld [vmem:[%s8264_s10 + $0xc4] sm:$0xf0]  ;;  %v6582_v40 = vld [vmem:[%s8264_s10 + $0x90] sm:$0xf] }
 0x8af   :  { %4246 = vmatpush.bf16.msrb.mxu2 %v6471_v33  ;;  %v6623_v33 = vor.u32 %v7147_v3, %v6622_v54  ;;  %v6607_v63 = vor.u32 %v7143_v22, %v6606_v45  ;;  %v7119_v54 = vld [vmem:[%s8264_s10 + $0x4] sm:$0xf0]  ;;  %v7118_v3 = vld [vmem:[%s8264_s10 + $0x4] sm:$0xf] }
 0x8b1   :  { %4275 = vmatpush.bf16.msra.mxu0 %v6467_v53  ;;  %4508 = vmatpush.bf16.msra.mxu3 %v6571_v38  ;;  %v6619_v53 = vor.u32 %v7144_v1, %v6616_v12  ;;  %v6608_v38 = vld [vmem:[%s8264_s10 + $0xc8] sm:$0xf0]  ;;  %v7134_v1 = vld [vmem:[%s8264_s10 + $0x84] sm:$0xf] }
 0x8b2   :  { %4481 = vmatpush.bf16.msrb.mxu1 %v6559_v13  ;;  %v6611_v48 = vor.u32 %v7142_v60, %v6608_v38 }
 0x8b3   :  { %4247 = vmatpush.bf16.msrb.mxu2 %v6463_v8  ;;  %v7145_v8 = vld [vmem:[%s8264_s10 + $0xd4] sm:$0xf0] }
 0x8b4   :  { %v6615_v10 = vor.u32 %v7145_v8, %v6614_v6  ;;  %v6574_v6 = vld [vmem:[%s8264_s10 + $0x80] sm:$0xf]  ;;  %v7135_v8 = vld [vmem:[%s8264_s10 + $0x84] sm:$0xf0] }
 0x8b5   :  { %4276 = vmatpush.bf16.msra.mxu0 %v6459_v17  ;;  %4509 = vmatpush.bf16.msra.mxu3 %v6563_v28  ;;  %v7123_v17 = vld [vmem:[%s8264_s10 + $0x24] sm:$0xf0]  ;;  %v7140_v28 = vld [vmem:[%s8264_s10 + $0xb4] sm:$0xf]  ;;  %v6575_v12 = vor.u32 %v7135_v8, %v6574_v6 }
 0x8b6   :  { %4482 = vmatpush.bf16.msrb.mxu1 %v6551_v34  ;;  %v6527_v62 = vor.u32 %v7123_v17, %v6526_v29 }
 0x8b7   :  { %4248 = vmatpush.bf16.msrb.mxu2 %v6455_v50 }
 0x8b9   :  { %4277 = vmatpush.bf16.msra.mxu0 %v6451_v35  ;;  %4510 = vmatpush.bf16.msra.mxu3 %v6555_v43  ;;  %v6603_v35 = vor.u32 %v7140_v28, %v6600_v19  ;;  %v6510_v43 = vld [vmem:[%s8264_s10] sm:$0xf] }
 0x8ba   :  { %4483 = vmatpush.bf16.msrb.mxu1 %v6543_v56 }
 0x8bb   :  { %4249 = vmatpush.bf16.msrb.mxu2 %v6447_v5  ;;  %v6599_v5 = vor.u32 %v7141_v7, %v6598_v0 }
 0x8bd   :  { %4522 = vmatpush.bf16.msrb.mxu0 %v6635_v26  ;;  %4511 = vmatpush.bf16.msra.mxu3 %v6547_v59  ;;  %v6523_v26 = vor.u32 %v7120_v36, %v6520_v2  ;;  %v6587_v59 = vor.u32 %v7136_v46, %v6584_v4  ;;  %v7162_v46 = vld [vmem:[%s8265_s11 + $0x60] sm:$0xff] }
 0x8be   :  { %4484 = vmatpush.bf16.msrb.mxu1 %v6535_v18 }
 0x8bf   :  { %4494 = vmatpush.bf16.msra.mxu2 %v6631_v61  ;;  %v6590_v61 = vld [vmem:[%s8264_s10 + $0xa0] sm:$0xf] }
 0x8c0   :  { %v6591_v34 = vor.u32 %v7139_v27, %v6590_v61 }
 0x8c1   :  { %4523 = vmatpush.bf16.msrb.mxu0 %v6627_v51  ;;  %4512 = vmatpush.bf16.msra.mxu3 %v6539_v21 }
 0x8c2   :  { %4485 = vmatpush.bf16.msrb.mxu1 %v6527_v62 }
 0x8c3   :  { %4495 = vmatpush.bf16.msra.mxu2 %v6623_v33  ;;  %v6512_v33 = vld [vmem:[%s8264_s10 + $0x8] sm:$0xf0] }
 0x8c4   :  { %v6515_v23 = vor.u32 %v7118_v3, %v6512_v33  ;;  %v7196_v33 = vld [vmem:[%s8266_s12 + $0x8] sm:$0x1f] }
 0x8c5   :  { %4524 = vmatpush.bf16.msrb.mxu0 %v6619_v53 }
 0x8c6   :  { %4486 = vmatpush.bf16.msrb.mxu1 %v6519_v31 }
 0x8c7   :  { %4496 = vmatpush.bf16.msra.mxu2 %v6615_v10  ;;  %v6576_v10 = vld [vmem:[%s8264_s10 + $0x88] sm:$0xf0] }
 0x8c8   :  { %v6579_v53 = vor.u32 %v7134_v1, %v6576_v10 }
 0x8c9   :  { %4525 = vmatpush.bf16.msrb.mxu0 %v6611_v48 }
 0x8cb   :  { %4497 = vmatpush.bf16.msra.mxu2 %v6607_v63 }
 0x8cd   :  { %4526 = vmatpush.bf16.msrb.mxu0 %v6603_v35  ;;  %v7164_v35 = vld [vmem:[%s8265_s11 + $0x70] sm:$0xff] }
 0x8cf   :  { %4498 = vmatpush.bf16.msra.mxu2 %v6599_v5  ;;  %v7165_v5 = vld [vmem:[%s8265_s11 + $0x78] sm:$0xff] }
 0x8d1   :  { %4527 = vmatpush.bf16.msrb.mxu0 %v6595_v32 }
 0x8d3   :  { %4499 = vmatpush.bf16.msra.mxu2 %v6591_v34  ;;  %v7163_v34 = vld [vmem:[%s8265_s11 + $0x68] sm:$0xff] }
 0x8d5   :  { %4528 = vmatpush.bf16.msrb.mxu0 %v6587_v59 }
 0x8d9   :  { %4529 = vmatpush.bf16.msrb.mxu0 %v6579_v53 }
 0x8fd   :  { %v3759_v60 = vpop.f32.mrf.mxu1 }
 0x903   :  { %v3731_v58 = vpop.f32.mrf.mxu3 }
 0x909   :  { %v3745_v15 = vpop.f32.mrf.mxu0 }
 0x90a   :  { %v3746_v44 = vadd.f32 %v3745_v15, %v3731_v58  ;;  %v6528_v58 = vld [vmem:[%s8264_s10 + $0x28] sm:$0xf0]  ;;  %v6511_v15 = vor.u32 %v7119_v54, %v6510_v43 }
 0x90b   :  { %v3733_v52 = vpop.f32.mrf.mxu3  ;;  %v6531_v47 = vor.u32 %v7122_v39, %v6528_v58 }
 0x90c   :  { %4487 = vmatpush.bf16.msrb.mxu1 %v6511_v15 }
 0x90d   :  { %4513 = vmatpush.bf16.msra.mxu3 %v6531_v47 }
 0x90f   :  { %v3773_v63 = vpop.f32.mrf.mxu2 }
 0x910   :  { %v3774_v47 = vadd.f32 %v3773_v63, %v3759_v60 }
 0x911   :  { %v3747_v24 = vpop.f32.mrf.mxu0  ;;  %4514 = vmatpush.bf16.msra.mxu3 %v6523_v26 }
 0x912   :  { %v3748_v50 = vadd.f32 %v3747_v24, %v3733_v52  ;;  %v3761_v24 = vpop.f32.mrf.mxu1 }
 0x913   :  { %v3947_v41 = vpop.f32.mrf.mxu3 }
 0x914   :  { %v3948_v13 = vadd.f32 %v3947_v41, %v3746_v44  ;;  %v7137_v44 = vld [vmem:[%s8264_s10 + $0x94] sm:$0xf0] }
 0x915   :  { %v6583_v57 = vor.u32 %v7137_v44, %v6582_v40  ;;  %4515 = vmatpush.bf16.msra.mxu3 %v6515_v23  ;;  %v4537_v40 = vperm.slane %v7196_v33, 4  ;;  %v7154_v23 = vld [vmem:[%s8265_s11 + $0x20] sm:$0xff] }
 0x917   :  { %4500 = vmatpush.bf16.msra.mxu2 %v6583_v57  ;;  %v7198_v57 = vld [vmem:[%s8266_s12] sm:$0x1f] }
 0x918   :  { %v4536_v59 = vperm.slane %v7198_v57, 4 }
 0x919   :  { %v3961_v42 = vpop.f32.mrf.mxu0 }
 0x91a   :  { %v8161_v51 = vadd.f32 %v3961_v42, %v3948_v13  ;;  %v3975_v38 = vpop.f32.mrf.mxu1 }
 0x91b   :  { %v3949_v52 = vpop.f32.mrf.mxu3  ;;  %4501 = vmatpush.bf16.msra.mxu2 %v6575_v12  ;;  %v3976_v7 = vadd.f32 %v3975_v38, %v3774_v47  ;;  %v7152_v38 = vld [vmem:[%s8265_s11 + $0x10] sm:$0xff] }
 0x91c   :  { %v3950_v56 = vadd.f32 %v3949_v52, %v3748_v50  ;;  %v3775_v50 = vpop.f32.mrf.mxu2  ;;  %v7197_v52 = vld [vmem:[#allocation11 + $0x8] sm:$0x1f] }
 0x91d   :  { %v3776_v31 = vadd.f32 %v3775_v50, %v3761_v24  ;;  %v7160_v50 = vld [vmem:[%s8265_s11 + $0x50] sm:$0xff] }
 0x921   :  { %v3963_v37 = vpop.f32.mrf.mxu0 }
 0x922   :  { %v8181_v49 = vadd.f32 %v3963_v37, %v3950_v56  ;;  %v3977_v48 = vpop.f32.mrf.mxu1  ;;  %v4543_v56 = vperm.slane %v7197_v52, 4 }
 0x923   :  { %v4014_v55 = vpop.f32.mrf.mxu3  ;;  %v3978_v32 = vadd.f32 %v3977_v48, %v3776_v31 }
 0x924   :  { %v3989_v29 = vpop.f32.mrf.mxu2 }
 0x925   :  { %v3990_v19 = vadd.f32 %v3989_v29, %v3976_v7  ;;  %v4554_v7 = vld [vmem:[%s8258_s4] sm:$0x1] }
 0x929   :  { %v4028_v18 = vpop.f32.mrf.mxu0 }
 0x92b   :  { %v4016_v20 = vpop.f32.mrf.mxu3 }
 0x92c   :  { %v4033_v21 = vpack.c.bf16 %v4016_v20, %v4014_v55  ;;  %v3991_v39 = vpop.f32.mrf.mxu2  ;;  %v7153_v55 = vld [vmem:[%s8265_s11 + $0x18] sm:$0xff] }
 0x92d   :  { %v3992_v3 = vadd.f32 %v3991_v39, %v3978_v32 }
 0x92e   :  { %4236 = vmatmul.bf16.vlgmr.msra.gmra.mxu1 %v4033_v21  ;;  %4264 = vmatmul.bf16.vlgmr.msrb.gmra.mxu3 %v4033_v21  ;;  %v7199_v21 = vld [vmem:[#allocation11] sm:$0x1f] }
 0x931   :  { %v4030_v45 = vpop.f32.mrf.mxu0 }
 0x932   :  { %v4034_v22 = vpack.c.bf16 %v4030_v45, %v4028_v18  ;;  %v7161_v18 = vld [vmem:[%s8265_s11 + $0x58] sm:$0xff]  ;;  %v4542_v45 = vperm.slane %v7199_v21, 4 }
 0x934   :  { %4250 = vmatmul.bf16.vlgmr.msrb.gmra.mxu2 %v4034_v22  ;;  %4278 = vmatmul.bf16.vlgmr.msra.gmra.mxu0 %v4034_v22 }
 0x935   :  { %4731 = vmatpush.bf16.msra.mxu0 %v7165_v5  ;;  %v7150_v5 = vld [vmem:[%s8265_s11] sm:$0xff] }
 0x939   :  { %4732 = vmatpush.bf16.msra.mxu0 %v7164_v35 }
 0x93d   :  { %4733 = vmatpush.bf16.msra.mxu0 %v7163_v34 }
 0x93e   :  { %4488 = vmatmul.bf16.vlgmr.msrb.gmra.mxu1 %v7943_v30  ;;  %4516 = vmatmul.bf16.vlgmr.msra.gmra.mxu3 %v7943_v30 }
 0x941   :  { %4734 = vmatpush.bf16.msra.mxu0 %v7162_v46 }
 0x944   :  { %4502 = vmatmul.bf16.vlgmr.msra.gmra.mxu2 %v7949_v16  ;;  %4530 = vmatmul.bf16.vlgmr.msrb.gmra.mxu0 %v7949_v16  ;;  %v7157_v16 = vld [vmem:[%s8265_s11 + $0x38] sm:$0xff] }
 0x945   :  { %4718 = vmatpush.bf16.msrb.mxu3 %v7157_v16  ;;  %4735 = vmatpush.bf16.msra.mxu0 %v7161_v18  ;;  %v7159_v16 = vld [vmem:[%s8265_s11 + $0x48] sm:$0xff] }
 0x949   :  { %4719 = vmatpush.bf16.msrb.mxu3 %v7156_v11  ;;  %4736 = vmatpush.bf16.msra.mxu0 %v7160_v50 }
 0x94d   :  { %4720 = vmatpush.bf16.msrb.mxu3 %v7155_v9  ;;  %4737 = vmatpush.bf16.msra.mxu0 %v7159_v16 }
 0x951   :  { %4721 = vmatpush.bf16.msrb.mxu3 %v7154_v23 }
 0x955   :  { %4722 = vmatpush.bf16.msrb.mxu3 %v7153_v55 }
 0x959   :  { %4723 = vmatpush.bf16.msrb.mxu3 %v7152_v38 }
 0x9ab   :  { %v4237_v17 = vpop.f32.mrf.mxu1 }
 0x9b1   :  { %v4265_v41 = vpop.f32.mrf.mxu3  ;;  %v4279_v62 = vpop.f32.mrf.mxu0 }
 0x9b2   :  { %v4280_v28 = vadd.f32 %v4279_v62, %v4265_v41 }
 0x9b3   :  { %v4239_v58 = vpop.f32.mrf.mxu1 }
 0x9b4   :  { %v4285_v61 = vadd.f32 %v4280_v28, %v3990_v19  ;;  %v7158_v19 = vld [vmem:[%s8265_s11 + $0x40] sm:$0xff] }
 0x9b5   :  { %4738 = vmatpush.bf16.msra.mxu0 %v7158_v19 }
 0x9b7   :  { %v4251_v13 = vpop.f32.mrf.mxu2 }
 0x9b8   :  { %v4252_v36 = vadd.f32 %v4251_v13, %v4237_v17 }
 0x9b9   :  { %v4267_v0 = vpop.f32.mrf.mxu3  ;;  %v4281_v30 = vpop.f32.mrf.mxu0 }
 0x9ba   :  { %v4282_v43 = vadd.f32 %v4281_v30, %v4267_v0  ;;  %v4284_v54 = vadd.f32 %v4252_v36, %v8161_v51 }
 0x9bb   :  { %v4489_v2 = vpop.f32.mrf.mxu1 }
 0x9bc   :  { %v4490_v51 = vadd.f32 %v4489_v2, %v4284_v54  ;;  %v4287_v4 = vadd.f32 %v4282_v43, %v3992_v3 }
 0x9bf   :  { %v4253_v14 = vpop.f32.mrf.mxu2 }
 0x9c0   :  { %v4254_v42 = vadd.f32 %v4253_v14, %v4239_v58  ;;  %v7151_v58 = vld [vmem:[%s8265_s11 + $0x8] sm:$0xff]  ;;  %s4753_s11 = sshll.u32 %s8269_s15, 4  ;;  %s4754_s11 = int_to_ptr.hbm [resolvable:$true] %s4753_s11 }
 0x9c1   :  { %v4517_v26 = vpop.f32.mrf.mxu3  ;;  %v4531_v27 = vpop.f32.mrf.mxu0  ;;  %4724 = vmatpush.bf16.msrb.mxu3 %v7151_v58 }
 0x9c2   :  { %v4518_v25 = vadd.f32 %v4517_v26, %v4285_v61  ;;  %v4286_v1 = vadd.f32 %v4254_v42, %v8181_v49  ;;  %v7179_v26 = vld [vmem:[%s8268_s14] ss:$0 sm:$0xff] }
 0x9c3   :  { %v4491_v53 = vpop.f32.mrf.mxu1 }
 0x9c4   :  { %v4532_v15 = vadd.f32 %v4531_v27, %v4518_v25  ;;  %v4492_v60 = vadd.f32 %v4491_v53, %v4286_v1 }
 0x9c5   :  { %4725 = vmatpush.bf16.msrb.mxu3 %v7150_v5 }
 0x9c6   :  { %v4539_v8 = vmul.f32 %v4537_v40, %v4532_v15 }
 0x9c7   :  { %v4503_v44 = vpop.f32.mrf.mxu2 }
 0x9c8   :  { %v4504_v10 = vadd.f32 %v4503_v44, %v4490_v51  ;;  %v4545_v22 = vadd.f32 %v4543_v56, %v4539_v8 }
 0x9c9   :  { %v4519_v6 = vpop.f32.mrf.mxu3  ;;  %v4533_v37 = vpop.f32.mrf.mxu0 }
 0x9ca   :  { %v4520_v12 = vadd.f32 %v4519_v6, %v4287_v4  ;;  %v4538_v49 = vmul.f32 %v4536_v59, %v4504_v10  ;;  %v4549_v17 = vmax.f32 %v4545_v22, 0.0 }
 0x9cc   :  { %v4534_v20 = vadd.f32 %v4533_v37, %v4520_v12  ;;  %v4544_v39 = vadd.f32 %v4542_v45, %v4538_v49 }
 0x9ce   :  { %v4541_v24 = vmul.f32 %v4537_v40, %v4534_v20  ;;  %v4548_v0 = vmax.f32 %v4544_v39, 0.0 }
 0x9cf   :  { %v4505_v63 = vpop.f32.mrf.mxu2 }
 0x9d0   :  { %v4547_v48 = vadd.f32 %v4543_v56, %v4541_v24  ;;  %v4506_v29 = vadd.f32 %v4505_v63, %v4492_v60 }
 0x9d2   :  { %v4551_v41 = vmax.f32 %v4547_v48, 0.0  ;;  %v4540_v62 = vmul.f32 %v4536_v59, %v4506_v29 }
 0x9d4   :  { %v4553_v13 = vpack.c.bf16 %v4551_v41, %v4549_v17  ;;  %v4546_v47 = vadd.f32 %v4542_v45, %v4540_v62 }
 0x9d6   :  { %v4550_v30 = vmax.f32 %v4546_v47, 0.0  ;;  %4578 = vmatpush.bf16.msrb.mxu2 %v4553_v13 }
 0x9d8   :  { %v4552_v28 = vpack.c.bf16 %v4550_v30, %v4548_v0 }
 0x9d9   :  { %6637 = vmatmul.msk.bf16.vlgmr.msrb.gmra.mxu2 %vm3422_vm2, %v4554_v7 }
 0x9da   :  { %4565 = vmatpush.bf16.msra.mxu1 %v4552_v28 }
 0x9dd   :  { %6636 = vmatmul.msk.bf16.vlgmr.msra.gmra.mxu1 %vm3422_vm2, %v4554_v7 }
 0xa5a   :  { %v4567_v14 = vpop.f32.mrf.mxu1 }
 0xa5b   :  { %v4584_v11 = vpack.c.bf16 %v4567_v14, %v4567_v14 }
 0xa5c   :  { %v4580_v35 = vpop.f32.mrf.mxu2 }
 0xa5d   :  { %4726 = vmatmul.bf16.vlgmr.msrb.gmra.mxu3 %v4584_v11  ;;  %v4585_v31 = vpack.c.bf16 %v4580_v35, %v4580_v35 }
 0xa5f   :  { %4739 = vmatmul.bf16.vlgmr.msra.gmra.mxu0 %v4585_v31 }
 0xa62   :  { %v4569_v36 = vpop.f32.mrf.mxu1 }
 0xa64   :  { %v4582_v2 = vpop.f32.mrf.mxu2 }
 0xadc   :  { %v4740_v61 = vpop.f32.mrf.mxu0 }
 0xae0   :  { %v4727_v27 = vpop.f32.mrf.mxu3 }
 0xae1   :  { %v4728_v25 = vadd.f32 %v7179_v26, %v4727_v27 }
 0xae3   :  { %v4741_v9 = vadd.f32 %v4740_v61, %v4728_v25 }
 0xae4   :  { %v4742_v34 = vpop.f32.mrf.mxu0 }
 0xae5   :  { %4745 = vst.msk [vmem:[#allocation13] sm:$0x3] %vm4744_vm3, %v4741_v9 }
 0xae6   :  { %4756 = dma.vmem_to_hbm [thread:$0]  %s4752_s5, 32, %s4754_s11, [#allocation4]  }
 0xae8   :  { %v4729_v32 = vpop.f32.mrf.mxu3 }
 0xae9   :  { %7376 = dma.done.wait [#allocation4], 32  }
 0xaea   :  { %7377 = vsyncadd [#allocation4], 4294967264 }
 0xaeb   :  { %4761 = vsyncpa [#allocation3], 1 }
 0xaec   :  { %4762 = vsyncpa [#allocation6], 1 }
 0xaed   :  { %4763 = vsyncpa [#allocation9], 1 }
 0xaee   :  { %4764 = vsyncpa [#allocation12], 1 }
 0xaef   :  { %4765 = vsyncpa [#allocation4], 1 }

</bundles_post_ra>
